<compile_context>
chip_gen: v7x
topology: tpu7x:2x2x1
jax: 0.10.0
libtpu: 0.0.40
codegen_flags: <defaults>
</compile_context>

<pallas_src>
import functools

import jax
import jax.numpy as jnp
from jax import lax
from jax.experimental import pallas as pl
from jax.experimental.pallas import tpu as pltpu


def _round_up(x, m):
    return ((x + m - 1) // m) * m


def _num_tensorcores():
    """Best-effort TensorCore count per chip (2 on v7x-class, else 1)."""
    try:
        kind = jax.devices()[0].device_kind.lower()
        return 2 if ("v7" in kind or "7x" in kind) else 1
    except Exception:
        return 1


def _pick_batch_tile(b8, T, H, HP, budget_bytes=40 * 1024 * 1024):
    """Largest batch tile (multiple of 8, capped at 256) fitting the VMEM budget."""
    def vmem_bytes(tb):
        slab = T * tb * 3 * HP * 4              # one direction's gx slab (f32)
        return (2 * slab                        # gxf + gxb scratches
                + slab                          # transient matmul result
                + T * tb * HP * 4               # backward-output scratch
                + 3 * T * tb * H * 2            # embedded block (bf16, bufs+value)
                + 2 * T * tb * H * 4            # output block (f32, 2 bufs)
                + 4 * HP * 3 * HP * 2           # W_hh fwd+bwd (bf16, 2 bufs)
                + 4 * H * 3 * HP * 2)           # W_ih fwd+bwd (bf16, 2 bufs)
    tb = min(b8, 256)
    while tb > 8 and vmem_bytes(tb) > budget_bytes:
        tb -= 8
    return max(tb, 8)


def _bigru_kernel(emb_ref, len_ref, wihf_ref, wihb_ref, bf_ref, bb_ref,
                  whhf_ref, whhb_ref, bhnf_ref, bhnb_ref,
                  out_ref, hid_ref,
                  gxf_ref, gxb_ref, bwd_ref,
                  *, T, TB, H, HP, unroll):
    """Fused bidirectional GRU over one (T, TB) batch tile, all in VMEM.

    PyTorch GRU cell (gate order r, z, n):
      r = sigmoid(x Wir + bir + h Whr + bhr)
      z = sigmoid(x Wiz + biz + h Whz + bhz)
      n = tanh   (x Win + bin + r * (h Whn + bhn))
      h' = (1 - z) * n + z * h
    x-projections (with bir+bhr / biz+bhz / bin folded) are precomputed for all
    timesteps; only bhn stays with the h-projection (inside the r*(...) term).
    """
    # ---- Stage 1: all-timestep input projections, one MXU matmul per
    # direction (bf16 operands, f32 accumulation), stored flat (t-major rows).
    emb2d = emb_ref[...]                                     # (T*TB, H) bf16
    gxf_ref[...] = jnp.dot(emb2d, wihf_ref[...],
                           preferred_element_type=jnp.float32) + bf_ref[...]
    gxb_ref[...] = jnp.dot(emb2d, wihb_ref[...],
                           preferred_element_type=jnp.float32) + bb_ref[...]

    lens = len_ref[...]                                      # (TB, 1) int32
    whh_f = whhf_ref[...]                                    # (HP, 3HP) bf16
    whh_b = whhb_ref[...]
    bhn_f = bhnf_ref[...]                                    # (1, HP) f32
    bhn_b = bhnb_ref[...]

    def gru_cell(gx_t, h, whh, bhn):
        gh = jnp.dot(h.astype(whh.dtype), whh,
                     preferred_element_type=jnp.float32)
        r = jax.nn.sigmoid(gx_t[:, 0:HP] + gh[:, 0:HP])
        z = jax.nn.sigmoid(gx_t[:, HP:2 * HP] + gh[:, HP:2 * HP])
        n = jnp.tanh(gx_t[:, 2 * HP:] + r * (gh[:, 2 * HP:] + bhn))
        return (1.0 - z) * n + z * h

    h0 = jnp.zeros((TB, HP), jnp.float32)

    # ---- Stage 2: fused forward + backward recurrence (iteration i handles
    # fwd step i and bwd step T-1-i). Padded steps (t >= length) freeze the
    # state and contribute 0 to the outputs (packed-sequence semantics).
    def step(i, carry):
        h_f, h_b = carry
        t_f = i
        t_b = T - 1 - i

        m_f = (lens > t_f).astype(jnp.float32)               # (TB, 1)
        m_b = (lens > t_b).astype(jnp.float32)

        gx_f = gxf_ref[pl.ds(pl.multiple_of(t_f * TB, TB), TB), :]
        gx_b = gxb_ref[pl.ds(pl.multiple_of(t_b * TB, TB), TB), :]

        h_f_new = gru_cell(gx_f, h_f, whh_f, bhn_f)
        h_b_new = gru_cell(gx_b, h_b, whh_b, bhn_b)

        out_f = m_f * h_f_new
        out_b = m_b * h_b_new
        out_ref[t_f] = out_f[:, :H]            # forward half, written once
        bwd_ref[t_b] = out_b                   # backward half, into scratch

        h_f = out_f + (1.0 - m_f) * h_f
        h_b = out_b + (1.0 - m_b) * h_b
        return (h_f, h_b)

    h_f, h_b = lax.fori_loop(0, T, step, (h0, h0), unroll=unroll)

    hid_ref[0] = h_f[:, :H]
    hid_ref[1] = h_b[:, :H]
    # Single vectorized pass summing the two directions (no per-step RMW).
    out_ref[...] = out_ref[...] + bwd_ref[:, :, :H]


def init_params(key, vocab_size, hidden_size):
    """Deterministic synthetic parameters (PyTorch-style uniform init)."""
    H = hidden_size
    scale = 1.0 / jnp.sqrt(jnp.float32(H))
    ks = jax.random.split(key, 9)
    u = lambda k, shp: jax.random.uniform(k, shp, jnp.float32, -scale, scale)
    return {
        "embedding": jax.random.normal(ks[0], (vocab_size, H), jnp.float32),
        # Weights stored transposed relative to PyTorch ((H_in, 3H)) so the
        # kernel computes x @ W.  Gate order along the 3H axis: r, z, n.
        "wih_f": u(ks[1], (H, 3 * H)),
        "whh_f": u(ks[2], (H, 3 * H)),
        "bih_f": u(ks[3], (1, 3 * H)),
        "bhh_f": u(ks[4], (1, 3 * H)),
        "wih_b": u(ks[5], (H, 3 * H)),
        "whh_b": u(ks[6], (H, 3 * H)),
        "bih_b": u(ks[7], (1, 3 * H)),
        "bhh_b": u(ks[8], (1, 3 * H)),
    }


def _prepare_kernel_weights(params, H, HP):
    """Pad gates to 128-lane blocks, fold r/z biases, cast matmul weights bf16."""

    def pad_gate_cols(w):                     # (rows, 3H) -> (rows, 3*HP)
        rows = w.shape[0]
        wp = jnp.zeros((rows, 3, HP), w.dtype)
        wp = wp.at[:, :, :H].set(w.reshape(rows, 3, H))
        return wp.reshape(rows, 3 * HP)

    def pad_rows(w):                          # (H, N) -> (HP, N)
        return jnp.zeros((HP, w.shape[1]), w.dtype).at[:H].set(w)

    def fold_bias(bih, bhh):                  # r,z: bih+bhh ; n: bih only
        b = jnp.concatenate([bih[:, :2 * H] + bhh[:, :2 * H], bih[:, 2 * H:]],
                            axis=1)
        return pad_gate_cols(b)               # (1, 3*HP) f32

    def pad_vec(v):                           # (1, H) -> (1, HP)
        return jnp.zeros((1, HP), v.dtype).at[:, :H].set(v)

    wihf = pad_gate_cols(params["wih_f"]).astype(jnp.bfloat16)
    wihb = pad_gate_cols(params["wih_b"]).astype(jnp.bfloat16)
    b_f = fold_bias(params["bih_f"], params["bhh_f"])
    b_b = fold_bias(params["bih_b"], params["bhh_b"])
    whhf = pad_rows(pad_gate_cols(params["whh_f"])).astype(jnp.bfloat16)
    whhb = pad_rows(pad_gate_cols(params["whh_b"])).astype(jnp.bfloat16)
    bhnf = pad_vec(params["bhh_f"][:, 2 * H:])
    bhnb = pad_vec(params["bhh_b"][:, 2 * H:])
    return wihf, wihb, b_f, b_b, whhf, whhb, bhnf, bhnb


def encoder_rnn_forward(input_seq, input_lengths, params):
    """EncoderRNN.forward: embedding -> packed bidirectional GRU -> sum dirs."""
    T, B = input_seq.shape
    H = params["embedding"].shape[1]
    HP = _round_up(max(H, 128), 128)          # lane-dense padded gate width

    # Batch tiling: pad to a sublane multiple, pick the largest tile that fits
    # the VMEM budget (grid is a serial loop on 1-TC chips), and only split
    # further when the chip has 2 TensorCores (v7x) for real core parallelism.
    B8 = _round_up(B, 8)
    TB = _pick_batch_tile(B8, T, H, HP)
    num_cores = _num_tensorcores()
    if num_cores > 1:
        TB = min(TB, max(8, (B8 // num_cores) // 8 * 8))
    nb = -(-B8 // TB)
    B_pad = nb * TB

    unroll = T if T <= 16 else 4

    # TODO(synk): nn.Embedding gather stays in XLA (dynamic row gather has no
    # clean small-shape Pallas equivalent); cast to bf16 for the MXU.
    embedded = params["embedding"][input_seq].astype(jnp.bfloat16)   # (T,B,H)
    lens = input_lengths.astype(jnp.int32)
    if B_pad != B:
        embedded = jnp.pad(embedded, ((0, 0), (0, B_pad - B), (0, 0)))
        lens = jnp.pad(lens, (0, B_pad - B))      # length 0 => fully masked

    # Per-tile, time-major flat rows: tile b holds row t*TB + j == (t, b*TB+j).
    emb_tiles = embedded.reshape(T, nb, TB, H).transpose(1, 0, 2, 3)
    emb_tiles = emb_tiles.reshape(nb, T * TB, H)
    lens2d = lens.reshape(B_pad, 1)

    (wihf, wihb, b_f, b_b, whhf, whhb, bhnf, bhnb) = _prepare_kernel_weights(
        params, H, HP)

    kernel = functools.partial(_bigru_kernel, T=T, TB=TB, H=H, HP=HP,
                               unroll=unroll)
    const = lambda b: (0, 0)

    out_p, hid_p = pl.pallas_call(
        kernel,
        out_shape=(jax.ShapeDtypeStruct((T, B_pad, H), jnp.float32),
                   jax.ShapeDtypeStruct((2, B_pad, H), jnp.float32)),
        grid=(nb,),
        in_specs=[
            pl.BlockSpec((None, T * TB, H), lambda b: (b, 0, 0)),  # embedded
            pl.BlockSpec((TB, 1), lambda b: (b, 0)),               # lengths
            pl.BlockSpec((H, 3 * HP), const),                      # W_ih fwd
            pl.BlockSpec((H, 3 * HP), const),                      # W_ih bwd
            pl.BlockSpec((1, 3 * HP), const),                      # bias fwd
            pl.BlockSpec((1, 3 * HP), const),                      # bias bwd
            pl.BlockSpec((HP, 3 * HP), const),                     # W_hh fwd
            pl.BlockSpec((HP, 3 * HP), const),                     # W_hh bwd
            pl.BlockSpec((1, HP), const),                          # b_hh_n fwd
            pl.BlockSpec((1, HP), const),                          # b_hh_n bwd
        ],
        out_specs=(
            pl.BlockSpec((T, TB, H), lambda b: (0, b, 0)),         # outputs
            pl.BlockSpec((2, TB, H), lambda b: (0, b, 0)),         # hidden
        ),
        scratch_shapes=[
            pltpu.VMEM((T * TB, 3 * HP), jnp.float32),             # gx forward
            pltpu.VMEM((T * TB, 3 * HP), jnp.float32),             # gx backward
            pltpu.VMEM((T, TB, HP), jnp.float32),                  # bwd outputs
        ],
        compiler_params=pltpu.CompilerParams(
            dimension_semantics=("parallel",),
            vmem_limit_bytes=64 * 1024 * 1024),
    )(emb_tiles, lens2d, wihf, wihb, b_f, b_b, whhf, whhb, bhnf, bhnb)

    if B_pad != B:
        out_p = out_p[:, :B, :]
        hid_p = hid_p[:, :B, :]
    return out_p, hid_p


def _reference_forward(input_seq, input_lengths, params):
    """Pure-JAX f32 reference (same semantics) for a correctness check."""
    T, B = input_seq.shape
    H = params["embedding"].shape[1]
    emb = params["embedding"][input_seq]
    mask = (jnp.arange(T)[:, None] < input_lengths[None, :]).astype(jnp.float32)

    def cell(x, h, wih, whh, bih, bhh):
        gx = x @ wih + bih
        gh = h @ whh + bhh
        r = jax.nn.sigmoid(gx[:, :H] + gh[:, :H])
        z = jax.nn.sigmoid(gx[:, H:2 * H] + gh[:, H:2 * H])
        n = jnp.tanh(gx[:, 2 * H:] + r * gh[:, 2 * H:])
        return (1.0 - z) * n + z * h

    def run(direction):
        ts = range(T) if direction == "f" else range(T - 1, -1, -1)
        w = (params[f"wih_{direction}"], params[f"whh_{direction}"],
             params[f"bih_{direction}"], params[f"bhh_{direction}"])
        h = jnp.zeros((B, H), jnp.float32)
        outs = [None] * T
        for t in ts:
            m = mask[t][:, None]
            h_new = cell(emb[t], h, *w)
            outs[t] = m * h_new
            h = m * h_new + (1.0 - m) * h
        return jnp.stack(outs, 0), h

    of, hf = run("f")
    ob, hb = run("b")
    return of + ob, jnp.stack([hf, hb], 0)


if __name__ == "__main__":
    VOCAB, T, B, H = 20, 8, 8, 32

    key = jax.random.PRNGKey(0)
    k_param, k_seq = jax.random.split(key)
    params = init_params(k_param, VOCAB, H)

    input_seq = jax.random.randint(k_seq, (T, B), 0, VOCAB, jnp.int32)
    # pack_padded_sequence requires lengths sorted in decreasing order.
    input_lengths = jnp.array([8, 7, 6, 5, 5, 3, 2, 1], jnp.int32)

    outputs, hidden = jax.block_until_ready(
        encoder_rnn_forward(input_seq, input_lengths, params))

    ref_out, ref_hid = _reference_forward(input_seq, input_lengths, params)
    assert outputs.shape == (T, B, H) and hidden.shape == (2, B, H)
    # bf16 MXU operands with f32 accumulation -> slightly looser tolerance.
    assert jnp.allclose(outputs, ref_out, atol=2e-2, rtol=2e-2)
    assert jnp.allclose(hidden, ref_hid, atol=2e-2, rtol=2e-2)

    print("KERNEL_OK")
</pallas_src>

<mosaic_0001>
module attributes {stable_mosaic.version = 11 : i64} {
  func.func @_bigru_kernel(%arg0: i32, %arg1: memref<1x64x32xbf16, #tpu.memory_space<vmem>>, %arg2: memref<8x1xi32, #tpu.memory_space<vmem>>, %arg3: memref<32x384xbf16, #tpu.memory_space<vmem>>, %arg4: memref<32x384xbf16, #tpu.memory_space<vmem>>, %arg5: memref<1x384xf32, #tpu.memory_space<vmem>>, %arg6: memref<1x384xf32, #tpu.memory_space<vmem>>, %arg7: memref<128x384xbf16, #tpu.memory_space<vmem>>, %arg8: memref<128x384xbf16, #tpu.memory_space<vmem>>, %arg9: memref<1x128xf32, #tpu.memory_space<vmem>>, %arg10: memref<1x128xf32, #tpu.memory_space<vmem>>, %arg11: memref<8x8x32xf32, #tpu.memory_space<vmem>>, %arg12: memref<2x8x32xf32, #tpu.memory_space<vmem>>, %arg13: memref<64x384xf32, #tpu.memory_space<vmem>>, %arg14: memref<64x384xf32, #tpu.memory_space<vmem>>, %arg15: memref<8x8x128xf32, #tpu.memory_space<vmem>>) attributes {dimension_semantics = [#tpu.dimension_semantics<parallel>], iteration_bounds = array<i64: 1>, scalar_prefetch = 0 : i64, scratch_operands = 3 : i64, tpu.core_type = #tpu.core_type<tc>, window_params = [{transform_indices = @transform_0, window_bounds = array<i64: 1, 64, 32>}, {transform_indices = @transform_1, window_bounds = array<i64: 8, 1>}, {pipeline_mode = #tpu.pipeline_mode<synchronous>, transform_indices = @transform_2, window_bounds = array<i64: 32, 384>}, {pipeline_mode = #tpu.pipeline_mode<synchronous>, transform_indices = @transform_3, window_bounds = array<i64: 32, 384>}, {pipeline_mode = #tpu.pipeline_mode<synchronous>, transform_indices = @transform_4, window_bounds = array<i64: 1, 384>}, {pipeline_mode = #tpu.pipeline_mode<synchronous>, transform_indices = @transform_5, window_bounds = array<i64: 1, 384>}, {pipeline_mode = #tpu.pipeline_mode<synchronous>, transform_indices = @transform_6, window_bounds = array<i64: 128, 384>}, {pipeline_mode = #tpu.pipeline_mode<synchronous>, transform_indices = @transform_7, window_bounds = array<i64: 128, 384>}, {pipeline_mode = #tpu.pipeline_mode<synchronous>, transform_indices = @transform_8, window_bounds = array<i64: 1, 128>}, {pipeline_mode = #tpu.pipeline_mode<synchronous>, transform_indices = @transform_9, window_bounds = array<i64: 1, 128>}, {transform_indices = @transform_10, window_bounds = array<i64: 8, 8, 32>}, {transform_indices = @transform_11, window_bounds = array<i64: 2, 8, 32>}]} {
    %c0 = arith.constant 0 : index
    %c0_0 = arith.constant 0 : index
    %c0_1 = arith.constant 0 : index
    %0 = vector.load %arg1[%c0, %c0_0, %c0_1] : memref<1x64x32xbf16, #tpu.memory_space<vmem>>, vector<1x64x32xbf16>
    %1 = vector.shape_cast %0 : vector<1x64x32xbf16> to vector<64x32xbf16>
    %c0_2 = arith.constant 0 : index
    %c0_3 = arith.constant 0 : index
    %2 = vector.load %arg3[%c0_2, %c0_3] : memref<32x384xbf16, #tpu.memory_space<vmem>>, vector<32x384xbf16>
    %cst = arith.constant dense<0.000000e+00> : vector<64x384xf32>
    %3 = tpu.matmul %1, %2, %cst {dimension_numbers = #tpu.dot_dimension_numbers<[1], [0], [0], [1], [0, 0, 1, 1], [], []>} : vector<64x32xbf16>, vector<32x384xbf16>, vector<64x384xf32> -> vector<64x384xf32>
    %c0_4 = arith.constant 0 : index
    %c0_5 = arith.constant 0 : index
    %4 = vector.load %arg5[%c0_4, %c0_5] : memref<1x384xf32, #tpu.memory_space<vmem>>, vector<1x384xf32>
    %5 = vector.broadcast %4 : vector<1x384xf32> to vector<64x384xf32>
    %6 = arith.addf %3, %5 : vector<64x384xf32>
    %c0_6 = arith.constant 0 : index
    %c0_7 = arith.constant 0 : index
    %7 = vector.load %arg13[%c0_6, %c0_7] : memref<64x384xf32, #tpu.memory_space<vmem>>, vector<64x384xf32>
    tpu.vector_store %arg13[%c0_6, %c0_7], %6 {strides = array<i32>} : memref<64x384xf32, #tpu.memory_space<vmem>>, vector<64x384xf32>,
    %c0_8 = arith.constant 0 : index
    %c0_9 = arith.constant 0 : index
    %8 = vector.load %arg4[%c0_8, %c0_9] : memref<32x384xbf16, #tpu.memory_space<vmem>>, vector<32x384xbf16>
    %cst_10 = arith.constant dense<0.000000e+00> : vector<64x384xf32>
    %9 = tpu.matmul %1, %8, %cst_10 {dimension_numbers = #tpu.dot_dimension_numbers<[1], [0], [0], [1], [0, 0, 1, 1], [], []>} : vector<64x32xbf16>, vector<32x384xbf16>, vector<64x384xf32> -> vector<64x384xf32>
    %c0_11 = arith.constant 0 : index
    %c0_12 = arith.constant 0 : index
    %10 = vector.load %arg6[%c0_11, %c0_12] : memref<1x384xf32, #tpu.memory_space<vmem>>, vector<1x384xf32>
    %11 = vector.broadcast %10 : vector<1x384xf32> to vector<64x384xf32>
    %12 = arith.addf %9, %11 : vector<64x384xf32>
    %c0_13 = arith.constant 0 : index
    %c0_14 = arith.constant 0 : index
    %13 = vector.load %arg14[%c0_13, %c0_14] : memref<64x384xf32, #tpu.memory_space<vmem>>, vector<64x384xf32>
    tpu.vector_store %arg14[%c0_13, %c0_14], %12 {strides = array<i32>} : memref<64x384xf32, #tpu.memory_space<vmem>>, vector<64x384xf32>,
    %c0_15 = arith.constant 0 : index
    %c0_16 = arith.constant 0 : index
    %14 = vector.load %arg2[%c0_15, %c0_16] : memref<8x1xi32, #tpu.memory_space<vmem>>, vector<8x1xi32>
    %c0_17 = arith.constant 0 : index
    %c0_18 = arith.constant 0 : index
    %15 = vector.load %arg7[%c0_17, %c0_18] : memref<128x384xbf16, #tpu.memory_space<vmem>>, vector<128x384xbf16>
    %c0_19 = arith.constant 0 : index
    %c0_20 = arith.constant 0 : index
    %16 = vector.load %arg8[%c0_19, %c0_20] : memref<128x384xbf16, #tpu.memory_space<vmem>>, vector<128x384xbf16>
    %c0_21 = arith.constant 0 : index
    %c0_22 = arith.constant 0 : index
    %17 = vector.load %arg9[%c0_21, %c0_22] : memref<1x128xf32, #tpu.memory_space<vmem>>, vector<1x128xf32>
    %c0_23 = arith.constant 0 : index
    %c0_24 = arith.constant 0 : index
    %18 = vector.load %arg10[%c0_23, %c0_24] : memref<1x128xf32, #tpu.memory_space<vmem>>, vector<1x128xf32>
    %cst_25 = arith.constant 0.000000e+00 : f32
    %19 = vector.broadcast %cst_25 : f32 to vector<8x128xf32>
    %c0_i32 = arith.constant 0 : i32
    %c7_i32 = arith.constant 7 : i32
    %20 = arith.subi %c7_i32, %c0_i32 : i32
    %21 = vector.broadcast %c0_i32 : i32 to vector<8x1xi32>
    %22 = arith.cmpi sgt, %14, %21 : vector<8x1xi32>
    %23 = arith.extui %22 : vector<8x1xi1> to vector<8x1xi32>
    %24 = arith.sitofp %23 : vector<8x1xi32> to vector<8x1xf32>
    %25 = vector.broadcast %20 : i32 to vector<8x1xi32>
    %26 = arith.cmpi sgt, %14, %25 : vector<8x1xi32>
    %27 = arith.extui %26 : vector<8x1xi1> to vector<8x1xi32>
    %28 = arith.sitofp %27 : vector<8x1xi32> to vector<8x1xf32>
    %c8_i32 = arith.constant 8 : i32
    %29 = arith.muli %c0_i32, %c8_i32 : i32
    %30 = tpu.assume_multiple %29, 8 : i32
    %31 = arith.index_cast %30 : i32 to index
    %c0_26 = arith.constant 0 : index
    %32 = vector.load %arg13[%31, %c0_26] : memref<64x384xf32, #tpu.memory_space<vmem>>, vector<8x384xf32>
    %c8_i32_27 = arith.constant 8 : i32
    %33 = arith.muli %20, %c8_i32_27 : i32
    %34 = tpu.assume_multiple %33, 8 : i32
    %35 = arith.index_cast %34 : i32 to index
    %c0_28 = arith.constant 0 : index
    %36 = vector.load %arg14[%35, %c0_28] : memref<64x384xf32, #tpu.memory_space<vmem>>, vector<8x384xf32>
    %37 = arith.truncf %19 : vector<8x128xf32> to vector<8x128xbf16>
    %cst_29 = arith.constant dense<0.000000e+00> : vector<8x384xf32>
    %38 = tpu.matmul %37, %15, %cst_29 {dimension_numbers = #tpu.dot_dimension_numbers<[1], [0], [0], [1], [0, 0, 1, 1], [], []>} : vector<8x128xbf16>, vector<128x384xbf16>, vector<8x384xf32> -> vector<8x384xf32>
    %39 = vector.extract_strided_slice %32 {offsets = [0, 0], sizes = [8, 128], strides = [1, 1]} : vector<8x384xf32> to vector<8x128xf32>
    %40 = vector.extract_strided_slice %38 {offsets = [0, 0], sizes = [8, 128], strides = [1, 1]} : vector<8x384xf32> to vector<8x128xf32>
    %41 = arith.addf %39, %40 : vector<8x128xf32>
    %42 = arith.negf %41 : vector<8x128xf32>
    %43 = math.exp %42 : vector<8x128xf32>
    %cst_30 = arith.constant 1.000000e+00 : f32
    %44 = vector.broadcast %cst_30 : f32 to vector<8x128xf32>
    %45 = arith.addf %44, %43 : vector<8x128xf32>
    %46 = arith.divf %44, %45 : vector<8x128xf32>
    %47 = vector.extract_strided_slice %32 {offsets = [0, 128], sizes = [8, 128], strides = [1, 1]} : vector<8x384xf32> to vector<8x128xf32>
    %48 = vector.extract_strided_slice %38 {offsets = [0, 128], sizes = [8, 128], strides = [1, 1]} : vector<8x384xf32> to vector<8x128xf32>
    %49 = arith.addf %47, %48 : vector<8x128xf32>
    %50 = arith.negf %49 : vector<8x128xf32>
    %51 = math.exp %50 : vector<8x128xf32>
    %cst_31 = arith.constant 1.000000e+00 : f32
    %52 = vector.broadcast %cst_31 : f32 to vector<8x128xf32>
    %53 = arith.addf %52, %51 : vector<8x128xf32>
    %54 = arith.divf %52, %53 : vector<8x128xf32>
    %55 = vector.extract_strided_slice %32 {offsets = [0, 256], sizes = [8, 128], strides = [1, 1]} : vector<8x384xf32> to vector<8x128xf32>
    %56 = vector.extract_strided_slice %38 {offsets = [0, 256], sizes = [8, 128], strides = [1, 1]} : vector<8x384xf32> to vector<8x128xf32>
    %57 = vector.broadcast %17 : vector<1x128xf32> to vector<8x128xf32>
    %58 = arith.addf %56, %57 : vector<8x128xf32>
    %59 = arith.mulf %46, %58 : vector<8x128xf32>
    %60 = arith.addf %55, %59 : vector<8x128xf32>
    %61 = math.tanh %60 : vector<8x128xf32>
    %cst_32 = arith.constant 1.000000e+00 : f32
    %62 = vector.broadcast %cst_32 : f32 to vector<8x128xf32>
    %63 = arith.subf %62, %54 : vector<8x128xf32>
    %64 = arith.mulf %63, %61 : vector<8x128xf32>
    %65 = arith.mulf %54, %19 : vector<8x128xf32>
    %66 = arith.addf %64, %65 : vector<8x128xf32>
    %67 = arith.truncf %19 : vector<8x128xf32> to vector<8x128xbf16>
    %cst_33 = arith.constant dense<0.000000e+00> : vector<8x384xf32>
    %68 = tpu.matmul %67, %16, %cst_33 {dimension_numbers = #tpu.dot_dimension_numbers<[1], [0], [0], [1], [0, 0, 1, 1], [], []>} : vector<8x128xbf16>, vector<128x384xbf16>, vector<8x384xf32> -> vector<8x384xf32>
    %69 = vector.extract_strided_slice %36 {offsets = [0, 0], sizes = [8, 128], strides = [1, 1]} : vector<8x384xf32> to vector<8x128xf32>
    %70 = vector.extract_strided_slice %68 {offsets = [0, 0], sizes = [8, 128], strides = [1, 1]} : vector<8x384xf32> to vector<8x128xf32>
    %71 = arith.addf %69, %70 : vector<8x128xf32>
    %72 = arith.negf %71 : vector<8x128xf32>
    %73 = math.exp %72 : vector<8x128xf32>
    %cst_34 = arith.constant 1.000000e+00 : f32
    %74 = vector.broadcast %cst_34 : f32 to vector<8x128xf32>
    %75 = arith.addf %74, %73 : vector<8x128xf32>
    %76 = arith.divf %74, %75 : vector<8x128xf32>
    %77 = vector.extract_strided_slice %36 {offsets = [0, 128], sizes = [8, 128], strides = [1, 1]} : vector<8x384xf32> to vector<8x128xf32>
    %78 = vector.extract_strided_slice %68 {offsets = [0, 128], sizes = [8, 128], strides = [1, 1]} : vector<8x384xf32> to vector<8x128xf32>
    %79 = arith.addf %77, %78 : vector<8x128xf32>
    %80 = arith.negf %79 : vector<8x128xf32>
    %81 = math.exp %80 : vector<8x128xf32>
    %cst_35 = arith.constant 1.000000e+00 : f32
    %82 = vector.broadcast %cst_35 : f32 to vector<8x128xf32>
    %83 = arith.addf %82, %81 : vector<8x128xf32>
    %84 = arith.divf %82, %83 : vector<8x128xf32>
    %85 = vector.extract_strided_slice %36 {offsets = [0, 256], sizes = [8, 128], strides = [1, 1]} : vector<8x384xf32> to vector<8x128xf32>
    %86 = vector.extract_strided_slice %68 {offsets = [0, 256], sizes = [8, 128], strides = [1, 1]} : vector<8x384xf32> to vector<8x128xf32>
    %87 = vector.broadcast %18 : vector<1x128xf32> to vector<8x128xf32>
    %88 = arith.addf %86, %87 : vector<8x128xf32>
    %89 = arith.mulf %76, %88 : vector<8x128xf32>
    %90 = arith.addf %85, %89 : vector<8x128xf32>
    %91 = math.tanh %90 : vector<8x128xf32>
    %cst_36 = arith.constant 1.000000e+00 : f32
    %92 = vector.broadcast %cst_36 : f32 to vector<8x128xf32>
    %93 = arith.subf %92, %84 : vector<8x128xf32>
    %94 = arith.mulf %93, %91 : vector<8x128xf32>
    %95 = arith.mulf %84, %19 : vector<8x128xf32>
    %96 = arith.addf %94, %95 : vector<8x128xf32>
    %97 = vector.broadcast %24 : vector<8x1xf32> to vector<8x128xf32>
    %98 = arith.mulf %97, %66 : vector<8x128xf32>
    %99 = vector.broadcast %28 : vector<8x1xf32> to vector<8x128xf32>
    %100 = arith.mulf %99, %96 : vector<8x128xf32>
    %101 = vector.extract_strided_slice %98 {offsets = [0, 0], sizes = [8, 32], strides = [1, 1]} : vector<8x128xf32> to vector<8x32xf32>
    %102 = arith.index_cast %c0_i32 : i32 to index
    %c0_37 = arith.constant 0 : index
    %c0_38 = arith.constant 0 : index
    %103 = vector.load %arg11[%102, %c0_37, %c0_38] : memref<8x8x32xf32, #tpu.memory_space<vmem>>, vector<1x8x32xf32>
    %104 = vector.shape_cast %103 : vector<1x8x32xf32> to vector<8x32xf32>
    %105 = vector.shape_cast %101 : vector<8x32xf32> to vector<1x8x32xf32>
    tpu.vector_store %arg11[%102, %c0_37, %c0_38], %105 {strides = array<i32>} : memref<8x8x32xf32, #tpu.memory_space<vmem>>, vector<1x8x32xf32>,
    %106 = arith.index_cast %20 : i32 to index
    %c0_39 = arith.constant 0 : index
    %c0_40 = arith.constant 0 : index
    %107 = vector.load %arg15[%106, %c0_39, %c0_40] : memref<8x8x128xf32, #tpu.memory_space<vmem>>, vector<1x8x128xf32>
    %108 = vector.shape_cast %107 : vector<1x8x128xf32> to vector<8x128xf32>
    %109 = vector.shape_cast %100 : vector<8x128xf32> to vector<1x8x128xf32>
    tpu.vector_store %arg15[%106, %c0_39, %c0_40], %109 {strides = array<i32>} : memref<8x8x128xf32, #tpu.memory_space<vmem>>, vector<1x8x128xf32>,
    %cst_41 = arith.constant 1.000000e+00 : f32
    %110 = vector.broadcast %cst_41 : f32 to vector<8x1xf32>
    %111 = arith.subf %110, %24 : vector<8x1xf32>
    %112 = vector.broadcast %111 : vector<8x1xf32> to vector<8x128xf32>
    %113 = arith.mulf %112, %19 : vector<8x128xf32>
    %114 = arith.addf %98, %113 : vector<8x128xf32>
    %cst_42 = arith.constant 1.000000e+00 : f32
    %115 = vector.broadcast %cst_42 : f32 to vector<8x1xf32>
    %116 = arith.subf %115, %28 : vector<8x1xf32>
    %117 = vector.broadcast %116 : vector<8x1xf32> to vector<8x128xf32>
    %118 = arith.mulf %117, %19 : vector<8x128xf32>
    %119 = arith.addf %100, %118 : vector<8x128xf32>
    %c1_i32 = arith.constant 1 : i32
    %c7_i32_43 = arith.constant 7 : i32
    %120 = arith.subi %c7_i32_43, %c1_i32 : i32
    %121 = vector.broadcast %c1_i32 : i32 to vector<8x1xi32>
    %122 = arith.cmpi sgt, %14, %121 : vector<8x1xi32>
    %123 = arith.extui %122 : vector<8x1xi1> to vector<8x1xi32>
    %124 = arith.sitofp %123 : vector<8x1xi32> to vector<8x1xf32>
    %125 = vector.broadcast %120 : i32 to vector<8x1xi32>
    %126 = arith.cmpi sgt, %14, %125 : vector<8x1xi32>
    %127 = arith.extui %126 : vector<8x1xi1> to vector<8x1xi32>
    %128 = arith.sitofp %127 : vector<8x1xi32> to vector<8x1xf32>
    %c8_i32_44 = arith.constant 8 : i32
    %129 = arith.muli %c1_i32, %c8_i32_44 : i32
    %130 = tpu.assume_multiple %129, 8 : i32
    %131 = arith.index_cast %130 : i32 to index
    %c0_45 = arith.constant 0 : index
    %132 = vector.load %arg13[%131, %c0_45] : memref<64x384xf32, #tpu.memory_space<vmem>>, vector<8x384xf32>
    %c8_i32_46 = arith.constant 8 : i32
    %133 = arith.muli %120, %c8_i32_46 : i32
    %134 = tpu.assume_multiple %133, 8 : i32
    %135 = arith.index_cast %134 : i32 to index
    %c0_47 = arith.constant 0 : index
    %136 = vector.load %arg14[%135, %c0_47] : memref<64x384xf32, #tpu.memory_space<vmem>>, vector<8x384xf32>
    %137 = arith.truncf %114 : vector<8x128xf32> to vector<8x128xbf16>
    %cst_48 = arith.constant dense<0.000000e+00> : vector<8x384xf32>
    %138 = tpu.matmul %137, %15, %cst_48 {dimension_numbers = #tpu.dot_dimension_numbers<[1], [0], [0], [1], [0, 0, 1, 1], [], []>} : vector<8x128xbf16>, vector<128x384xbf16>, vector<8x384xf32> -> vector<8x384xf32>
    %139 = vector.extract_strided_slice %132 {offsets = [0, 0], sizes = [8, 128], strides = [1, 1]} : vector<8x384xf32> to vector<8x128xf32>
    %140 = vector.extract_strided_slice %138 {offsets = [0, 0], sizes = [8, 128], strides = [1, 1]} : vector<8x384xf32> to vector<8x128xf32>
    %141 = arith.addf %139, %140 : vector<8x128xf32>
    %142 = arith.negf %141 : vector<8x128xf32>
    %143 = math.exp %142 : vector<8x128xf32>
    %cst_49 = arith.constant 1.000000e+00 : f32
    %144 = vector.broadcast %cst_49 : f32 to vector<8x128xf32>
    %145 = arith.addf %144, %143 : vector<8x128xf32>
    %146 = arith.divf %144, %145 : vector<8x128xf32>
    %147 = vector.extract_strided_slice %132 {offsets = [0, 128], sizes = [8, 128], strides = [1, 1]} : vector<8x384xf32> to vector<8x128xf32>
    %148 = vector.extract_strided_slice %138 {offsets = [0, 128], sizes = [8, 128], strides = [1, 1]} : vector<8x384xf32> to vector<8x128xf32>
    %149 = arith.addf %147, %148 : vector<8x128xf32>
    %150 = arith.negf %149 : vector<8x128xf32>
    %151 = math.exp %150 : vector<8x128xf32>
    %cst_50 = arith.constant 1.000000e+00 : f32
    %152 = vector.broadcast %cst_50 : f32 to vector<8x128xf32>
    %153 = arith.addf %152, %151 : vector<8x128xf32>
    %154 = arith.divf %152, %153 : vector<8x128xf32>
    %155 = vector.extract_strided_slice %132 {offsets = [0, 256], sizes = [8, 128], strides = [1, 1]} : vector<8x384xf32> to vector<8x128xf32>
    %156 = vector.extract_strided_slice %138 {offsets = [0, 256], sizes = [8, 128], strides = [1, 1]} : vector<8x384xf32> to vector<8x128xf32>
    %157 = vector.broadcast %17 : vector<1x128xf32> to vector<8x128xf32>
    %158 = arith.addf %156, %157 : vector<8x128xf32>
    %159 = arith.mulf %146, %158 : vector<8x128xf32>
    %160 = arith.addf %155, %159 : vector<8x128xf32>
    %161 = math.tanh %160 : vector<8x128xf32>
    %cst_51 = arith.constant 1.000000e+00 : f32
    %162 = vector.broadcast %cst_51 : f32 to vector<8x128xf32>
    %163 = arith.subf %162, %154 : vector<8x128xf32>
    %164 = arith.mulf %163, %161 : vector<8x128xf32>
    %165 = arith.mulf %154, %114 : vector<8x128xf32>
    %166 = arith.addf %164, %165 : vector<8x128xf32>
    %167 = arith.truncf %119 : vector<8x128xf32> to vector<8x128xbf16>
    %cst_52 = arith.constant dense<0.000000e+00> : vector<8x384xf32>
    %168 = tpu.matmul %167, %16, %cst_52 {dimension_numbers = #tpu.dot_dimension_numbers<[1], [0], [0], [1], [0, 0, 1, 1], [], []>} : vector<8x128xbf16>, vector<128x384xbf16>, vector<8x384xf32> -> vector<8x384xf32>
    %169 = vector.extract_strided_slice %136 {offsets = [0, 0], sizes = [8, 128], strides = [1, 1]} : vector<8x384xf32> to vector<8x128xf32>
    %170 = vector.extract_strided_slice %168 {offsets = [0, 0], sizes = [8, 128], strides = [1, 1]} : vector<8x384xf32> to vector<8x128xf32>
    %171 = arith.addf %169, %170 : vector<8x128xf32>
    %172 = arith.negf %171 : vector<8x128xf32>
    %173 = math.exp %172 : vector<8x128xf32>
    %cst_53 = arith.constant 1.000000e+00 : f32
    %174 = vector.broadcast %cst_53 : f32 to vector<8x128xf32>
    %175 = arith.addf %174, %173 : vector<8x128xf32>
    %176 = arith.divf %174, %175 : vector<8x128xf32>
    %177 = vector.extract_strided_slice %136 {offsets = [0, 128], sizes = [8, 128], strides = [1, 1]} : vector<8x384xf32> to vector<8x128xf32>
    %178 = vector.extract_strided_slice %168 {offsets = [0, 128], sizes = [8, 128], strides = [1, 1]} : vector<8x384xf32> to vector<8x128xf32>
    %179 = arith.addf %177, %178 : vector<8x128xf32>
    %180 = arith.negf %179 : vector<8x128xf32>
    %181 = math.exp %180 : vector<8x128xf32>
    %cst_54 = arith.constant 1.000000e+00 : f32
    %182 = vector.broadcast %cst_54 : f32 to vector<8x128xf32>
    %183 = arith.addf %182, %181 : vector<8x128xf32>
    %184 = arith.divf %182, %183 : vector<8x128xf32>
    %185 = vector.extract_strided_slice %136 {offsets = [0, 256], sizes = [8, 128], strides = [1, 1]} : vector<8x384xf32> to vector<8x128xf32>
    %186 = vector.extract_strided_slice %168 {offsets = [0, 256], sizes = [8, 128], strides = [1, 1]} : vector<8x384xf32> to vector<8x128xf32>
    %187 = vector.broadcast %18 : vector<1x128xf32> to vector<8x128xf32>
    %188 = arith.addf %186, %187 : vector<8x128xf32>
    %189 = arith.mulf %176, %188 : vector<8x128xf32>
    %190 = arith.addf %185, %189 : vector<8x128xf32>
    %191 = math.tanh %190 : vector<8x128xf32>
    %cst_55 = arith.constant 1.000000e+00 : f32
    %192 = vector.broadcast %cst_55 : f32 to vector<8x128xf32>
    %193 = arith.subf %192, %184 : vector<8x128xf32>
    %194 = arith.mulf %193, %191 : vector<8x128xf32>
    %195 = arith.mulf %184, %119 : vector<8x128xf32>
    %196 = arith.addf %194, %195 : vector<8x128xf32>
    %197 = vector.broadcast %124 : vector<8x1xf32> to vector<8x128xf32>
    %198 = arith.mulf %197, %166 : vector<8x128xf32>
    %199 = vector.broadcast %128 : vector<8x1xf32> to vector<8x128xf32>
    %200 = arith.mulf %199, %196 : vector<8x128xf32>
    %201 = vector.extract_strided_slice %198 {offsets = [0, 0], sizes = [8, 32], strides = [1, 1]} : vector<8x128xf32> to vector<8x32xf32>
    %202 = arith.index_cast %c1_i32 : i32 to index
    %c0_56 = arith.constant 0 : index
    %c0_57 = arith.constant 0 : index
    %203 = vector.load %arg11[%202, %c0_56, %c0_57] : memref<8x8x32xf32, #tpu.memory_space<vmem>>, vector<1x8x32xf32>
    %204 = vector.shape_cast %203 : vector<1x8x32xf32> to vector<8x32xf32>
    %205 = vector.shape_cast %201 : vector<8x32xf32> to vector<1x8x32xf32>
    tpu.vector_store %arg11[%202, %c0_56, %c0_57], %205 {strides = array<i32>} : memref<8x8x32xf32, #tpu.memory_space<vmem>>, vector<1x8x32xf32>,
    %206 = arith.index_cast %120 : i32 to index
    %c0_58 = arith.constant 0 : index
    %c0_59 = arith.constant 0 : index
    %207 = vector.load %arg15[%206, %c0_58, %c0_59] : memref<8x8x128xf32, #tpu.memory_space<vmem>>, vector<1x8x128xf32>
    %208 = vector.shape_cast %207 : vector<1x8x128xf32> to vector<8x128xf32>
    %209 = vector.shape_cast %200 : vector<8x128xf32> to vector<1x8x128xf32>
    tpu.vector_store %arg15[%206, %c0_58, %c0_59], %209 {strides = array<i32>} : memref<8x8x128xf32, #tpu.memory_space<vmem>>, vector<1x8x128xf32>,
    %cst_60 = arith.constant 1.000000e+00 : f32
    %210 = vector.broadcast %cst_60 : f32 to vector<8x1xf32>
    %211 = arith.subf %210, %124 : vector<8x1xf32>
    %212 = vector.broadcast %211 : vector<8x1xf32> to vector<8x128xf32>
    %213 = arith.mulf %212, %114 : vector<8x128xf32>
    %214 = arith.addf %198, %213 : vector<8x128xf32>
    %cst_61 = arith.constant 1.000000e+00 : f32
    %215 = vector.broadcast %cst_61 : f32 to vector<8x1xf32>
    %216 = arith.subf %215, %128 : vector<8x1xf32>
    %217 = vector.broadcast %216 : vector<8x1xf32> to vector<8x128xf32>
    %218 = arith.mulf %217, %119 : vector<8x128xf32>
    %219 = arith.addf %200, %218 : vector<8x128xf32>
    %c2_i32 = arith.constant 2 : i32
    %c7_i32_62 = arith.constant 7 : i32
    %220 = arith.subi %c7_i32_62, %c2_i32 : i32
    %221 = vector.broadcast %c2_i32 : i32 to vector<8x1xi32>
    %222 = arith.cmpi sgt, %14, %221 : vector<8x1xi32>
    %223 = arith.extui %222 : vector<8x1xi1> to vector<8x1xi32>
    %224 = arith.sitofp %223 : vector<8x1xi32> to vector<8x1xf32>
    %225 = vector.broadcast %220 : i32 to vector<8x1xi32>
    %226 = arith.cmpi sgt, %14, %225 : vector<8x1xi32>
    %227 = arith.extui %226 : vector<8x1xi1> to vector<8x1xi32>
    %228 = arith.sitofp %227 : vector<8x1xi32> to vector<8x1xf32>
    %c8_i32_63 = arith.constant 8 : i32
    %229 = arith.muli %c2_i32, %c8_i32_63 : i32
    %230 = tpu.assume_multiple %229, 8 : i32
    %231 = arith.index_cast %230 : i32 to index
    %c0_64 = arith.constant 0 : index
    %232 = vector.load %arg13[%231, %c0_64] : memref<64x384xf32, #tpu.memory_space<vmem>>, vector<8x384xf32>
    %c8_i32_65 = arith.constant 8 : i32
    %233 = arith.muli %220, %c8_i32_65 : i32
    %234 = tpu.assume_multiple %233, 8 : i32
    %235 = arith.index_cast %234 : i32 to index
    %c0_66 = arith.constant 0 : index
    %236 = vector.load %arg14[%235, %c0_66] : memref<64x384xf32, #tpu.memory_space<vmem>>, vector<8x384xf32>
    %237 = arith.truncf %214 : vector<8x128xf32> to vector<8x128xbf16>
    %cst_67 = arith.constant dense<0.000000e+00> : vector<8x384xf32>
    %238 = tpu.matmul %237, %15, %cst_67 {dimension_numbers = #tpu.dot_dimension_numbers<[1], [0], [0], [1], [0, 0, 1, 1], [], []>} : vector<8x128xbf16>, vector<128x384xbf16>, vector<8x384xf32> -> vector<8x384xf32>
    %239 = vector.extract_strided_slice %232 {offsets = [0, 0], sizes = [8, 128], strides = [1, 1]} : vector<8x384xf32> to vector<8x128xf32>
    %240 = vector.extract_strided_slice %238 {offsets = [0, 0], sizes = [8, 128], strides = [1, 1]} : vector<8x384xf32> to vector<8x128xf32>
    %241 = arith.addf %239, %240 : vector<8x128xf32>
    %242 = arith.negf %241 : vector<8x128xf32>
    %243 = math.exp %242 : vector<8x128xf32>
    %cst_68 = arith.constant 1.000000e+00 : f32
    %244 = vector.broadcast %cst_68 : f32 to vector<8x128xf32>
    %245 = arith.addf %244, %243 : vector<8x128xf32>
    %246 = arith.divf %244, %245 : vector<8x128xf32>
    %247 = vector.extract_strided_slice %232 {offsets = [0, 128], sizes = [8, 128], strides = [1, 1]} : vector<8x384xf32> to vector<8x128xf32>
    %248 = vector.extract_strided_slice %238 {offsets = [0, 128], sizes = [8, 128], strides = [1, 1]} : vector<8x384xf32> to vector<8x128xf32>
    %249 = arith.addf %247, %248 : vector<8x128xf32>
    %250 = arith.negf %249 : vector<8x128xf32>
    %251 = math.exp %250 : vector<8x128xf32>
    %cst_69 = arith.constant 1.000000e+00 : f32
    %252 = vector.broadcast %cst_69 : f32 to vector<8x128xf32>
    %253 = arith.addf %252, %251 : vector<8x128xf32>
    %254 = arith.divf %252, %253 : vector<8x128xf32>
    %255 = vector.extract_strided_slice %232 {offsets = [0, 256], sizes = [8, 128], strides = [1, 1]} : vector<8x384xf32> to vector<8x128xf32>
    %256 = vector.extract_strided_slice %238 {offsets = [0, 256], sizes = [8, 128], strides = [1, 1]} : vector<8x384xf32> to vector<8x128xf32>
    %257 = vector.broadcast %17 : vector<1x128xf32> to vector<8x128xf32>
    %258 = arith.addf %256, %257 : vector<8x128xf32>
    %259 = arith.mulf %246, %258 : vector<8x128xf32>
    %260 = arith.addf %255, %259 : vector<8x128xf32>
    %261 = math.tanh %260 : vector<8x128xf32>
    %cst_70 = arith.constant 1.000000e+00 : f32
    %262 = vector.broadcast %cst_70 : f32 to vector<8x128xf32>
    %263 = arith.subf %262, %254 : vector<8x128xf32>
    %264 = arith.mulf %263, %261 : vector<8x128xf32>
    %265 = arith.mulf %254, %214 : vector<8x128xf32>
    %266 = arith.addf %264, %265 : vector<8x128xf32>
    %267 = arith.truncf %219 : vector<8x128xf32> to vector<8x128xbf16>
    %cst_71 = arith.constant dense<0.000000e+00> : vector<8x384xf32>
    %268 = tpu.matmul %267, %16, %cst_71 {dimension_numbers = #tpu.dot_dimension_numbers<[1], [0], [0], [1], [0, 0, 1, 1], [], []>} : vector<8x128xbf16>, vector<128x384xbf16>, vector<8x384xf32> -> vector<8x384xf32>
    %269 = vector.extract_strided_slice %236 {offsets = [0, 0], sizes = [8, 128], strides = [1, 1]} : vector<8x384xf32> to vector<8x128xf32>
    %270 = vector.extract_strided_slice %268 {offsets = [0, 0], sizes = [8, 128], strides = [1, 1]} : vector<8x384xf32> to vector<8x128xf32>
    %271 = arith.addf %269, %270 : vector<8x128xf32>
    %272 = arith.negf %271 : vector<8x128xf32>
    %273 = math.exp %272 : vector<8x128xf32>
    %cst_72 = arith.constant 1.000000e+00 : f32
    %274 = vector.broadcast %cst_72 : f32 to vector<8x128xf32>
    %275 = arith.addf %274, %273 : vector<8x128xf32>
    %276 = arith.divf %274, %275 : vector<8x128xf32>
    %277 = vector.extract_strided_slice %236 {offsets = [0, 128], sizes = [8, 128], strides = [1, 1]} : vector<8x384xf32> to vector<8x128xf32>
    %278 = vector.extract_strided_slice %268 {offsets = [0, 128], sizes = [8, 128], strides = [1, 1]} : vector<8x384xf32> to vector<8x128xf32>
    %279 = arith.addf %277, %278 : vector<8x128xf32>
    %280 = arith.negf %279 : vector<8x128xf32>
    %281 = math.exp %280 : vector<8x128xf32>
    %cst_73 = arith.constant 1.000000e+00 : f32
    %282 = vector.broadcast %cst_73 : f32 to vector<8x128xf32>
    %283 = arith.addf %282, %281 : vector<8x128xf32>
    %284 = arith.divf %282, %283 : vector<8x128xf32>
    %285 = vector.extract_strided_slice %236 {offsets = [0, 256], sizes = [8, 128], strides = [1, 1]} : vector<8x384xf32> to vector<8x128xf32>
    %286 = vector.extract_strided_slice %268 {offsets = [0, 256], sizes = [8, 128], strides = [1, 1]} : vector<8x384xf32> to vector<8x128xf32>
    %287 = vector.broadcast %18 : vector<1x128xf32> to vector<8x128xf32>
    %288 = arith.addf %286, %287 : vector<8x128xf32>
    %289 = arith.mulf %276, %288 : vector<8x128xf32>
    %290 = arith.addf %285, %289 : vector<8x128xf32>
    %291 = math.tanh %290 : vector<8x128xf32>
    %cst_74 = arith.constant 1.000000e+00 : f32
    %292 = vector.broadcast %cst_74 : f32 to vector<8x128xf32>
    %293 = arith.subf %292, %284 : vector<8x128xf32>
    %294 = arith.mulf %293, %291 : vector<8x128xf32>
    %295 = arith.mulf %284, %219 : vector<8x128xf32>
    %296 = arith.addf %294, %295 : vector<8x128xf32>
    %297 = vector.broadcast %224 : vector<8x1xf32> to vector<8x128xf32>
    %298 = arith.mulf %297, %266 : vector<8x128xf32>
    %299 = vector.broadcast %228 : vector<8x1xf32> to vector<8x128xf32>
    %300 = arith.mulf %299, %296 : vector<8x128xf32>
    %301 = vector.extract_strided_slice %298 {offsets = [0, 0], sizes = [8, 32], strides = [1, 1]} : vector<8x128xf32> to vector<8x32xf32>
    %302 = arith.index_cast %c2_i32 : i32 to index
    %c0_75 = arith.constant 0 : index
    %c0_76 = arith.constant 0 : index
    %303 = vector.load %arg11[%302, %c0_75, %c0_76] : memref<8x8x32xf32, #tpu.memory_space<vmem>>, vector<1x8x32xf32>
    %304 = vector.shape_cast %303 : vector<1x8x32xf32> to vector<8x32xf32>
    %305 = vector.shape_cast %301 : vector<8x32xf32> to vector<1x8x32xf32>
    tpu.vector_store %arg11[%302, %c0_75, %c0_76], %305 {strides = array<i32>} : memref<8x8x32xf32, #tpu.memory_space<vmem>>, vector<1x8x32xf32>,
    %306 = arith.index_cast %220 : i32 to index
    %c0_77 = arith.constant 0 : index
    %c0_78 = arith.constant 0 : index
    %307 = vector.load %arg15[%306, %c0_77, %c0_78] : memref<8x8x128xf32, #tpu.memory_space<vmem>>, vector<1x8x128xf32>
    %308 = vector.shape_cast %307 : vector<1x8x128xf32> to vector<8x128xf32>
    %309 = vector.shape_cast %300 : vector<8x128xf32> to vector<1x8x128xf32>
    tpu.vector_store %arg15[%306, %c0_77, %c0_78], %309 {strides = array<i32>} : memref<8x8x128xf32, #tpu.memory_space<vmem>>, vector<1x8x128xf32>,
    %cst_79 = arith.constant 1.000000e+00 : f32
    %310 = vector.broadcast %cst_79 : f32 to vector<8x1xf32>
    %311 = arith.subf %310, %224 : vector<8x1xf32>
    %312 = vector.broadcast %311 : vector<8x1xf32> to vector<8x128xf32>
    %313 = arith.mulf %312, %214 : vector<8x128xf32>
    %314 = arith.addf %298, %313 : vector<8x128xf32>
    %cst_80 = arith.constant 1.000000e+00 : f32
    %315 = vector.broadcast %cst_80 : f32 to vector<8x1xf32>
    %316 = arith.subf %315, %228 : vector<8x1xf32>
    %317 = vector.broadcast %316 : vector<8x1xf32> to vector<8x128xf32>
    %318 = arith.mulf %317, %219 : vector<8x128xf32>
    %319 = arith.addf %300, %318 : vector<8x128xf32>
    %c3_i32 = arith.constant 3 : i32
    %c7_i32_81 = arith.constant 7 : i32
    %320 = arith.subi %c7_i32_81, %c3_i32 : i32
    %321 = vector.broadcast %c3_i32 : i32 to vector<8x1xi32>
    %322 = arith.cmpi sgt, %14, %321 : vector<8x1xi32>
    %323 = arith.extui %322 : vector<8x1xi1> to vector<8x1xi32>
    %324 = arith.sitofp %323 : vector<8x1xi32> to vector<8x1xf32>
    %325 = vector.broadcast %320 : i32 to vector<8x1xi32>
    %326 = arith.cmpi sgt, %14, %325 : vector<8x1xi32>
    %327 = arith.extui %326 : vector<8x1xi1> to vector<8x1xi32>
    %328 = arith.sitofp %327 : vector<8x1xi32> to vector<8x1xf32>
    %c8_i32_82 = arith.constant 8 : i32
    %329 = arith.muli %c3_i32, %c8_i32_82 : i32
    %330 = tpu.assume_multiple %329, 8 : i32
    %331 = arith.index_cast %330 : i32 to index
    %c0_83 = arith.constant 0 : index
    %332 = vector.load %arg13[%331, %c0_83] : memref<64x384xf32, #tpu.memory_space<vmem>>, vector<8x384xf32>
    %c8_i32_84 = arith.constant 8 : i32
    %333 = arith.muli %320, %c8_i32_84 : i32
    %334 = tpu.assume_multiple %333, 8 : i32
    %335 = arith.index_cast %334 : i32 to index
    %c0_85 = arith.constant 0 : index
    %336 = vector.load %arg14[%335, %c0_85] : memref<64x384xf32, #tpu.memory_space<vmem>>, vector<8x384xf32>
    %337 = arith.truncf %314 : vector<8x128xf32> to vector<8x128xbf16>
    %cst_86 = arith.constant dense<0.000000e+00> : vector<8x384xf32>
    %338 = tpu.matmul %337, %15, %cst_86 {dimension_numbers = #tpu.dot_dimension_numbers<[1], [0], [0], [1], [0, 0, 1, 1], [], []>} : vector<8x128xbf16>, vector<128x384xbf16>, vector<8x384xf32> -> vector<8x384xf32>
    %339 = vector.extract_strided_slice %332 {offsets = [0, 0], sizes = [8, 128], strides = [1, 1]} : vector<8x384xf32> to vector<8x128xf32>
    %340 = vector.extract_strided_slice %338 {offsets = [0, 0], sizes = [8, 128], strides = [1, 1]} : vector<8x384xf32> to vector<8x128xf32>
    %341 = arith.addf %339, %340 : vector<8x128xf32>
    %342 = arith.negf %341 : vector<8x128xf32>
    %343 = math.exp %342 : vector<8x128xf32>
    %cst_87 = arith.constant 1.000000e+00 : f32
    %344 = vector.broadcast %cst_87 : f32 to vector<8x128xf32>
    %345 = arith.addf %344, %343 : vector<8x128xf32>
    %346 = arith.divf %344, %345 : vector<8x128xf32>
    %347 = vector.extract_strided_slice %332 {offsets = [0, 128], sizes = [8, 128], strides = [1, 1]} : vector<8x384xf32> to vector<8x128xf32>
    %348 = vector.extract_strided_slice %338 {offsets = [0, 128], sizes = [8, 128], strides = [1, 1]} : vector<8x384xf32> to vector<8x128xf32>
    %349 = arith.addf %347, %348 : vector<8x128xf32>
    %350 = arith.negf %349 : vector<8x128xf32>
    %351 = math.exp %350 : vector<8x128xf32>
    %cst_88 = arith.constant 1.000000e+00 : f32
    %352 = vector.broadcast %cst_88 : f32 to vector<8x128xf32>
    %353 = arith.addf %352, %351 : vector<8x128xf32>
    %354 = arith.divf %352, %353 : vector<8x128xf32>
    %355 = vector.extract_strided_slice %332 {offsets = [0, 256], sizes = [8, 128], strides = [1, 1]} : vector<8x384xf32> to vector<8x128xf32>
    %356 = vector.extract_strided_slice %338 {offsets = [0, 256], sizes = [8, 128], strides = [1, 1]} : vector<8x384xf32> to vector<8x128xf32>
    %357 = vector.broadcast %17 : vector<1x128xf32> to vector<8x128xf32>
    %358 = arith.addf %356, %357 : vector<8x128xf32>
    %359 = arith.mulf %346, %358 : vector<8x128xf32>
    %360 = arith.addf %355, %359 : vector<8x128xf32>
    %361 = math.tanh %360 : vector<8x128xf32>
    %cst_89 = arith.constant 1.000000e+00 : f32
    %362 = vector.broadcast %cst_89 : f32 to vector<8x128xf32>
    %363 = arith.subf %362, %354 : vector<8x128xf32>
    %364 = arith.mulf %363, %361 : vector<8x128xf32>
    %365 = arith.mulf %354, %314 : vector<8x128xf32>
    %366 = arith.addf %364, %365 : vector<8x128xf32>
    %367 = arith.truncf %319 : vector<8x128xf32> to vector<8x128xbf16>
    %cst_90 = arith.constant dense<0.000000e+00> : vector<8x384xf32>
    %368 = tpu.matmul %367, %16, %cst_90 {dimension_numbers = #tpu.dot_dimension_numbers<[1], [0], [0], [1], [0, 0, 1, 1], [], []>} : vector<8x128xbf16>, vector<128x384xbf16>, vector<8x384xf32> -> vector<8x384xf32>
    %369 = vector.extract_strided_slice %336 {offsets = [0, 0], sizes = [8, 128], strides = [1, 1]} : vector<8x384xf32> to vector<8x128xf32>
    %370 = vector.extract_strided_slice %368 {offsets = [0, 0], sizes = [8, 128], strides = [1, 1]} : vector<8x384xf32> to vector<8x128xf32>
    %371 = arith.addf %369, %370 : vector<8x128xf32>
    %372 = arith.negf %371 : vector<8x128xf32>
    %373 = math.exp %372 : vector<8x128xf32>
    %cst_91 = arith.constant 1.000000e+00 : f32
    %374 = vector.broadcast %cst_91 : f32 to vector<8x128xf32>
    %375 = arith.addf %374, %373 : vector<8x128xf32>
    %376 = arith.divf %374, %375 : vector<8x128xf32>
    %377 = vector.extract_strided_slice %336 {offsets = [0, 128], sizes = [8, 128], strides = [1, 1]} : vector<8x384xf32> to vector<8x128xf32>
    %378 = vector.extract_strided_slice %368 {offsets = [0, 128], sizes = [8, 128], strides = [1, 1]} : vector<8x384xf32> to vector<8x128xf32>
    %379 = arith.addf %377, %378 : vector<8x128xf32>
    %380 = arith.negf %379 : vector<8x128xf32>
    %381 = math.exp %380 : vector<8x128xf32>
    %cst_92 = arith.constant 1.000000e+00 : f32
    %382 = vector.broadcast %cst_92 : f32 to vector<8x128xf32>
    %383 = arith.addf %382, %381 : vector<8x128xf32>
    %384 = arith.divf %382, %383 : vector<8x128xf32>
    %385 = vector.extract_strided_slice %336 {offsets = [0, 256], sizes = [8, 128], strides = [1, 1]} : vector<8x384xf32> to vector<8x128xf32>
    %386 = vector.extract_strided_slice %368 {offsets = [0, 256], sizes = [8, 128], strides = [1, 1]} : vector<8x384xf32> to vector<8x128xf32>
    %387 = vector.broadcast %18 : vector<1x128xf32> to vector<8x128xf32>
    %388 = arith.addf %386, %387 : vector<8x128xf32>
    %389 = arith.mulf %376, %388 : vector<8x128xf32>
    %390 = arith.addf %385, %389 : vector<8x128xf32>
    %391 = math.tanh %390 : vector<8x128xf32>
    %cst_93 = arith.constant 1.000000e+00 : f32
    %392 = vector.broadcast %cst_93 : f32 to vector<8x128xf32>
    %393 = arith.subf %392, %384 : vector<8x128xf32>
    %394 = arith.mulf %393, %391 : vector<8x128xf32>
    %395 = arith.mulf %384, %319 : vector<8x128xf32>
    %396 = arith.addf %394, %395 : vector<8x128xf32>
    %397 = vector.broadcast %324 : vector<8x1xf32> to vector<8x128xf32>
    %398 = arith.mulf %397, %366 : vector<8x128xf32>
    %399 = vector.broadcast %328 : vector<8x1xf32> to vector<8x128xf32>
    %400 = arith.mulf %399, %396 : vector<8x128xf32>
    %401 = vector.extract_strided_slice %398 {offsets = [0, 0], sizes = [8, 32], strides = [1, 1]} : vector<8x128xf32> to vector<8x32xf32>
    %402 = arith.index_cast %c3_i32 : i32 to index
    %c0_94 = arith.constant 0 : index
    %c0_95 = arith.constant 0 : index
    %403 = vector.load %arg11[%402, %c0_94, %c0_95] : memref<8x8x32xf32, #tpu.memory_space<vmem>>, vector<1x8x32xf32>
    %404 = vector.shape_cast %403 : vector<1x8x32xf32> to vector<8x32xf32>
    %405 = vector.shape_cast %401 : vector<8x32xf32> to vector<1x8x32xf32>
    tpu.vector_store %arg11[%402, %c0_94, %c0_95], %405 {strides = array<i32>} : memref<8x8x32xf32, #tpu.memory_space<vmem>>, vector<1x8x32xf32>,
    %406 = arith.index_cast %320 : i32 to index
    %c0_96 = arith.constant 0 : index
    %c0_97 = arith.constant 0 : index
    %407 = vector.load %arg15[%406, %c0_96, %c0_97] : memref<8x8x128xf32, #tpu.memory_space<vmem>>, vector<1x8x128xf32>
    %408 = vector.shape_cast %407 : vector<1x8x128xf32> to vector<8x128xf32>
    %409 = vector.shape_cast %400 : vector<8x128xf32> to vector<1x8x128xf32>
    tpu.vector_store %arg15[%406, %c0_96, %c0_97], %409 {strides = array<i32>} : memref<8x8x128xf32, #tpu.memory_space<vmem>>, vector<1x8x128xf32>,
    %cst_98 = arith.constant 1.000000e+00 : f32
    %410 = vector.broadcast %cst_98 : f32 to vector<8x1xf32>
    %411 = arith.subf %410, %324 : vector<8x1xf32>
    %412 = vector.broadcast %411 : vector<8x1xf32> to vector<8x128xf32>
    %413 = arith.mulf %412, %314 : vector<8x128xf32>
    %414 = arith.addf %398, %413 : vector<8x128xf32>
    %cst_99 = arith.constant 1.000000e+00 : f32
    %415 = vector.broadcast %cst_99 : f32 to vector<8x1xf32>
    %416 = arith.subf %415, %328 : vector<8x1xf32>
    %417 = vector.broadcast %416 : vector<8x1xf32> to vector<8x128xf32>
    %418 = arith.mulf %417, %319 : vector<8x128xf32>
    %419 = arith.addf %400, %418 : vector<8x128xf32>
    %c4_i32 = arith.constant 4 : i32
    %c7_i32_100 = arith.constant 7 : i32
    %420 = arith.subi %c7_i32_100, %c4_i32 : i32
    %421 = vector.broadcast %c4_i32 : i32 to vector<8x1xi32>
    %422 = arith.cmpi sgt, %14, %421 : vector<8x1xi32>
    %423 = arith.extui %422 : vector<8x1xi1> to vector<8x1xi32>
    %424 = arith.sitofp %423 : vector<8x1xi32> to vector<8x1xf32>
    %425 = vector.broadcast %420 : i32 to vector<8x1xi32>
    %426 = arith.cmpi sgt, %14, %425 : vector<8x1xi32>
    %427 = arith.extui %426 : vector<8x1xi1> to vector<8x1xi32>
    %428 = arith.sitofp %427 : vector<8x1xi32> to vector<8x1xf32>
    %c8_i32_101 = arith.constant 8 : i32
    %429 = arith.muli %c4_i32, %c8_i32_101 : i32
    %430 = tpu.assume_multiple %429, 8 : i32
    %431 = arith.index_cast %430 : i32 to index
    %c0_102 = arith.constant 0 : index
    %432 = vector.load %arg13[%431, %c0_102] : memref<64x384xf32, #tpu.memory_space<vmem>>, vector<8x384xf32>
    %c8_i32_103 = arith.constant 8 : i32
    %433 = arith.muli %420, %c8_i32_103 : i32
    %434 = tpu.assume_multiple %433, 8 : i32
    %435 = arith.index_cast %434 : i32 to index
    %c0_104 = arith.constant 0 : index
    %436 = vector.load %arg14[%435, %c0_104] : memref<64x384xf32, #tpu.memory_space<vmem>>, vector<8x384xf32>
    %437 = arith.truncf %414 : vector<8x128xf32> to vector<8x128xbf16>
    %cst_105 = arith.constant dense<0.000000e+00> : vector<8x384xf32>
    %438 = tpu.matmul %437, %15, %cst_105 {dimension_numbers = #tpu.dot_dimension_numbers<[1], [0], [0], [1], [0, 0, 1, 1], [], []>} : vector<8x128xbf16>, vector<128x384xbf16>, vector<8x384xf32> -> vector<8x384xf32>
    %439 = vector.extract_strided_slice %432 {offsets = [0, 0], sizes = [8, 128], strides = [1, 1]} : vector<8x384xf32> to vector<8x128xf32>
    %440 = vector.extract_strided_slice %438 {offsets = [0, 0], sizes = [8, 128], strides = [1, 1]} : vector<8x384xf32> to vector<8x128xf32>
    %441 = arith.addf %439, %440 : vector<8x128xf32>
    %442 = arith.negf %441 : vector<8x128xf32>
    %443 = math.exp %442 : vector<8x128xf32>
    %cst_106 = arith.constant 1.000000e+00 : f32
    %444 = vector.broadcast %cst_106 : f32 to vector<8x128xf32>
    %445 = arith.addf %444, %443 : vector<8x128xf32>
    %446 = arith.divf %444, %445 : vector<8x128xf32>
    %447 = vector.extract_strided_slice %432 {offsets = [0, 128], sizes = [8, 128], strides = [1, 1]} : vector<8x384xf32> to vector<8x128xf32>
    %448 = vector.extract_strided_slice %438 {offsets = [0, 128], sizes = [8, 128], strides = [1, 1]} : vector<8x384xf32> to vector<8x128xf32>
    %449 = arith.addf %447, %448 : vector<8x128xf32>
    %450 = arith.negf %449 : vector<8x128xf32>
    %451 = math.exp %450 : vector<8x128xf32>
    %cst_107 = arith.constant 1.000000e+00 : f32
    %452 = vector.broadcast %cst_107 : f32 to vector<8x128xf32>
    %453 = arith.addf %452, %451 : vector<8x128xf32>
    %454 = arith.divf %452, %453 : vector<8x128xf32>
    %455 = vector.extract_strided_slice %432 {offsets = [0, 256], sizes = [8, 128], strides = [1, 1]} : vector<8x384xf32> to vector<8x128xf32>
    %456 = vector.extract_strided_slice %438 {offsets = [0, 256], sizes = [8, 128], strides = [1, 1]} : vector<8x384xf32> to vector<8x128xf32>
    %457 = vector.broadcast %17 : vector<1x128xf32> to vector<8x128xf32>
    %458 = arith.addf %456, %457 : vector<8x128xf32>
    %459 = arith.mulf %446, %458 : vector<8x128xf32>
    %460 = arith.addf %455, %459 : vector<8x128xf32>
    %461 = math.tanh %460 : vector<8x128xf32>
    %cst_108 = arith.constant 1.000000e+00 : f32
    %462 = vector.broadcast %cst_108 : f32 to vector<8x128xf32>
    %463 = arith.subf %462, %454 : vector<8x128xf32>
    %464 = arith.mulf %463, %461 : vector<8x128xf32>
    %465 = arith.mulf %454, %414 : vector<8x128xf32>
    %466 = arith.addf %464, %465 : vector<8x128xf32>
    %467 = arith.truncf %419 : vector<8x128xf32> to vector<8x128xbf16>
    %cst_109 = arith.constant dense<0.000000e+00> : vector<8x384xf32>
    %468 = tpu.matmul %467, %16, %cst_109 {dimension_numbers = #tpu.dot_dimension_numbers<[1], [0], [0], [1], [0, 0, 1, 1], [], []>} : vector<8x128xbf16>, vector<128x384xbf16>, vector<8x384xf32> -> vector<8x384xf32>
    %469 = vector.extract_strided_slice %436 {offsets = [0, 0], sizes = [8, 128], strides = [1, 1]} : vector<8x384xf32> to vector<8x128xf32>
    %470 = vector.extract_strided_slice %468 {offsets = [0, 0], sizes = [8, 128], strides = [1, 1]} : vector<8x384xf32> to vector<8x128xf32>
    %471 = arith.addf %469, %470 : vector<8x128xf32>
    %472 = arith.negf %471 : vector<8x128xf32>
    %473 = math.exp %472 : vector<8x128xf32>
    %cst_110 = arith.constant 1.000000e+00 : f32
    %474 = vector.broadcast %cst_110 : f32 to vector<8x128xf32>
    %475 = arith.addf %474, %473 : vector<8x128xf32>
    %476 = arith.divf %474, %475 : vector<8x128xf32>
    %477 = vector.extract_strided_slice %436 {offsets = [0, 128], sizes = [8, 128], strides = [1, 1]} : vector<8x384xf32> to vector<8x128xf32>
    %478 = vector.extract_strided_slice %468 {offsets = [0, 128], sizes = [8, 128], strides = [1, 1]} : vector<8x384xf32> to vector<8x128xf32>
    %479 = arith.addf %477, %478 : vector<8x128xf32>
    %480 = arith.negf %479 : vector<8x128xf32>
    %481 = math.exp %480 : vector<8x128xf32>
    %cst_111 = arith.constant 1.000000e+00 : f32
    %482 = vector.broadcast %cst_111 : f32 to vector<8x128xf32>
    %483 = arith.addf %482, %481 : vector<8x128xf32>
    %484 = arith.divf %482, %483 : vector<8x128xf32>
    %485 = vector.extract_strided_slice %436 {offsets = [0, 256], sizes = [8, 128], strides = [1, 1]} : vector<8x384xf32> to vector<8x128xf32>
    %486 = vector.extract_strided_slice %468 {offsets = [0, 256], sizes = [8, 128], strides = [1, 1]} : vector<8x384xf32> to vector<8x128xf32>
    %487 = vector.broadcast %18 : vector<1x128xf32> to vector<8x128xf32>
    %488 = arith.addf %486, %487 : vector<8x128xf32>
    %489 = arith.mulf %476, %488 : vector<8x128xf32>
    %490 = arith.addf %485, %489 : vector<8x128xf32>
    %491 = math.tanh %490 : vector<8x128xf32>
    %cst_112 = arith.constant 1.000000e+00 : f32
    %492 = vector.broadcast %cst_112 : f32 to vector<8x128xf32>
    %493 = arith.subf %492, %484 : vector<8x128xf32>
    %494 = arith.mulf %493, %491 : vector<8x128xf32>
    %495 = arith.mulf %484, %419 : vector<8x128xf32>
    %496 = arith.addf %494, %495 : vector<8x128xf32>
    %497 = vector.broadcast %424 : vector<8x1xf32> to vector<8x128xf32>
    %498 = arith.mulf %497, %466 : vector<8x128xf32>
    %499 = vector.broadcast %428 : vector<8x1xf32> to vector<8x128xf32>
    %500 = arith.mulf %499, %496 : vector<8x128xf32>
    %501 = vector.extract_strided_slice %498 {offsets = [0, 0], sizes = [8, 32], strides = [1, 1]} : vector<8x128xf32> to vector<8x32xf32>
    %502 = arith.index_cast %c4_i32 : i32 to index
    %c0_113 = arith.constant 0 : index
    %c0_114 = arith.constant 0 : index
    %503 = vector.load %arg11[%502, %c0_113, %c0_114] : memref<8x8x32xf32, #tpu.memory_space<vmem>>, vector<1x8x32xf32>
    %504 = vector.shape_cast %503 : vector<1x8x32xf32> to vector<8x32xf32>
    %505 = vector.shape_cast %501 : vector<8x32xf32> to vector<1x8x32xf32>
    tpu.vector_store %arg11[%502, %c0_113, %c0_114], %505 {strides = array<i32>} : memref<8x8x32xf32, #tpu.memory_space<vmem>>, vector<1x8x32xf32>,
    %506 = arith.index_cast %420 : i32 to index
    %c0_115 = arith.constant 0 : index
    %c0_116 = arith.constant 0 : index
    %507 = vector.load %arg15[%506, %c0_115, %c0_116] : memref<8x8x128xf32, #tpu.memory_space<vmem>>, vector<1x8x128xf32>
    %508 = vector.shape_cast %507 : vector<1x8x128xf32> to vector<8x128xf32>
    %509 = vector.shape_cast %500 : vector<8x128xf32> to vector<1x8x128xf32>
    tpu.vector_store %arg15[%506, %c0_115, %c0_116], %509 {strides = array<i32>} : memref<8x8x128xf32, #tpu.memory_space<vmem>>, vector<1x8x128xf32>,
    %cst_117 = arith.constant 1.000000e+00 : f32
    %510 = vector.broadcast %cst_117 : f32 to vector<8x1xf32>
    %511 = arith.subf %510, %424 : vector<8x1xf32>
    %512 = vector.broadcast %511 : vector<8x1xf32> to vector<8x128xf32>
    %513 = arith.mulf %512, %414 : vector<8x128xf32>
    %514 = arith.addf %498, %513 : vector<8x128xf32>
    %cst_118 = arith.constant 1.000000e+00 : f32
    %515 = vector.broadcast %cst_118 : f32 to vector<8x1xf32>
    %516 = arith.subf %515, %428 : vector<8x1xf32>
    %517 = vector.broadcast %516 : vector<8x1xf32> to vector<8x128xf32>
    %518 = arith.mulf %517, %419 : vector<8x128xf32>
    %519 = arith.addf %500, %518 : vector<8x128xf32>
    %c5_i32 = arith.constant 5 : i32
    %c7_i32_119 = arith.constant 7 : i32
    %520 = arith.subi %c7_i32_119, %c5_i32 : i32
    %521 = vector.broadcast %c5_i32 : i32 to vector<8x1xi32>
    %522 = arith.cmpi sgt, %14, %521 : vector<8x1xi32>
    %523 = arith.extui %522 : vector<8x1xi1> to vector<8x1xi32>
    %524 = arith.sitofp %523 : vector<8x1xi32> to vector<8x1xf32>
    %525 = vector.broadcast %520 : i32 to vector<8x1xi32>
    %526 = arith.cmpi sgt, %14, %525 : vector<8x1xi32>
    %527 = arith.extui %526 : vector<8x1xi1> to vector<8x1xi32>
    %528 = arith.sitofp %527 : vector<8x1xi32> to vector<8x1xf32>
    %c8_i32_120 = arith.constant 8 : i32
    %529 = arith.muli %c5_i32, %c8_i32_120 : i32
    %530 = tpu.assume_multiple %529, 8 : i32
    %531 = arith.index_cast %530 : i32 to index
    %c0_121 = arith.constant 0 : index
    %532 = vector.load %arg13[%531, %c0_121] : memref<64x384xf32, #tpu.memory_space<vmem>>, vector<8x384xf32>
    %c8_i32_122 = arith.constant 8 : i32
    %533 = arith.muli %520, %c8_i32_122 : i32
    %534 = tpu.assume_multiple %533, 8 : i32
    %535 = arith.index_cast %534 : i32 to index
    %c0_123 = arith.constant 0 : index
    %536 = vector.load %arg14[%535, %c0_123] : memref<64x384xf32, #tpu.memory_space<vmem>>, vector<8x384xf32>
    %537 = arith.truncf %514 : vector<8x128xf32> to vector<8x128xbf16>
    %cst_124 = arith.constant dense<0.000000e+00> : vector<8x384xf32>
    %538 = tpu.matmul %537, %15, %cst_124 {dimension_numbers = #tpu.dot_dimension_numbers<[1], [0], [0], [1], [0, 0, 1, 1], [], []>} : vector<8x128xbf16>, vector<128x384xbf16>, vector<8x384xf32> -> vector<8x384xf32>
    %539 = vector.extract_strided_slice %532 {offsets = [0, 0], sizes = [8, 128], strides = [1, 1]} : vector<8x384xf32> to vector<8x128xf32>
    %540 = vector.extract_strided_slice %538 {offsets = [0, 0], sizes = [8, 128], strides = [1, 1]} : vector<8x384xf32> to vector<8x128xf32>
    %541 = arith.addf %539, %540 : vector<8x128xf32>
    %542 = arith.negf %541 : vector<8x128xf32>
    %543 = math.exp %542 : vector<8x128xf32>
    %cst_125 = arith.constant 1.000000e+00 : f32
    %544 = vector.broadcast %cst_125 : f32 to vector<8x128xf32>
    %545 = arith.addf %544, %543 : vector<8x128xf32>
    %546 = arith.divf %544, %545 : vector<8x128xf32>
    %547 = vector.extract_strided_slice %532 {offsets = [0, 128], sizes = [8, 128], strides = [1, 1]} : vector<8x384xf32> to vector<8x128xf32>
    %548 = vector.extract_strided_slice %538 {offsets = [0, 128], sizes = [8, 128], strides = [1, 1]} : vector<8x384xf32> to vector<8x128xf32>
    %549 = arith.addf %547, %548 : vector<8x128xf32>
    %550 = arith.negf %549 : vector<8x128xf32>
    %551 = math.exp %550 : vector<8x128xf32>
    %cst_126 = arith.constant 1.000000e+00 : f32
    %552 = vector.broadcast %cst_126 : f32 to vector<8x128xf32>
    %553 = arith.addf %552, %551 : vector<8x128xf32>
    %554 = arith.divf %552, %553 : vector<8x128xf32>
    %555 = vector.extract_strided_slice %532 {offsets = [0, 256], sizes = [8, 128], strides = [1, 1]} : vector<8x384xf32> to vector<8x128xf32>
    %556 = vector.extract_strided_slice %538 {offsets = [0, 256], sizes = [8, 128], strides = [1, 1]} : vector<8x384xf32> to vector<8x128xf32>
    %557 = vector.broadcast %17 : vector<1x128xf32> to vector<8x128xf32>
    %558 = arith.addf %556, %557 : vector<8x128xf32>
    %559 = arith.mulf %546, %558 : vector<8x128xf32>
    %560 = arith.addf %555, %559 : vector<8x128xf32>
    %561 = math.tanh %560 : vector<8x128xf32>
    %cst_127 = arith.constant 1.000000e+00 : f32
    %562 = vector.broadcast %cst_127 : f32 to vector<8x128xf32>
    %563 = arith.subf %562, %554 : vector<8x128xf32>
    %564 = arith.mulf %563, %561 : vector<8x128xf32>
    %565 = arith.mulf %554, %514 : vector<8x128xf32>
    %566 = arith.addf %564, %565 : vector<8x128xf32>
    %567 = arith.truncf %519 : vector<8x128xf32> to vector<8x128xbf16>
    %cst_128 = arith.constant dense<0.000000e+00> : vector<8x384xf32>
    %568 = tpu.matmul %567, %16, %cst_128 {dimension_numbers = #tpu.dot_dimension_numbers<[1], [0], [0], [1], [0, 0, 1, 1], [], []>} : vector<8x128xbf16>, vector<128x384xbf16>, vector<8x384xf32> -> vector<8x384xf32>
    %569 = vector.extract_strided_slice %536 {offsets = [0, 0], sizes = [8, 128], strides = [1, 1]} : vector<8x384xf32> to vector<8x128xf32>
    %570 = vector.extract_strided_slice %568 {offsets = [0, 0], sizes = [8, 128], strides = [1, 1]} : vector<8x384xf32> to vector<8x128xf32>
    %571 = arith.addf %569, %570 : vector<8x128xf32>
    %572 = arith.negf %571 : vector<8x128xf32>
    %573 = math.exp %572 : vector<8x128xf32>
    %cst_129 = arith.constant 1.000000e+00 : f32
    %574 = vector.broadcast %cst_129 : f32 to vector<8x128xf32>
    %575 = arith.addf %574, %573 : vector<8x128xf32>
    %576 = arith.divf %574, %575 : vector<8x128xf32>
    %577 = vector.extract_strided_slice %536 {offsets = [0, 128], sizes = [8, 128], strides = [1, 1]} : vector<8x384xf32> to vector<8x128xf32>
    %578 = vector.extract_strided_slice %568 {offsets = [0, 128], sizes = [8, 128], strides = [1, 1]} : vector<8x384xf32> to vector<8x128xf32>
    %579 = arith.addf %577, %578 : vector<8x128xf32>
    %580 = arith.negf %579 : vector<8x128xf32>
    %581 = math.exp %580 : vector<8x128xf32>
    %cst_130 = arith.constant 1.000000e+00 : f32
    %582 = vector.broadcast %cst_130 : f32 to vector<8x128xf32>
    %583 = arith.addf %582, %581 : vector<8x128xf32>
    %584 = arith.divf %582, %583 : vector<8x128xf32>
    %585 = vector.extract_strided_slice %536 {offsets = [0, 256], sizes = [8, 128], strides = [1, 1]} : vector<8x384xf32> to vector<8x128xf32>
    %586 = vector.extract_strided_slice %568 {offsets = [0, 256], sizes = [8, 128], strides = [1, 1]} : vector<8x384xf32> to vector<8x128xf32>
    %587 = vector.broadcast %18 : vector<1x128xf32> to vector<8x128xf32>
    %588 = arith.addf %586, %587 : vector<8x128xf32>
    %589 = arith.mulf %576, %588 : vector<8x128xf32>
    %590 = arith.addf %585, %589 : vector<8x128xf32>
    %591 = math.tanh %590 : vector<8x128xf32>
    %cst_131 = arith.constant 1.000000e+00 : f32
    %592 = vector.broadcast %cst_131 : f32 to vector<8x128xf32>
    %593 = arith.subf %592, %584 : vector<8x128xf32>
    %594 = arith.mulf %593, %591 : vector<8x128xf32>
    %595 = arith.mulf %584, %519 : vector<8x128xf32>
    %596 = arith.addf %594, %595 : vector<8x128xf32>
    %597 = vector.broadcast %524 : vector<8x1xf32> to vector<8x128xf32>
    %598 = arith.mulf %597, %566 : vector<8x128xf32>
    %599 = vector.broadcast %528 : vector<8x1xf32> to vector<8x128xf32>
    %600 = arith.mulf %599, %596 : vector<8x128xf32>
    %601 = vector.extract_strided_slice %598 {offsets = [0, 0], sizes = [8, 32], strides = [1, 1]} : vector<8x128xf32> to vector<8x32xf32>
    %602 = arith.index_cast %c5_i32 : i32 to index
    %c0_132 = arith.constant 0 : index
    %c0_133 = arith.constant 0 : index
    %603 = vector.load %arg11[%602, %c0_132, %c0_133] : memref<8x8x32xf32, #tpu.memory_space<vmem>>, vector<1x8x32xf32>
    %604 = vector.shape_cast %603 : vector<1x8x32xf32> to vector<8x32xf32>
    %605 = vector.shape_cast %601 : vector<8x32xf32> to vector<1x8x32xf32>
    tpu.vector_store %arg11[%602, %c0_132, %c0_133], %605 {strides = array<i32>} : memref<8x8x32xf32, #tpu.memory_space<vmem>>, vector<1x8x32xf32>,
    %606 = arith.index_cast %520 : i32 to index
    %c0_134 = arith.constant 0 : index
    %c0_135 = arith.constant 0 : index
    %607 = vector.load %arg15[%606, %c0_134, %c0_135] : memref<8x8x128xf32, #tpu.memory_space<vmem>>, vector<1x8x128xf32>
    %608 = vector.shape_cast %607 : vector<1x8x128xf32> to vector<8x128xf32>
    %609 = vector.shape_cast %600 : vector<8x128xf32> to vector<1x8x128xf32>
    tpu.vector_store %arg15[%606, %c0_134, %c0_135], %609 {strides = array<i32>} : memref<8x8x128xf32, #tpu.memory_space<vmem>>, vector<1x8x128xf32>,
    %cst_136 = arith.constant 1.000000e+00 : f32
    %610 = vector.broadcast %cst_136 : f32 to vector<8x1xf32>
    %611 = arith.subf %610, %524 : vector<8x1xf32>
    %612 = vector.broadcast %611 : vector<8x1xf32> to vector<8x128xf32>
    %613 = arith.mulf %612, %514 : vector<8x128xf32>
    %614 = arith.addf %598, %613 : vector<8x128xf32>
    %cst_137 = arith.constant 1.000000e+00 : f32
    %615 = vector.broadcast %cst_137 : f32 to vector<8x1xf32>
    %616 = arith.subf %615, %528 : vector<8x1xf32>
    %617 = vector.broadcast %616 : vector<8x1xf32> to vector<8x128xf32>
    %618 = arith.mulf %617, %519 : vector<8x128xf32>
    %619 = arith.addf %600, %618 : vector<8x128xf32>
    %c6_i32 = arith.constant 6 : i32
    %c7_i32_138 = arith.constant 7 : i32
    %620 = arith.subi %c7_i32_138, %c6_i32 : i32
    %621 = vector.broadcast %c6_i32 : i32 to vector<8x1xi32>
    %622 = arith.cmpi sgt, %14, %621 : vector<8x1xi32>
    %623 = arith.extui %622 : vector<8x1xi1> to vector<8x1xi32>
    %624 = arith.sitofp %623 : vector<8x1xi32> to vector<8x1xf32>
    %625 = vector.broadcast %620 : i32 to vector<8x1xi32>
    %626 = arith.cmpi sgt, %14, %625 : vector<8x1xi32>
    %627 = arith.extui %626 : vector<8x1xi1> to vector<8x1xi32>
    %628 = arith.sitofp %627 : vector<8x1xi32> to vector<8x1xf32>
    %c8_i32_139 = arith.constant 8 : i32
    %629 = arith.muli %c6_i32, %c8_i32_139 : i32
    %630 = tpu.assume_multiple %629, 8 : i32
    %631 = arith.index_cast %630 : i32 to index
    %c0_140 = arith.constant 0 : index
    %632 = vector.load %arg13[%631, %c0_140] : memref<64x384xf32, #tpu.memory_space<vmem>>, vector<8x384xf32>
    %c8_i32_141 = arith.constant 8 : i32
    %633 = arith.muli %620, %c8_i32_141 : i32
    %634 = tpu.assume_multiple %633, 8 : i32
    %635 = arith.index_cast %634 : i32 to index
    %c0_142 = arith.constant 0 : index
    %636 = vector.load %arg14[%635, %c0_142] : memref<64x384xf32, #tpu.memory_space<vmem>>, vector<8x384xf32>
    %637 = arith.truncf %614 : vector<8x128xf32> to vector<8x128xbf16>
    %cst_143 = arith.constant dense<0.000000e+00> : vector<8x384xf32>
    %638 = tpu.matmul %637, %15, %cst_143 {dimension_numbers = #tpu.dot_dimension_numbers<[1], [0], [0], [1], [0, 0, 1, 1], [], []>} : vector<8x128xbf16>, vector<128x384xbf16>, vector<8x384xf32> -> vector<8x384xf32>
    %639 = vector.extract_strided_slice %632 {offsets = [0, 0], sizes = [8, 128], strides = [1, 1]} : vector<8x384xf32> to vector<8x128xf32>
    %640 = vector.extract_strided_slice %638 {offsets = [0, 0], sizes = [8, 128], strides = [1, 1]} : vector<8x384xf32> to vector<8x128xf32>
    %641 = arith.addf %639, %640 : vector<8x128xf32>
    %642 = arith.negf %641 : vector<8x128xf32>
    %643 = math.exp %642 : vector<8x128xf32>
    %cst_144 = arith.constant 1.000000e+00 : f32
    %644 = vector.broadcast %cst_144 : f32 to vector<8x128xf32>
    %645 = arith.addf %644, %643 : vector<8x128xf32>
    %646 = arith.divf %644, %645 : vector<8x128xf32>
    %647 = vector.extract_strided_slice %632 {offsets = [0, 128], sizes = [8, 128], strides = [1, 1]} : vector<8x384xf32> to vector<8x128xf32>
    %648 = vector.extract_strided_slice %638 {offsets = [0, 128], sizes = [8, 128], strides = [1, 1]} : vector<8x384xf32> to vector<8x128xf32>
    %649 = arith.addf %647, %648 : vector<8x128xf32>
    %650 = arith.negf %649 : vector<8x128xf32>
    %651 = math.exp %650 : vector<8x128xf32>
    %cst_145 = arith.constant 1.000000e+00 : f32
    %652 = vector.broadcast %cst_145 : f32 to vector<8x128xf32>
    %653 = arith.addf %652, %651 : vector<8x128xf32>
    %654 = arith.divf %652, %653 : vector<8x128xf32>
    %655 = vector.extract_strided_slice %632 {offsets = [0, 256], sizes = [8, 128], strides = [1, 1]} : vector<8x384xf32> to vector<8x128xf32>
    %656 = vector.extract_strided_slice %638 {offsets = [0, 256], sizes = [8, 128], strides = [1, 1]} : vector<8x384xf32> to vector<8x128xf32>
    %657 = vector.broadcast %17 : vector<1x128xf32> to vector<8x128xf32>
    %658 = arith.addf %656, %657 : vector<8x128xf32>
    %659 = arith.mulf %646, %658 : vector<8x128xf32>
    %660 = arith.addf %655, %659 : vector<8x128xf32>
    %661 = math.tanh %660 : vector<8x128xf32>
    %cst_146 = arith.constant 1.000000e+00 : f32
    %662 = vector.broadcast %cst_146 : f32 to vector<8x128xf32>
    %663 = arith.subf %662, %654 : vector<8x128xf32>
    %664 = arith.mulf %663, %661 : vector<8x128xf32>
    %665 = arith.mulf %654, %614 : vector<8x128xf32>
    %666 = arith.addf %664, %665 : vector<8x128xf32>
    %667 = arith.truncf %619 : vector<8x128xf32> to vector<8x128xbf16>
    %cst_147 = arith.constant dense<0.000000e+00> : vector<8x384xf32>
    %668 = tpu.matmul %667, %16, %cst_147 {dimension_numbers = #tpu.dot_dimension_numbers<[1], [0], [0], [1], [0, 0, 1, 1], [], []>} : vector<8x128xbf16>, vector<128x384xbf16>, vector<8x384xf32> -> vector<8x384xf32>
    %669 = vector.extract_strided_slice %636 {offsets = [0, 0], sizes = [8, 128], strides = [1, 1]} : vector<8x384xf32> to vector<8x128xf32>
    %670 = vector.extract_strided_slice %668 {offsets = [0, 0], sizes = [8, 128], strides = [1, 1]} : vector<8x384xf32> to vector<8x128xf32>
    %671 = arith.addf %669, %670 : vector<8x128xf32>
    %672 = arith.negf %671 : vector<8x128xf32>
    %673 = math.exp %672 : vector<8x128xf32>
    %cst_148 = arith.constant 1.000000e+00 : f32
    %674 = vector.broadcast %cst_148 : f32 to vector<8x128xf32>
    %675 = arith.addf %674, %673 : vector<8x128xf32>
    %676 = arith.divf %674, %675 : vector<8x128xf32>
    %677 = vector.extract_strided_slice %636 {offsets = [0, 128], sizes = [8, 128], strides = [1, 1]} : vector<8x384xf32> to vector<8x128xf32>
    %678 = vector.extract_strided_slice %668 {offsets = [0, 128], sizes = [8, 128], strides = [1, 1]} : vector<8x384xf32> to vector<8x128xf32>
    %679 = arith.addf %677, %678 : vector<8x128xf32>
    %680 = arith.negf %679 : vector<8x128xf32>
    %681 = math.exp %680 : vector<8x128xf32>
    %cst_149 = arith.constant 1.000000e+00 : f32
    %682 = vector.broadcast %cst_149 : f32 to vector<8x128xf32>
    %683 = arith.addf %682, %681 : vector<8x128xf32>
    %684 = arith.divf %682, %683 : vector<8x128xf32>
    %685 = vector.extract_strided_slice %636 {offsets = [0, 256], sizes = [8, 128], strides = [1, 1]} : vector<8x384xf32> to vector<8x128xf32>
    %686 = vector.extract_strided_slice %668 {offsets = [0, 256], sizes = [8, 128], strides = [1, 1]} : vector<8x384xf32> to vector<8x128xf32>
    %687 = vector.broadcast %18 : vector<1x128xf32> to vector<8x128xf32>
    %688 = arith.addf %686, %687 : vector<8x128xf32>
    %689 = arith.mulf %676, %688 : vector<8x128xf32>
    %690 = arith.addf %685, %689 : vector<8x128xf32>
    %691 = math.tanh %690 : vector<8x128xf32>
    %cst_150 = arith.constant 1.000000e+00 : f32
    %692 = vector.broadcast %cst_150 : f32 to vector<8x128xf32>
    %693 = arith.subf %692, %684 : vector<8x128xf32>
    %694 = arith.mulf %693, %691 : vector<8x128xf32>
    %695 = arith.mulf %684, %619 : vector<8x128xf32>
    %696 = arith.addf %694, %695 : vector<8x128xf32>
    %697 = vector.broadcast %624 : vector<8x1xf32> to vector<8x128xf32>
    %698 = arith.mulf %697, %666 : vector<8x128xf32>
    %699 = vector.broadcast %628 : vector<8x1xf32> to vector<8x128xf32>
    %700 = arith.mulf %699, %696 : vector<8x128xf32>
    %701 = vector.extract_strided_slice %698 {offsets = [0, 0], sizes = [8, 32], strides = [1, 1]} : vector<8x128xf32> to vector<8x32xf32>
    %702 = arith.index_cast %c6_i32 : i32 to index
    %c0_151 = arith.constant 0 : index
    %c0_152 = arith.constant 0 : index
    %703 = vector.load %arg11[%702, %c0_151, %c0_152] : memref<8x8x32xf32, #tpu.memory_space<vmem>>, vector<1x8x32xf32>
    %704 = vector.shape_cast %703 : vector<1x8x32xf32> to vector<8x32xf32>
    %705 = vector.shape_cast %701 : vector<8x32xf32> to vector<1x8x32xf32>
    tpu.vector_store %arg11[%702, %c0_151, %c0_152], %705 {strides = array<i32>} : memref<8x8x32xf32, #tpu.memory_space<vmem>>, vector<1x8x32xf32>,
    %706 = arith.index_cast %620 : i32 to index
    %c0_153 = arith.constant 0 : index
    %c0_154 = arith.constant 0 : index
    %707 = vector.load %arg15[%706, %c0_153, %c0_154] : memref<8x8x128xf32, #tpu.memory_space<vmem>>, vector<1x8x128xf32>
    %708 = vector.shape_cast %707 : vector<1x8x128xf32> to vector<8x128xf32>
    %709 = vector.shape_cast %700 : vector<8x128xf32> to vector<1x8x128xf32>
    tpu.vector_store %arg15[%706, %c0_153, %c0_154], %709 {strides = array<i32>} : memref<8x8x128xf32, #tpu.memory_space<vmem>>, vector<1x8x128xf32>,
    %cst_155 = arith.constant 1.000000e+00 : f32
    %710 = vector.broadcast %cst_155 : f32 to vector<8x1xf32>
    %711 = arith.subf %710, %624 : vector<8x1xf32>
    %712 = vector.broadcast %711 : vector<8x1xf32> to vector<8x128xf32>
    %713 = arith.mulf %712, %614 : vector<8x128xf32>
    %714 = arith.addf %698, %713 : vector<8x128xf32>
    %cst_156 = arith.constant 1.000000e+00 : f32
    %715 = vector.broadcast %cst_156 : f32 to vector<8x1xf32>
    %716 = arith.subf %715, %628 : vector<8x1xf32>
    %717 = vector.broadcast %716 : vector<8x1xf32> to vector<8x128xf32>
    %718 = arith.mulf %717, %619 : vector<8x128xf32>
    %719 = arith.addf %700, %718 : vector<8x128xf32>
    %c7_i32_157 = arith.constant 7 : i32
    %c7_i32_158 = arith.constant 7 : i32
    %720 = arith.subi %c7_i32_158, %c7_i32_157 : i32
    %721 = vector.broadcast %c7_i32_157 : i32 to vector<8x1xi32>
    %722 = arith.cmpi sgt, %14, %721 : vector<8x1xi32>
    %723 = arith.extui %722 : vector<8x1xi1> to vector<8x1xi32>
    %724 = arith.sitofp %723 : vector<8x1xi32> to vector<8x1xf32>
    %725 = vector.broadcast %720 : i32 to vector<8x1xi32>
    %726 = arith.cmpi sgt, %14, %725 : vector<8x1xi32>
    %727 = arith.extui %726 : vector<8x1xi1> to vector<8x1xi32>
    %728 = arith.sitofp %727 : vector<8x1xi32> to vector<8x1xf32>
    %c8_i32_159 = arith.constant 8 : i32
    %729 = arith.muli %c7_i32_157, %c8_i32_159 : i32
    %730 = tpu.assume_multiple %729, 8 : i32
    %731 = arith.index_cast %730 : i32 to index
    %c0_160 = arith.constant 0 : index
    %732 = vector.load %arg13[%731, %c0_160] : memref<64x384xf32, #tpu.memory_space<vmem>>, vector<8x384xf32>
    %c8_i32_161 = arith.constant 8 : i32
    %733 = arith.muli %720, %c8_i32_161 : i32
    %734 = tpu.assume_multiple %733, 8 : i32
    %735 = arith.index_cast %734 : i32 to index
    %c0_162 = arith.constant 0 : index
    %736 = vector.load %arg14[%735, %c0_162] : memref<64x384xf32, #tpu.memory_space<vmem>>, vector<8x384xf32>
    %737 = arith.truncf %714 : vector<8x128xf32> to vector<8x128xbf16>
    %cst_163 = arith.constant dense<0.000000e+00> : vector<8x384xf32>
    %738 = tpu.matmul %737, %15, %cst_163 {dimension_numbers = #tpu.dot_dimension_numbers<[1], [0], [0], [1], [0, 0, 1, 1], [], []>} : vector<8x128xbf16>, vector<128x384xbf16>, vector<8x384xf32> -> vector<8x384xf32>
    %739 = vector.extract_strided_slice %732 {offsets = [0, 0], sizes = [8, 128], strides = [1, 1]} : vector<8x384xf32> to vector<8x128xf32>
    %740 = vector.extract_strided_slice %738 {offsets = [0, 0], sizes = [8, 128], strides = [1, 1]} : vector<8x384xf32> to vector<8x128xf32>
    %741 = arith.addf %739, %740 : vector<8x128xf32>
    %742 = arith.negf %741 : vector<8x128xf32>
    %743 = math.exp %742 : vector<8x128xf32>
    %cst_164 = arith.constant 1.000000e+00 : f32
    %744 = vector.broadcast %cst_164 : f32 to vector<8x128xf32>
    %745 = arith.addf %744, %743 : vector<8x128xf32>
    %746 = arith.divf %744, %745 : vector<8x128xf32>
    %747 = vector.extract_strided_slice %732 {offsets = [0, 128], sizes = [8, 128], strides = [1, 1]} : vector<8x384xf32> to vector<8x128xf32>
    %748 = vector.extract_strided_slice %738 {offsets = [0, 128], sizes = [8, 128], strides = [1, 1]} : vector<8x384xf32> to vector<8x128xf32>
    %749 = arith.addf %747, %748 : vector<8x128xf32>
    %750 = arith.negf %749 : vector<8x128xf32>
    %751 = math.exp %750 : vector<8x128xf32>
    %cst_165 = arith.constant 1.000000e+00 : f32
    %752 = vector.broadcast %cst_165 : f32 to vector<8x128xf32>
    %753 = arith.addf %752, %751 : vector<8x128xf32>
    %754 = arith.divf %752, %753 : vector<8x128xf32>
    %755 = vector.extract_strided_slice %732 {offsets = [0, 256], sizes = [8, 128], strides = [1, 1]} : vector<8x384xf32> to vector<8x128xf32>
    %756 = vector.extract_strided_slice %738 {offsets = [0, 256], sizes = [8, 128], strides = [1, 1]} : vector<8x384xf32> to vector<8x128xf32>
    %757 = vector.broadcast %17 : vector<1x128xf32> to vector<8x128xf32>
    %758 = arith.addf %756, %757 : vector<8x128xf32>
    %759 = arith.mulf %746, %758 : vector<8x128xf32>
    %760 = arith.addf %755, %759 : vector<8x128xf32>
    %761 = math.tanh %760 : vector<8x128xf32>
    %cst_166 = arith.constant 1.000000e+00 : f32
    %762 = vector.broadcast %cst_166 : f32 to vector<8x128xf32>
    %763 = arith.subf %762, %754 : vector<8x128xf32>
    %764 = arith.mulf %763, %761 : vector<8x128xf32>
    %765 = arith.mulf %754, %714 : vector<8x128xf32>
    %766 = arith.addf %764, %765 : vector<8x128xf32>
    %767 = arith.truncf %719 : vector<8x128xf32> to vector<8x128xbf16>
    %cst_167 = arith.constant dense<0.000000e+00> : vector<8x384xf32>
    %768 = tpu.matmul %767, %16, %cst_167 {dimension_numbers = #tpu.dot_dimension_numbers<[1], [0], [0], [1], [0, 0, 1, 1], [], []>} : vector<8x128xbf16>, vector<128x384xbf16>, vector<8x384xf32> -> vector<8x384xf32>
    %769 = vector.extract_strided_slice %736 {offsets = [0, 0], sizes = [8, 128], strides = [1, 1]} : vector<8x384xf32> to vector<8x128xf32>
    %770 = vector.extract_strided_slice %768 {offsets = [0, 0], sizes = [8, 128], strides = [1, 1]} : vector<8x384xf32> to vector<8x128xf32>
    %771 = arith.addf %769, %770 : vector<8x128xf32>
    %772 = arith.negf %771 : vector<8x128xf32>
    %773 = math.exp %772 : vector<8x128xf32>
    %cst_168 = arith.constant 1.000000e+00 : f32
    %774 = vector.broadcast %cst_168 : f32 to vector<8x128xf32>
    %775 = arith.addf %774, %773 : vector<8x128xf32>
    %776 = arith.divf %774, %775 : vector<8x128xf32>
    %777 = vector.extract_strided_slice %736 {offsets = [0, 128], sizes = [8, 128], strides = [1, 1]} : vector<8x384xf32> to vector<8x128xf32>
    %778 = vector.extract_strided_slice %768 {offsets = [0, 128], sizes = [8, 128], strides = [1, 1]} : vector<8x384xf32> to vector<8x128xf32>
    %779 = arith.addf %777, %778 : vector<8x128xf32>
    %780 = arith.negf %779 : vector<8x128xf32>
    %781 = math.exp %780 : vector<8x128xf32>
    %cst_169 = arith.constant 1.000000e+00 : f32
    %782 = vector.broadcast %cst_169 : f32 to vector<8x128xf32>
    %783 = arith.addf %782, %781 : vector<8x128xf32>
    %784 = arith.divf %782, %783 : vector<8x128xf32>
    %785 = vector.extract_strided_slice %736 {offsets = [0, 256], sizes = [8, 128], strides = [1, 1]} : vector<8x384xf32> to vector<8x128xf32>
    %786 = vector.extract_strided_slice %768 {offsets = [0, 256], sizes = [8, 128], strides = [1, 1]} : vector<8x384xf32> to vector<8x128xf32>
    %787 = vector.broadcast %18 : vector<1x128xf32> to vector<8x128xf32>
    %788 = arith.addf %786, %787 : vector<8x128xf32>
    %789 = arith.mulf %776, %788 : vector<8x128xf32>
    %790 = arith.addf %785, %789 : vector<8x128xf32>
    %791 = math.tanh %790 : vector<8x128xf32>
    %cst_170 = arith.constant 1.000000e+00 : f32
    %792 = vector.broadcast %cst_170 : f32 to vector<8x128xf32>
    %793 = arith.subf %792, %784 : vector<8x128xf32>
    %794 = arith.mulf %793, %791 : vector<8x128xf32>
    %795 = arith.mulf %784, %719 : vector<8x128xf32>
    %796 = arith.addf %794, %795 : vector<8x128xf32>
    %797 = vector.broadcast %724 : vector<8x1xf32> to vector<8x128xf32>
    %798 = arith.mulf %797, %766 : vector<8x128xf32>
    %799 = vector.broadcast %728 : vector<8x1xf32> to vector<8x128xf32>
    %800 = arith.mulf %799, %796 : vector<8x128xf32>
    %801 = vector.extract_strided_slice %798 {offsets = [0, 0], sizes = [8, 32], strides = [1, 1]} : vector<8x128xf32> to vector<8x32xf32>
    %802 = arith.index_cast %c7_i32_157 : i32 to index
    %c0_171 = arith.constant 0 : index
    %c0_172 = arith.constant 0 : index
    %803 = vector.load %arg11[%802, %c0_171, %c0_172] : memref<8x8x32xf32, #tpu.memory_space<vmem>>, vector<1x8x32xf32>
    %804 = vector.shape_cast %803 : vector<1x8x32xf32> to vector<8x32xf32>
    %805 = vector.shape_cast %801 : vector<8x32xf32> to vector<1x8x32xf32>
    tpu.vector_store %arg11[%802, %c0_171, %c0_172], %805 {strides = array<i32>} : memref<8x8x32xf32, #tpu.memory_space<vmem>>, vector<1x8x32xf32>,
    %806 = arith.index_cast %720 : i32 to index
    %c0_173 = arith.constant 0 : index
    %c0_174 = arith.constant 0 : index
    %807 = vector.load %arg15[%806, %c0_173, %c0_174] : memref<8x8x128xf32, #tpu.memory_space<vmem>>, vector<1x8x128xf32>
    %808 = vector.shape_cast %807 : vector<1x8x128xf32> to vector<8x128xf32>
    %809 = vector.shape_cast %800 : vector<8x128xf32> to vector<1x8x128xf32>
    tpu.vector_store %arg15[%806, %c0_173, %c0_174], %809 {strides = array<i32>} : memref<8x8x128xf32, #tpu.memory_space<vmem>>, vector<1x8x128xf32>,
    %cst_175 = arith.constant 1.000000e+00 : f32
    %810 = vector.broadcast %cst_175 : f32 to vector<8x1xf32>
    %811 = arith.subf %810, %724 : vector<8x1xf32>
    %812 = vector.broadcast %811 : vector<8x1xf32> to vector<8x128xf32>
    %813 = arith.mulf %812, %714 : vector<8x128xf32>
    %814 = arith.addf %798, %813 : vector<8x128xf32>
    %cst_176 = arith.constant 1.000000e+00 : f32
    %815 = vector.broadcast %cst_176 : f32 to vector<8x1xf32>
    %816 = arith.subf %815, %728 : vector<8x1xf32>
    %817 = vector.broadcast %816 : vector<8x1xf32> to vector<8x128xf32>
    %818 = arith.mulf %817, %719 : vector<8x128xf32>
    %819 = arith.addf %800, %818 : vector<8x128xf32>
    %c8_i32_177 = arith.constant 8 : i32
    %820 = vector.extract_strided_slice %814 {offsets = [0, 0], sizes = [8, 32], strides = [1, 1]} : vector<8x128xf32> to vector<8x32xf32>
    %c0_178 = arith.constant 0 : index
    %c0_179 = arith.constant 0 : index
    %c0_180 = arith.constant 0 : index
    %821 = vector.load %arg12[%c0_178, %c0_179, %c0_180] : memref<2x8x32xf32, #tpu.memory_space<vmem>>, vector<1x8x32xf32>
    %822 = vector.shape_cast %821 : vector<1x8x32xf32> to vector<8x32xf32>
    %823 = vector.shape_cast %820 : vector<8x32xf32> to vector<1x8x32xf32>
    tpu.vector_store %arg12[%c0_178, %c0_179, %c0_180], %823 {strides = array<i32>} : memref<2x8x32xf32, #tpu.memory_space<vmem>>, vector<1x8x32xf32>,
    %824 = vector.extract_strided_slice %819 {offsets = [0, 0], sizes = [8, 32], strides = [1, 1]} : vector<8x128xf32> to vector<8x32xf32>
    %c1 = arith.constant 1 : index
    %c0_181 = arith.constant 0 : index
    %c0_182 = arith.constant 0 : index
    %825 = vector.load %arg12[%c1, %c0_181, %c0_182] : memref<2x8x32xf32, #tpu.memory_space<vmem>>, vector<1x8x32xf32>
    %826 = vector.shape_cast %825 : vector<1x8x32xf32> to vector<8x32xf32>
    %827 = vector.shape_cast %824 : vector<8x32xf32> to vector<1x8x32xf32>
    tpu.vector_store %arg12[%c1, %c0_181, %c0_182], %827 {strides = array<i32>} : memref<2x8x32xf32, #tpu.memory_space<vmem>>, vector<1x8x32xf32>,
    %c0_183 = arith.constant 0 : index
    %c0_184 = arith.constant 0 : index
    %c0_185 = arith.constant 0 : index
    %828 = vector.load %arg11[%c0_183, %c0_184, %c0_185] : memref<8x8x32xf32, #tpu.memory_space<vmem>>, vector<8x8x32xf32>
    %c0_186 = arith.constant 0 : index
    %c0_187 = arith.constant 0 : index
    %c0_188 = arith.constant 0 : index
    %829 = vector.load %arg15[%c0_186, %c0_187, %c0_188] : memref<8x8x128xf32, #tpu.memory_space<vmem>>, vector<8x8x32xf32>
    %830 = arith.addf %828, %829 : vector<8x8x32xf32>
    %c0_189 = arith.constant 0 : index
    %c0_190 = arith.constant 0 : index
    %c0_191 = arith.constant 0 : index
    %831 = vector.load %arg11[%c0_189, %c0_190, %c0_191] : memref<8x8x32xf32, #tpu.memory_space<vmem>>, vector<8x8x32xf32>
    tpu.vector_store %arg11[%c0_189, %c0_190, %c0_191], %830 {strides = array<i32>} : memref<8x8x32xf32, #tpu.memory_space<vmem>>, vector<8x8x32xf32>,
    return
  }
  func.func @transform_0(%arg0: i32) -> (i32, i32, i32) {
    %c0_i32 = arith.constant 0 : i32
    %c0_i32_0 = arith.constant 0 : i32
    %c0_i32_1 = arith.constant 0 : i32
    return %arg0, %c0_i32, %c0_i32_0 : i32, i32, i32
  }
  func.func @transform_1(%arg0: i32) -> (i32, i32) {
    %c0_i32 = arith.constant 0 : i32
    %c0_i32_0 = arith.constant 0 : i32
    return %arg0, %c0_i32 : i32, i32
  }
  func.func @transform_2(%arg0: i32) -> (i32, i32) {
    %c0_i32 = arith.constant 0 : i32
    %c0_i32_0 = arith.constant 0 : i32
    %c0_i32_1 = arith.constant 0 : i32
    return %c0_i32, %c0_i32_0 : i32, i32
  }
  func.func @transform_3(%arg0: i32) -> (i32, i32) {
    %c0_i32 = arith.constant 0 : i32
    %c0_i32_0 = arith.constant 0 : i32
    %c0_i32_1 = arith.constant 0 : i32
    return %c0_i32, %c0_i32_0 : i32, i32
  }
  func.func @transform_4(%arg0: i32) -> (i32, i32) {
    %c0_i32 = arith.constant 0 : i32
    %c0_i32_0 = arith.constant 0 : i32
    %c0_i32_1 = arith.constant 0 : i32
    return %c0_i32, %c0_i32_0 : i32, i32
  }
  func.func @transform_5(%arg0: i32) -> (i32, i32) {
    %c0_i32 = arith.constant 0 : i32
    %c0_i32_0 = arith.constant 0 : i32
    %c0_i32_1 = arith.constant 0 : i32
    return %c0_i32, %c0_i32_0 : i32, i32
  }
  func.func @transform_6(%arg0: i32) -> (i32, i32) {
    %c0_i32 = arith.constant 0 : i32
    %c0_i32_0 = arith.constant 0 : i32
    %c0_i32_1 = arith.constant 0 : i32
    return %c0_i32, %c0_i32_0 : i32, i32
  }
  func.func @transform_7(%arg0: i32) -> (i32, i32) {
    %c0_i32 = arith.constant 0 : i32
    %c0_i32_0 = arith.constant 0 : i32
    %c0_i32_1 = arith.constant 0 : i32
    return %c0_i32, %c0_i32_0 : i32, i32
  }
  func.func @transform_8(%arg0: i32) -> (i32, i32) {
    %c0_i32 = arith.constant 0 : i32
    %c0_i32_0 = arith.constant 0 : i32
    %c0_i32_1 = arith.constant 0 : i32
    return %c0_i32, %c0_i32_0 : i32, i32
  }
  func.func @transform_9(%arg0: i32) -> (i32, i32) {
    %c0_i32 = arith.constant 0 : i32
    %c0_i32_0 = arith.constant 0 : i32
    %c0_i32_1 = arith.constant 0 : i32
    return %c0_i32, %c0_i32_0 : i32, i32
  }
  func.func @transform_10(%arg0: i32) -> (i32, i32, i32) {
    %c0_i32 = arith.constant 0 : i32
    %c0_i32_0 = arith.constant 0 : i32
    %c0_i32_1 = arith.constant 0 : i32
    return %c0_i32, %arg0, %c0_i32_0 : i32, i32, i32
  }
  func.func @transform_11(%arg0: i32) -> (i32, i32, i32) {
    %c0_i32 = arith.constant 0 : i32
    %c0_i32_0 = arith.constant 0 : i32
    %c0_i32_1 = arith.constant 0 : i32
    return %c0_i32, %arg0, %c0_i32_0 : i32, i32, i32
  }
}

</mosaic_0001>

<bundles_post_ra>
// kernel: tpu_custom_call.1
= control target key start
LH: loop header
LB: loop body
LE: loop exit
PB: predicated region body
PF: predicated region fallthrough
CT: control target
= control target key end

     0   :  { %17 = vsyncpa [#allocation6], 0  ;;  %s5690_s0 = inlined_call_operand.hbm [shape: bf16[1,64,32], index: 0, kind: input, shape index: {}]   ;;  %s5691_s1 = inlined_call_operand.hbm [shape: s32[8,1], index: 1, kind: input, shape index: {}]   ;;  %s5692_s2 = inlined_call_operand.hbm [shape: bf16[32,384], index: 2, kind: input, shape index: {}]   ;;  %s5693_s3 = inlined_call_operand.hbm [shape: bf16[32,384], index: 3, kind: input, shape index: {}]   ;;  %s5694_s4 = inlined_call_operand.hbm [shape: f32[1,384], index: 4, kind: input, shape index: {}]   ;;  %s5695_s5 = inlined_call_operand.hbm [shape: f32[1,384], index: 5, kind: input, shape index: {}]   ;;  %s5696_s6 = inlined_call_operand.hbm [shape: bf16[128,384], index: 6, kind: input, shape index: {}]   ;;  %s5697_s7 = inlined_call_operand.hbm [shape: bf16[128,384], index: 7, kind: input, shape index: {}]   ;;  %s5698_s8 = inlined_call_operand.hbm [shape: f32[1,128], index: 8, kind: input, shape index: {}]   ;;  %s5699_s9 = inlined_call_operand.hbm [shape: f32[1,128], index: 9, kind: input, shape index: {}]   ;;  %s5700_s10 = inlined_call_operand.hbm [shape: f32[8,8,32], index: 10, kind: output, shape index: {0}]   ;;  %s5701_s11 = inlined_call_operand.hbm [shape: f32[2,8,32], index: 11, kind: output, shape index: {1}]  }
   0x1   :  { %18 = vsyncpa [#allocation9], 0 }
   0x2   :  { %19 = vsyncpa [#allocation12], 0 }
   0x3   :  { %20 = vsyncpa [#allocation15], 0 }
   0x4   :  { %21 = vsyncpa [#allocation18], 0 }
   0x5   :  { %22 = vsyncpa [#allocation21], 0 }
   0x6   :  { %23 = vsyncpa [#allocation7], 0 }
   0x7   :  { %24 = vsyncpa [#allocation24], 0  ;;  %s4278_s17 = smov [#allocation8]   ;;  %s3998_s21 = scalar_lea.hbm %s5691_s1, 128 }
   0x8   :  { %s43_s18 = sshll.u32 %s4278_s17, 4  ;;  %p3999_p0 = scmp.ne.s32.totalorder %s5691_s1, %s3998_s21  ;;  %s44_s18 = int_to_ptr.vmem [resolvable:$true] %s43_s18 }
   0x9   :  { %p4002_p1 = scmp.lt.u32.totalorder %s3998_s21, %s5691_s1 }
   0xb   :  { %p4004_p2 = pnand %p4002_p1, %p3999_p0 }
   0xd   :  { %4007 = shalt.err (!%p4004_p2)
}
   0xe   :  { %s4008_s26 = scalar_lea.vmem %s44_s18, 128  ;;  %p4013_p4 = scmp.lt.s32.totalorder %s44_s18, %s44_s18 }
   0xf   :  { %p4009_p3 = scmp.ne.s32.totalorder %s44_s18, %s4008_s26  ;;  %p4014_p5 = scmp.lt.s32.totalorder %s4008_s26, %s4008_s26 }
  0x11   :  { %p4015_p6 = por %p4014_p5, %p4013_p4 }
  0x13   :  { %p4016_p7 = pnand %p4015_p6, %p4009_p3 }
  0x15   :  { %4019 = shalt.err (!%p4016_p7)
}
  0x16   :  { %46 = dma.hbm_to_vmem [thread:$0]  %s5691_s1, 128, %s44_s18, [#allocation9]  }
  0x17   :  { %s4279_s29 = smov [#allocation11]   ;;  %s4280_s12 = smov [#allocation14]  }
  0x18   :  { %s64_s30 = sshll.u32 %s4279_s29, 4  ;;  %s87_s13 = sshll.u32 %s4280_s12, 4  ;;  %s65_s30 = int_to_ptr.vmem [resolvable:$true] %s64_s30  ;;  %s88_s13 = int_to_ptr.vmem [resolvable:$true] %s87_s13 }
  0x19   :  { %s4020_s16 = scalar_lea.hbm %s5693_s3, 768 }
  0x1a   :  { %p4021_p8 = scmp.ne.s32.totalorder %s5693_s3, %s4020_s16  ;;  %p4024_p9 = scmp.lt.u32.totalorder %s4020_s16, %s5693_s3 }
  0x1c   :  { %p4026_p10 = pnand %p4024_p9, %p4021_p8 }
  0x1e   :  { %4029 = shalt.err (!%p4026_p10)
}
  0x1f   :  { %s4030_s1 = scalar_lea.vmem %s65_s30, 768  ;;  %p4035_p12 = scmp.lt.s32.totalorder %s65_s30, %s65_s30 }
  0x20   :  { %p4031_p11 = scmp.ne.s32.totalorder %s65_s30, %s4030_s1  ;;  %p4036_p13 = scmp.lt.s32.totalorder %s4030_s1, %s4030_s1 }
  0x22   :  { %p4037_p0 = por %p4036_p13, %p4035_p12 }
  0x24   :  { %p4038_p1 = pnand %p4037_p0, %p4031_p11 }
  0x26   :  { %4041 = shalt.err (!%p4038_p1)
}
  0x27   :  { %s4281_s18 = smov 192   ;;  %s4282_s22 = smov 12  }
  0x28   :  { %70 = dma.hbm_to_vmem [thread:$0]  %s5693_s3, 768, %s65_s30, [#allocation12], %s4281_s18, %s4281_s18, %s4282_s22  }
  0x29   :  { %s4042_s27 = scalar_lea.hbm %s5695_s5, 48 }
  0x2a   :  { %p4043_p2 = scmp.ne.s32.totalorder %s5695_s5, %s4042_s27  ;;  %p4046_p3 = scmp.lt.u32.totalorder %s4042_s27, %s5695_s5 }
  0x2c   :  { %p4048_p4 = pnand %p4046_p3, %p4043_p2 }
  0x2e   :  { %4051 = shalt.err (!%p4048_p4)
}
  0x2f   :  { %s4052_s15 = scalar_lea.vmem %s88_s13, 48  ;;  %s4056_s16 = scalar_lea.vmem %s88_s13, 64 }
  0x30   :  { %p4053_p5 = scmp.ne.s32.totalorder %s88_s13, %s4052_s15  ;;  %p4057_p6 = scmp.lt.s32.totalorder %s88_s13, %s88_s13 }
  0x31   :  { %p4058_p7 = scmp.lt.s32.totalorder %s4056_s16, %s4052_s15 }
  0x33   :  { %p4059_p8 = por %p4058_p7, %p4057_p6 }
  0x35   :  { %p4060_p9 = pnand %p4059_p8, %p4053_p5 }
  0x37   :  { %4063 = shalt.err (!%p4060_p9)
}
  0x38   :  { %90 = dma.hbm_to_vmem [thread:$0]  %s5695_s5, 48, %s88_s13, [#allocation15]  }
  0x39   :  { %s4283_s17 = smov [#allocation17]   ;;  %s4284_s20 = smov [#allocation5]  }
  0x3a   :  { %s108_s19 = sshll.u32 %s4283_s17, 4  ;;  %s30_s21 = sshll.u32 %s4284_s20, 4  ;;  %s109_s19 = int_to_ptr.vmem [resolvable:$true] %s108_s19  ;;  %s31_s21 = int_to_ptr.vmem [resolvable:$true] %s30_s21 }
  0x3b   :  { %s4064_s24 = scalar_lea.hbm %s5697_s7, 3072 }
  0x3c   :  { %p4065_p10 = scmp.ne.s32.totalorder %s5697_s7, %s4064_s24  ;;  %p4068_p11 = scmp.lt.u32.totalorder %s4064_s24, %s5697_s7 }
  0x3e   :  { %p4070_p12 = pnand %p4068_p11, %p4065_p10 }
  0x40   :  { %4073 = shalt.err (!%p4070_p12)
}
  0x41   :  { %s4074_s5 = scalar_lea.vmem %s109_s19, 3072  ;;  %p4079_p0 = scmp.lt.s32.totalorder %s109_s19, %s109_s19 }
  0x42   :  { %p4075_p13 = scmp.ne.s32.totalorder %s109_s19, %s4074_s5  ;;  %p4080_p1 = scmp.lt.s32.totalorder %s4074_s5, %s4074_s5 }
  0x44   :  { %p4081_p2 = por %p4080_p1, %p4079_p0 }
  0x46   :  { %p4082_p3 = pnand %p4081_p2, %p4075_p13 }
  0x48   :  { %4085 = shalt.err (!%p4082_p3)
}
  0x49   :  { %114 = dma.hbm_to_vmem [thread:$0]  %s5697_s7, 3072, %s109_s19, [#allocation18], %s4281_s18, %s4281_s18, %s4282_s22  }
  0x4a   :  { %s4086_s15 = scalar_lea.hbm %s5690_s0, 512 }
  0x4b   :  { %p4087_p4 = scmp.ne.s32.totalorder %s5690_s0, %s4086_s15  ;;  %p4090_p5 = scmp.lt.u32.totalorder %s4086_s15, %s5690_s0 }
  0x4d   :  { %p4092_p6 = pnand %p4090_p5, %p4087_p4 }
  0x4f   :  { %4095 = shalt.err (!%p4092_p6)
}
  0x50   :  { %s4096_s20 = scalar_lea.vmem %s31_s21, 512  ;;  %p4101_p8 = scmp.lt.s32.totalorder %s31_s21, %s31_s21 }
  0x51   :  { %p4097_p7 = scmp.ne.s32.totalorder %s31_s21, %s4096_s20  ;;  %p4102_p9 = scmp.lt.s32.totalorder %s4096_s20, %s4096_s20 }
  0x53   :  { %p4103_p10 = por %p4102_p9, %p4101_p8 }
  0x55   :  { %p4104_p11 = pnand %p4103_p10, %p4097_p7 }
  0x57   :  { %4107 = shalt.err (!%p4104_p11)
}
  0x58   :  { %s4285_s7 = smov 64   ;;  %s4286_s19 = smov 4  }
  0x59   :  { %36 = dma.hbm_to_vmem [thread:$0]  %s5690_s0, 512, %s31_s21, [#allocation6], %s4285_s7, %s4285_s7, %s4286_s19  }
  0x5a   :  { %s4287_s24 = smov [#allocation10]   ;;  %s4288_s26 = smov [#allocation13]  }
  0x5b   :  { %s52_s25 = sshll.u32 %s4287_s24, 4  ;;  %s77_s27 = sshll.u32 %s4288_s26, 4  ;;  %s53_s25 = int_to_ptr.vmem [resolvable:$true] %s52_s25  ;;  %s78_s27 = int_to_ptr.vmem [resolvable:$true] %s77_s27 }
  0x5c   :  { %s4108_s13 = scalar_lea.hbm %s5692_s2, 768 }
  0x5d   :  { %p4109_p12 = scmp.ne.s32.totalorder %s5692_s2, %s4108_s13  ;;  %p4112_p13 = scmp.lt.u32.totalorder %s4108_s13, %s5692_s2 }
  0x5f   :  { %p4114_p0 = pnand %p4112_p13, %p4109_p12 }
  0x61   :  { %4117 = shalt.err (!%p4114_p0)
}
  0x62   :  { %s4118_s0 = scalar_lea.vmem %s53_s25, 768  ;;  %p4123_p2 = scmp.lt.s32.totalorder %s53_s25, %s53_s25 }
  0x63   :  { %p4119_p1 = scmp.ne.s32.totalorder %s53_s25, %s4118_s0  ;;  %p4124_p3 = scmp.lt.s32.totalorder %s4118_s0, %s4118_s0 }
  0x65   :  { %p4125_p4 = por %p4124_p3, %p4123_p2 }
  0x67   :  { %p4126_p5 = pnand %p4125_p4, %p4119_p1 }
  0x69   :  { %4129 = shalt.err (!%p4126_p5)
}
  0x6a   :  { %58 = dma.hbm_to_vmem [thread:$0]  %s5692_s2, 768, %s53_s25, [#allocation9], %s4281_s18, %s4281_s18, %s4282_s22  }
  0x6b   :  { %s4130_s17 = scalar_lea.hbm %s5694_s4, 48 }
  0x6c   :  { %p4131_p6 = scmp.ne.s32.totalorder %s5694_s4, %s4130_s17  ;;  %p4134_p7 = scmp.lt.u32.totalorder %s4130_s17, %s5694_s4 }
  0x6e   :  { %p4136_p8 = pnand %p4134_p7, %p4131_p6 }
  0x70   :  { %4139 = shalt.err (!%p4136_p8)
}
  0x71   :  { %s4140_s23 = scalar_lea.vmem %s78_s27, 48  ;;  %s4144_s24 = scalar_lea.vmem %s78_s27, 64 }
  0x72   :  { %p4141_p9 = scmp.ne.s32.totalorder %s78_s27, %s4140_s23  ;;  %p4145_p10 = scmp.lt.s32.totalorder %s78_s27, %s78_s27 }
  0x73   :  { %p4146_p11 = scmp.lt.s32.totalorder %s4144_s24, %s4140_s23 }
  0x75   :  { %p4147_p12 = por %p4146_p11, %p4145_p10 }
  0x77   :  { %p4148_p13 = pnand %p4147_p12, %p4141_p9 }
  0x79   :  { %4151 = shalt.err (!%p4148_p13)
}
  0x7a   :  { %80 = dma.hbm_to_vmem [thread:$0]  %s5694_s4, 48, %s78_s27, [#allocation12]  }
  0x7b   :  { %s4289_s26 = smov [#allocation16]   ;;  %s4290_s5 = smov [#allocation19]  }
  0x7c   :  { %s96_s28 = sshll.u32 %s4289_s26, 4  ;;  %s121_s13 = sshll.u32 %s4290_s5, 4  ;;  %s97_s28 = int_to_ptr.vmem [resolvable:$true] %s96_s28  ;;  %s122_s13 = int_to_ptr.vmem [resolvable:$true] %s121_s13 }
  0x7d   :  { %s4152_s14 = scalar_lea.hbm %s5696_s6, 3072 }
  0x7e   :  { %p4153_p0 = scmp.ne.s32.totalorder %s5696_s6, %s4152_s14  ;;  %p4156_p1 = scmp.lt.u32.totalorder %s4152_s14, %s5696_s6 }
  0x80   :  { %p4158_p2 = pnand %p4156_p1, %p4153_p0 }
  0x82   :  { %4161 = shalt.err (!%p4158_p2)
}
  0x83   :  { %s4162_s4 = scalar_lea.vmem %s97_s28, 3072  ;;  %p4167_p4 = scmp.lt.s32.totalorder %s97_s28, %s97_s28 }
  0x84   :  { %p4163_p3 = scmp.ne.s32.totalorder %s97_s28, %s4162_s4  ;;  %p4168_p5 = scmp.lt.s32.totalorder %s4162_s4, %s4162_s4 }
  0x86   :  { %p4169_p6 = por %p4168_p5, %p4167_p4 }
  0x88   :  { %p4170_p7 = pnand %p4169_p6, %p4163_p3 }
  0x8a   :  { %4173 = shalt.err (!%p4170_p7)
}
  0x8b   :  { %102 = dma.hbm_to_vmem [thread:$0]  %s5696_s6, 3072, %s97_s28, [#allocation15], %s4281_s18, %s4281_s18, %s4282_s22  }
  0x8c   :  { %s4174_s20 = scalar_lea.hbm %s5698_s8, 16 }
  0x8d   :  { %p4175_p8 = scmp.ne.s32.totalorder %s5698_s8, %s4174_s20  ;;  %p4178_p9 = scmp.lt.u32.totalorder %s4174_s20, %s5698_s8 }
  0x8f   :  { %p4180_p10 = pnand %p4178_p9, %p4175_p8 }
  0x91   :  { %4183 = shalt.err (!%p4180_p10)
}
  0x92   :  { %s4184_s24 = scalar_lea.vmem %s122_s13, 16  ;;  %s4188_s2 = scalar_lea.vmem %s122_s13, 32 }
  0x93   :  { %p4185_p11 = scmp.ne.s32.totalorder %s122_s13, %s4184_s24  ;;  %p4189_p12 = scmp.lt.s32.totalorder %s122_s13, %s122_s13 }
  0x94   :  { %p4190_p13 = scmp.lt.s32.totalorder %s4188_s2, %s4184_s24 }
  0x96   :  { %p4191_p0 = por %p4190_p13, %p4189_p12 }
  0x98   :  { %p4192_p1 = pnand %p4191_p0, %p4185_p11 }
  0x9a   :  { %4195 = shalt.err (!%p4192_p1)
}
  0x9b   :  { %124 = dma.hbm_to_vmem [thread:$0]  %s5698_s8, 16, %s122_s13, [#allocation18]  }
  0x9c   :  { %s4291_s22 = smov [#allocation20]   ;;  %s4196_s5 = scalar_lea.hbm %s5699_s9, 16 }
  0x9d   :  { %s131_s25 = sshll.u32 %s4291_s22, 4  ;;  %p4197_p2 = scmp.ne.s32.totalorder %s5699_s9, %s4196_s5  ;;  %s132_s25 = int_to_ptr.vmem [resolvable:$true] %s131_s25 }
  0x9e   :  { %p4200_p3 = scmp.lt.u32.totalorder %s4196_s5, %s5699_s9 }
  0xa0   :  { %p4202_p4 = pnand %p4200_p3, %p4197_p2 }
  0xa2   :  { %4205 = shalt.err (!%p4202_p4)
}
  0xa3   :  { %s4206_s0 = scalar_lea.vmem %s132_s25, 16  ;;  %s4210_s8 = scalar_lea.vmem %s132_s25, 32 }
  0xa4   :  { %p4207_p5 = scmp.ne.s32.totalorder %s132_s25, %s4206_s0  ;;  %p4211_p6 = scmp.lt.s32.totalorder %s132_s25, %s132_s25 }
  0xa5   :  { %p4212_p7 = scmp.lt.s32.totalorder %s4210_s8, %s4206_s0 }
  0xa7   :  { %p4213_p8 = por %p4212_p7, %p4211_p6 }
  0xa9   :  { %p4214_p9 = pnand %p4213_p8, %p4207_p5 }
  0xab   :  { %4217 = shalt.err (!%p4214_p9)
}
  0xac   :  { %134 = dma.hbm_to_vmem [thread:$0]  %s5699_s9, 16, %s132_s25, [#allocation21]  }
  0xad   :  { %4262 = dma.done.wait [#allocation6], 512  }
  0xae   :  { %4263 = vsyncadd [#allocation6], 4294966784 }
  0xaf   :  { %4264 = dma.done.wait [#allocation9], 896  }
  0xb0   :  { %4265 = vsyncadd [#allocation9], 4294966400 }
  0xb1   :  { %4266 = dma.done.wait [#allocation12], 816  }
  0xb2   :  { %4267 = vsyncadd [#allocation12], 4294966480 }
  0xb3   :  { %4268 = dma.done.wait [#allocation15], 3120  }
  0xb4   :  { %4269 = vsyncadd [#allocation15], 4294964176 }
  0xb5   :  { %4270 = dma.done.wait [#allocation18], 3088  }
  0xb6   :  { %4271 = vsyncadd [#allocation18], 4294964208 }
  0xb7   :  { %4272 = dma.done.wait [#allocation21], 16  }
  0xb8   :  { %4273 = vsyncadd [#allocation21], 4294967280  ;;  %v5702_v0 = vmov 0   ;;  %v3656_v1 = vld [vmem:[#allocation10 + $0x4] ss:$12 sps:$4 sm:$0xff]   ;;  %vm251_vm0 = vcmask 261120  }
  0xb9   :  { %326 = vmatprep.mubr.bf16.mxu1 %v5702_v0  ;;  %296 = vmatprep.mubr.bf16.mxu0 %v5702_v0  ;;  %v3658_v2 = vld [vmem:[#allocation10] ss:$12 sps:$4 sm:$0xff]   ;;  %v3659_v3 = vld [vmem:[#allocation10 + $0x1c] ss:$12 sps:$4 sm:$0xff]   ;;  %v3661_v4 = vld [vmem:[#allocation10 + $0x18] ss:$12 sps:$4 sm:$0xff]  }
  0xba   :  { %3654 = vset.pattern.permute.xlu0 %v5702_v0  ;;  %3655 = vset.pattern.permute.xlu1 %v5702_v0  ;;  %v3663_v5 = vld [vmem:[#allocation10 + $0x8] ss:$12 sps:$4 sm:$0xff]   ;;  %v3665_v7 = vld [vmem:[#allocation5] sm:$0xff]   ;;  %v3664_v8 = vld [vmem:[#allocation10 + $0x20] ss:$12 sps:$4 sm:$0xff]   ;;  %v5704_v18 = vmov 0.0  }
  0xbb   :  { %3629 = vmatprep.subr.bf16.mxu1 %v3656_v1  ;;  %264 = vmatprep.subr.bf16.mxu0 %v3656_v1  ;;  %v4495_v6 = vld [vmem:[#allocation5 + $0x18] sm:$0xff]   ;;  %v3677_v10 = vld [vmem:[#allocation11 + $0x8] ss:$12 sps:$4 sm:$0xff]   ;;  %v4502_v13 = vld [vmem:[#allocation5 + $0x10] sm:$0xff]   ;;  %vm4294_vm1 = vmmov 0   ;;  %s4295_s9 = smov [#allocation22]  }
  0xbc   :  { %3631 = vmatpush1.bf16.msra.mxu1 %v3658_v2  ;;  %265 = vmatpush1.bf16.msra.mxu0 %v3658_v2  ;;  %v3669_v9 = vld [vmem:[#allocation11 + $0x4] ss:$12 sps:$4 sm:$0xff]   ;;  %v3667_v12 = vld [vmem:[#allocation11] ss:$12 sps:$4 sm:$0xff]   ;;  %v3673_v14 = vld [vmem:[#allocation11 + $0x1c] ss:$12 sps:$4 sm:$0xff]  }
  0xbd   :  { %3630 = vmatprep.subr.bf16.mxu1 %v3659_v3  ;;  %266 = vmatprep.subr.bf16.mxu0 %v3659_v3  ;;  %v3666_v11 = vld [vmem:[#allocation5 + $0x8] sm:$0xff]   ;;  %v3687_v15 = vld [vmem:[#allocation11 + $0x20] ss:$12 sps:$4 sm:$0xff]   ;;  %v3671_v16 = vld [vmem:[#allocation11 + $0x18] ss:$12 sps:$4 sm:$0xff]   ;;  %s2960_s16 = sshll.u32 %s4295_s9, 4  ;;  %s2961_s16 = int_to_ptr.vmem [resolvable:$true] %s2960_s16 }
  0xbe   :  { %v4508_v17 = vld [vmem:[#allocation16 + $0x4] ss:$12 sps:$4 sm:$0xff]   ;;  %v4519_v19 = vld [vmem:[#allocation16] ss:$12 sps:$4 sm:$0xff]   ;;  %v4521_v20 = vld [vmem:[#allocation16 + $0x1c] ss:$12 sps:$4 sm:$0xff]   ;;  %p4223_p11 = scmp.lt.s32.totalorder %s2961_s16, %s2961_s16 }
  0xbf   :  { %v4523_v21 = vld [vmem:[#allocation16 + $0x8] ss:$12 sps:$4 sm:$0xff]   ;;  %v4526_v22 = vld [vmem:[#allocation16 + $0x18] ss:$12 sps:$4 sm:$0xff]   ;;  %v4535_v24 = vld [vmem:[#allocation16 + $0x20] ss:$12 sps:$4 sm:$0xff]  }
  0xc0   :  { %3632 = vmatpush1.bf16.msra.mxu1 %v3661_v4  ;;  %267 = vmatpush1.bf16.msra.mxu0 %v3661_v4  ;;  %v4531_v23 = vld [vmem:[#allocation16 + $0x34] ss:$12 sps:$4 sm:$0xff]   ;;  %v4541_v25 = vld [vmem:[#allocation16 + $0x30] ss:$12 sps:$4 sm:$0xff]   ;;  %v4543_v26 = vld [vmem:[#allocation16 + $0x4c] ss:$12 sps:$4 sm:$0xff]  }
  0xc1   :  { %3285 = vmatprep.subr.bf16.mxu1 %v3663_v5  ;;  %3297 = vmatprep.subr.bf16.mxu0 %v3677_v10  ;;  %v4547_v27 = vld [vmem:[#allocation16 + $0x38] ss:$12 sps:$4 sm:$0xff]   ;;  %v4554_v28 = vld [vmem:[#allocation16 + $0x48] ss:$12 sps:$4 sm:$0xff]   ;;  %v4561_v30 = vld [vmem:[#allocation16 + $0x50] ss:$12 sps:$4 sm:$0xff]  }
  0xc2   :  { %v4557_v29 = vld [vmem:[#allocation16 + $0x64] ss:$12 sps:$4 sm:$0xff]   ;;  %v4566_v31 = vld [vmem:[#allocation16 + $0x60] ss:$12 sps:$4 sm:$0xff]   ;;  %v4569_v32 = vld [vmem:[#allocation16 + $0x7c] ss:$12 sps:$4 sm:$0xff]  }
  0xc3   :  { %3020 = vmatmul.mubr.msk.bf16.vlgmr.msra.gmra.mrb[0].mxu1 %vm251_vm0, %v4495_v6  ;;  %3017 = vmatmul.mubr.msk.bf16.vlgmr.msra.gmra.mrb[0].mxu0 %vm251_vm0, %v3665_v7  ;;  %5757 = vst [vmem:[#allocation33_spill] sm:$0xff] %v4566_v31  ;;  %5758 = vst [vmem:[#allocation34_spill] sm:$0xff] %v4569_v32  ;;  %v4573_v33 = vld [vmem:[#allocation16 + $0x68] ss:$12 sps:$4 sm:$0xff]   ;;  %v4581_v35 = vld [vmem:[#allocation16 + $0x78] ss:$12 sps:$4 sm:$0xff]  }
  0xc4   :  { %3286 = vmatpush3.bf16.msra.mxu1 %v3663_v5  ;;  %3289 = vmatprep.mubr.msk.bf16.mxu1 %vm251_vm0, %v3665_v7  ;;  %5759 = vst [vmem:[#allocation35_spill] sm:$0xff] %v4573_v33  ;;  %v4578_v34 = vld [vmem:[#allocation8] sm:$0xff]  ;;  %5760 = vst [vmem:[#allocation36_spill] sm:$0xff] %v4581_v35  ;;  %v4589_v37 = vld [vmem:[#allocation16 + $0x80] ss:$12 sps:$4 sm:$0xff]   ;;  %s4296_s4 = smov [#allocation23]  }
  0xc5   :  { %3287 = vmatprep.subr.bf16.mxu1 %v3664_v8  ;;  %306 = vmatprep.mubr.bf16.mxu0 %v5702_v0  ;;  %vm712_vm2 = vcmp.gt.s32.totalorder %v4578_v34, 0  ;;  %v4586_v36 = vld [vmem:[#allocation16 + $0x94] ss:$12 sps:$4 sm:$0xff]   ;;  %5762 = vst [vmem:[#allocation38_spill] sm:$0xff] %v4589_v37  ;;  %vm715_vm3 = vcmp.gt.s32.totalorder %v4578_v34, 7  ;;  %vm1235_vm4 = vcmp.gt.s32.totalorder %v4578_v34, 1 }
  0xc6   :  { %3298 = vmatpush3.bf16.msra.mxu0 %v3677_v10  ;;  %5761 = vst [vmem:[#allocation37_spill] sm:$0xff] %v4586_v36  ;;  %v3039_v38 = vsel %vm712_vm2, 1.0, %v5704_v18  ;;  %v4595_v40 = vld [vmem:[#allocation16 + $0x90] ss:$12 sps:$4 sm:$0xff]   ;;  %v3040_v41 = vsel %vm715_vm3, 1.0, %v5704_v18  ;;  %v3095_v44 = vsel %vm1235_vm4, 1.0, %v5704_v18 }
  0xc7   :  { %3299 = vmatprep.subr.bf16.mxu0 %v3687_v15  ;;  %1206 = vperm.xlu0 %3654, %v3039_v38   ;;  %v1219_v39 = vsub.f32 1.0, %v3039_v38  ;;  %5763 = vst [vmem:[#allocation39_spill] sm:$0xff] %v4595_v40  ;;  %v4600_v42 = vld [vmem:[#allocation16 + $0xac] ss:$12 sps:$4 sm:$0xff]   ;;  %v1227_v45 = vsub.f32 1.0, %v3040_v41  ;;  %vm1238_vm5 = vcmp.gt.s32.totalorder %v4578_v34, 6 }
  0xc8   :  { %3288 = vmatpush3.bf16.msra.mxu1 %v3664_v8  ;;  %5764 = vst [vmem:[#allocation40_spill] sm:$0xff] %v4600_v42  ;;  %v4603_v43 = vld [vmem:[#allocation16 + $0x98] ss:$12 sps:$4 sm:$0xff]   ;;  %1212 = vperm.xlu1 %3655, %v3040_v41   ;;  %v4610_v46 = vld [vmem:[#allocation16 + $0xa8] ss:$12 sps:$4 sm:$0xff]   ;;  %v1477_v49 = vsub.f32 1.0, %v3095_v44  ;;  %v184_v41 = vlaneseq }
  0xc9   :  { %483 = vmatprep.subr.bf16.mxu1 %v3669_v9  ;;  %5765 = vst [vmem:[#allocation41_spill] sm:$0xff] %v4603_v43  ;;  %5766 = vst [vmem:[#allocation42_spill] sm:$0xff] %v4610_v46  ;;  %v4615_v47 = vld [vmem:[#allocation17 + $0x4] ss:$12 sps:$4 sm:$0xff]   ;;  %v3096_v50 = vsel %vm1238_vm5, 1.0, %v5704_v18  ;;  %vm1493_vm6 = vcmp.gt.s32.totalorder %v4578_v34, 2 }
  0xca   :  { %3300 = vmatpush3.bf16.msra.mxu0 %v3687_v15  ;;  %5767 = vst [vmem:[#allocation43_spill] sm:$0xff] %v4615_v47  ;;  %v4618_v48 = vld [vmem:[#allocation16 + $0xb0] ss:$12 sps:$4 sm:$0xff]   ;;  %v4623_v51 = vld [vmem:[#allocation17] ss:$12 sps:$4 sm:$0xff]   ;;  %v1485_v55 = vsub.f32 1.0, %v3096_v50 }
  0xcb   :  { %3290 = vmatmul.mubr.msk.bf16.vlgmr.msra.gmra.mrb[4].mxu1 %vm251_vm0, %v3666_v11  ;;  %3018 = vmatmul.mubr.msk.bf16.gmra.mrb[4].mxu0 %vm251_vm0, %v3666_v11  ;;  %5768 = vst [vmem:[#allocation44_spill] sm:$0xff] %v4618_v48  ;;  %v4626_v52 = vld [vmem:[#allocation17 + $0x1c] ss:$12 sps:$4 sm:$0xff]   ;;  %v4635_v54 = vld [vmem:[#allocation17 + $0x18] ss:$12 sps:$4 sm:$0xff]   ;;  %v3101_v56 = vsel %vm1493_vm6, 1.0, %v5704_v18 }
  0xcc   :  { %484 = vmatpush1.bf16.msra.mxu1 %v3667_v12  ;;  %3293 = vmatprep.mubr.msk.bf16.mxu1 %vm251_vm0, %v4502_v13  ;;  %v4629_v53 = vld [vmem:[#allocation17 + $0x8] ss:$12 sps:$4 sm:$0xff]   ;;  %v4643_v58 = vld [vmem:[#allocation17 + $0x20] ss:$12 sps:$4 sm:$0xff]   ;;  %vm1496_vm7 = vcmp.gt.s32.totalorder %v4578_v34, 5  ;;  %v1735_v60 = vsub.f32 1.0, %v3101_v56 }
  0xcd   :  { %485 = vmatprep.subr.bf16.mxu1 %v3673_v14  ;;  %316 = vmatprep.mubr.bf16.mxu0 %v5702_v0  ;;  %v4640_v57 = vld [vmem:[#allocation17 + $0x34] ss:$12 sps:$4 sm:$0xff]   ;;  %v4651_v59 = vld [vmem:[#allocation17 + $0x30] ss:$12 sps:$4 sm:$0xff]   ;;  %v3102_v61 = vsel %vm1496_vm7, 1.0, %v5704_v18  ;;  %vm1751_vm8 = vcmp.gt.s32.totalorder %v4578_v34, 3 }
  0xce   :  { %3309 = vmatprep.subr.bf16.mxu0 %v5704_v18  ;;  %1222 = vperm.xlu0 %3654, %v1219_v39   ;;  %v4655_v62 = vld [vmem:[#allocation17 + $0x4c] ss:$12 sps:$4 sm:$0xff]   ;;  %v4663_v1 = vld [vmem:[#allocation17 + $0x48] ss:$12 sps:$4 sm:$0xff]   ;;  %v1743_v2 = vsub.f32 1.0, %v3102_v61  ;;  %v3107_v3 = vsel %vm1751_vm8, 1.0, %v5704_v18 }
  0xcf   :  { %1230 = vperm.xlu1 %3655, %v1227_v45   ;;  %v4658_v63 = vld [vmem:[#allocation17 + $0x38] ss:$12 sps:$4 sm:$0xff]   ;;  %v4670_v5 = vld [vmem:[#allocation17 + $0x50] ss:$12 sps:$4 sm:$0xff]   ;;  %vm1754_vm9 = vcmp.gt.s32.totalorder %v4578_v34, 4  ;;  %s2972_s27 = sshll.u32 %s4296_s4, 4  ;;  %s5657_s27 = int_to_ptr.vmem [resolvable:$true] %s2972_s27 }
  0xd0   :  { %486 = vmatpush1.bf16.msra.mxu1 %v3671_v16  ;;  %v4667_v4 = vld [vmem:[#allocation17 + $0x64] ss:$12 sps:$4 sm:$0xff]   ;;  %v3108_v8 = vsel %vm1754_vm9, 1.0, %v5704_v18  ;;  %v4679_v9 = vld [vmem:[#allocation17 + $0x7c] ss:$12 sps:$4 sm:$0xff]   ;;  %s4218_s3 = scalar_lea.vmem %s2961_s16, 1024 }
  0xd1   :  { %858 = vmatprep.subr.bf16.mxu1 %v4508_v17  ;;  %v4682_v10 = vld [vmem:[#allocation17 + $0x68] ss:$12 sps:$4 sm:$0xff]   ;;  %v2001_v12 = vsub.f32 1.0, %v3108_v8  ;;  %v4692_v14 = vld [vmem:[#allocation17 + $0x80] ss:$12 sps:$4 sm:$0xff]   ;;  %p4219_p10 = scmp.ne.s32.totalorder %s2961_s16, %s4218_s3  ;;  %p4224_p12 = scmp.lt.s32.totalorder %s4218_s3, %s4218_s3 }
  0xd2   :  { %1463 = vperm.xlu0 %3654, %v3095_v44   ;;  %v4696_v15 = vld [vmem:[#allocation17 + $0x90] ss:$12 sps:$4 sm:$0xff]   ;;  %v4699_v16 = vld [vmem:[#allocation17 + $0xac] ss:$12 sps:$4 sm:$0xff]   ;;  %v4706_v38 = vld [vmem:[#allocation17 + $0xa8] ss:$12 sps:$4 sm:$0xff]  }
  0xd3   :  { %3294 = vmatmul.mubr.msk.bf16.gmra.mrb[8].mxu1 %vm251_vm0, %v4495_v6  ;;  %3019 = vmatmul.mubr.msk.bf16.gmra.mrb[8].mxu0 %vm251_vm0, %v4502_v13  ;;  %v4702_v34 = vld [vmem:[#allocation17 + $0x98] ss:$12 sps:$4 sm:$0xff]   ;;  %v4710_v39 = vld [vmem:[#allocation17 + $0xb0] ss:$12 sps:$4 sm:$0xff]   ;;  %v185_v44 = vshrl.u32 %v184_v41, 7  ;;  %p4225_p13 = por %p4224_p12, %p4223_p11 }
  0xd4   :  { %515 = vmatprep.mubr.bf16.mxu1 %v5702_v0  ;;  %3301 = vmatprep.mubr.msk.bf16.mxu0 %vm251_vm0, %v3665_v7 }
  0xd5   :  { %1480 = vperm.xlu1 %3655, %v1477_v49   ;;  %v186_v45 = vsub.s32 0, %v185_v44  ;;  %v182_v49 = vld [vmem:[#allocation13] sm:$0x7]  ;;  %p4226_p0 = pnand %p4225_p13, %p4219_p10 }
  0xd6   :  { %1469 = vperm.xlu0 %3654, %v3096_v50   ;;  %v190_v50 = vsub.s32 1, %v185_v44 }
  0xd9   :  { %1488 = vperm.xlu1 %3655, %v1485_v55   ;;  %v4754_v55 = vrot.slane %v182_v49, %v186_v45 }
  0xda   :  { %1721 = vperm.xlu0 %3654, %v3101_v56   ;;  %v4756_v56 = vrot.slane %v182_v49, %v190_v50 }
  0xdb   :  { %3031 = vmatmul.mubr.msk.bf16.vlgmr.msra.gmra.mrb[12].mxu1 %vm251_vm0, %v3665_v7  ;;  %3302 = vmatmul.mubr.msk.bf16.vlgmr.msra.gmra.mrb[12].mxu0 %vm251_vm0, %v3666_v11  ;;  %v1993_v7 = vsub.f32 1.0, %v3107_v3 }
  0xdc   :  { %859 = vmatpush1.bf16.msra.mxu1 %v4519_v19  ;;  %525 = vmatprep.mubr.bf16.mxu1 %v5702_v0 }
  0xdd   :  { %860 = vmatprep.subr.bf16.mxu1 %v4521_v20  ;;  %3310 = vmatpush3.bf16.msra.mxu0 %v4523_v21 }
  0xde   :  { %3311 = vmatprep.subr.bf16.mxu0 %v5704_v18  ;;  %3305 = vmatprep.mubr.msk.bf16.mxu0 %vm251_vm0, %v4502_v13 }
  0xdf   :  { %1727 = vperm.xlu0 %3654, %v3102_v61   ;;  %1738 = vperm.xlu1 %3655, %v1735_v60  }
  0xe0   :  { %861 = vmatpush1.bf16.msra.mxu1 %v4526_v22 }
  0xe1   :  { %862 = vmatprep.subr.bf16.mxu1 %v4531_v23  ;;  %3312 = vmatpush3.bf16.msra.mxu0 %v4535_v24 }
  0xe2   :  { %3313 = vmatprep.subr.bf16.mxu0 %v5704_v18 }
  0xe3   :  { %3032 = vmatmul.mubr.msk.bf16.gmra.mrb[16].mxu1 %vm251_vm0, %v3666_v11  ;;  %3306 = vmatmul.mubr.msk.bf16.gmra.mrb[16].mxu0 %vm251_vm0, %v4495_v6  ;;  %v4686_v11 = vld [vmem:[#allocation17 + $0x78] ss:$12 sps:$4 sm:$0xff]  }
  0xe4   :  { %863 = vmatpush1.bf16.msra.mxu1 %v4541_v25  ;;  %535 = vmatprep.mubr.bf16.mxu1 %v5702_v0 }
  0xe5   :  { %864 = vmatprep.subr.bf16.mxu1 %v4543_v26  ;;  %3314 = vmatpush3.bf16.msra.mxu0 %v4547_v27 }
  0xe6   :  { %3315 = vmatprep.subr.bf16.mxu0 %v5704_v18  ;;  %3325 = vmatprep.mubr.msk.bf16.mxu0 %vm4294_vm1, %v5704_v18 }
  0xe7   :  { %1979 = vperm.xlu0 %3654, %v3107_v3   ;;  %1746 = vperm.xlu1 %3655, %v1743_v2  }
  0xe8   :  { %865 = vmatpush1.bf16.msra.mxu1 %v4554_v28 }
  0xe9   :  { %866 = vmatprep.subr.bf16.mxu1 %v4557_v29  ;;  %3316 = vmatpush3.bf16.msra.mxu0 %v4561_v30 }
  0xea   :  { %3317 = vmatprep.subr.bf16.mxu0 %v5704_v18 }
  0xeb   :  { %3033 = vmatmul.mubr.msk.bf16.gmra.mrb[20].mxu1 %vm251_vm0, %v4502_v13  ;;  %1985 = vperm.xlu0 %3654, %v3108_v8   ;;  %v4689_v13 = vld [vmem:[#allocation17 + $0x94] ss:$12 sps:$4 sm:$0xff]  }
  0xec   :  { %867 = vmatpush1.bf16.msra.mxu1 %v4566_v31  ;;  %545 = vmatprep.mubr.bf16.mxu1 %v5702_v0 }
  0xed   :  { %868 = vmatprep.subr.bf16.mxu1 %v4569_v32  ;;  %3318 = vmatpush3.bf16.msra.mxu0 %v4573_v33 }
  0xee   :  { %3319 = vmatprep.subr.bf16.mxu0 %v5704_v18  ;;  %1996 = vperm.xlu1 %3655, %v1993_v7   ;;  %v194_v7 = vsub.s32 2, %v185_v44 }
  0xf0   :  { %869 = vmatpush1.bf16.msra.mxu1 %v4581_v35 }
  0xf1   :  { %870 = vmatprep.subr.bf16.mxu1 %v4586_v36  ;;  %3320 = vmatpush3.bf16.msra.mxu0 %v4589_v37 }
  0xf2   :  { %3321 = vmatprep.subr.bf16.mxu0 %v5704_v18  ;;  %2004 = vperm.xlu1 %3655, %v2001_v12  }
  0xf3   :  { %3034 = vmatmul.mubr.msk.bf16.gmra.mrb[24].mxu1 %vm251_vm0, %v4495_v6  ;;  %v4675_v6 = vld [vmem:[#allocation17 + $0x60] ss:$12 sps:$4 sm:$0xff]  }
  0xf4   :  { %871 = vmatpush1.bf16.msra.mxu1 %v4595_v40  ;;  %890 = vmatprep.mubr.bf16.mxu1 %v5702_v0 }
  0xf5   :  { %872 = vmatprep.subr.bf16.mxu1 %v4600_v42  ;;  %3322 = vmatpush3.bf16.msra.mxu0 %v4603_v43 }
  0xf6   :  { %3323 = vmatprep.subr.bf16.mxu0 %v5704_v18 }
  0xf8   :  { %873 = vmatpush1.bf16.msra.mxu1 %v4610_v46 }
  0xf9   :  { %1095 = vmatprep.subr.bf16.mxu1 %v4615_v47  ;;  %3324 = vmatpush3.bf16.msra.mxu0 %v4618_v48 }
  0xfa   :  { %3329 = vmatprep.subr.bf16.mxu0 %v5704_v18 }
  0xfb   :  { %891 = vmatmul.mubr.bf16.vlgmr.msra.gmra.mrb[28].mxu1 %v5702_v0 }
  0xfc   :  { %1096 = vmatpush1.bf16.msra.mxu1 %v4623_v51  ;;  %3326 = vmatmul.mubr.bf16.vlgmr.msra.gmra.mrb[20].mxu0 %v5702_v0 }
  0xfd   :  { %1097 = vmatprep.subr.bf16.mxu1 %v4626_v52  ;;  %3330 = vmatpush3.bf16.msra.mxu0 %v4629_v53 }
  0xfe   :  { %3331 = vmatprep.subr.bf16.mxu0 %v5704_v18  ;;  %1127 = vmatprep.mubr.bf16.mxu1 %v5702_v0 }
  0xff   :  { %3345 = vmatprep.mubr.msk.bf16.mxu0 %vm4294_vm1, %v5704_v18 }
 0x100   :  { %1098 = vmatpush1.bf16.msra.mxu1 %v4635_v54 }
 0x101   :  { %1099 = vmatprep.subr.bf16.mxu1 %v4640_v57  ;;  %3332 = vmatpush3.bf16.msra.mxu0 %v4643_v58 }
 0x102   :  { %3333 = vmatprep.subr.bf16.mxu0 %v5704_v18 }
 0x104   :  { %1100 = vmatpush1.bf16.msra.mxu1 %v4651_v59 }
 0x105   :  { %1101 = vmatprep.subr.bf16.mxu1 %v4655_v62  ;;  %3334 = vmatpush3.bf16.msra.mxu0 %v4658_v63 }
 0x106   :  { %3335 = vmatprep.subr.bf16.mxu0 %v5704_v18 }
 0x108   :  { %1102 = vmatpush1.bf16.msra.mxu1 %v4663_v1 }
 0x109   :  { %1103 = vmatprep.subr.bf16.mxu1 %v4667_v4  ;;  %3336 = vmatpush3.bf16.msra.mxu0 %v4670_v5 }
 0x10a   :  { %3337 = vmatprep.subr.bf16.mxu0 %v5704_v18 }
 0x10c   :  { %1104 = vmatpush1.bf16.msra.mxu1 %v4675_v6 }
 0x10d   :  { %1105 = vmatprep.subr.bf16.mxu1 %v4679_v9  ;;  %3338 = vmatpush3.bf16.msra.mxu0 %v4682_v10 }
 0x10e   :  { %3339 = vmatprep.subr.bf16.mxu0 %v5704_v18 }
 0x110   :  { %1106 = vmatpush1.bf16.msra.mxu1 %v4686_v11 }
 0x111   :  { %1107 = vmatprep.subr.bf16.mxu1 %v4689_v13  ;;  %3340 = vmatpush3.bf16.msra.mxu0 %v4692_v14 }
 0x112   :  { %3341 = vmatprep.subr.bf16.mxu0 %v5704_v18 }
 0x114   :  { %1108 = vmatpush1.bf16.msra.mxu1 %v4696_v15 }
 0x115   :  { %1109 = vmatprep.subr.bf16.mxu1 %v4699_v16  ;;  %3342 = vmatpush3.bf16.msra.mxu0 %v4702_v34 }
 0x116   :  { %3343 = vmatprep.subr.bf16.mxu0 %v5704_v18 }
 0x118   :  { %1110 = vmatpush1.bf16.msra.mxu1 %v4706_v38 }
 0x119   :  { %3344 = vmatpush3.bf16.msra.mxu0 %v4710_v39  ;;  %1254 = vmatprep.subr.bf16.mxu1 %v4508_v17 }
 0x11a   :  { %3349 = vmatprep.subr.bf16.mxu0 %v5704_v18 }
 0x11b   :  { %1128 = vmatmul.mubr.bf16.vlgmr.msra.gmra.mrb[32].mxu1 %v5702_v0 }
 0x11c   :  { %3346 = vmatmul.mubr.bf16.vlgmr.msra.gmra.mrb[24].mxu0 %v5702_v0  ;;  %1255 = vmatpush1.bf16.msra.mxu1 %v4519_v19 }
 0x11d   :  { %3350 = vmatpush3.bf16.msra.mxu0 %v4523_v21  ;;  %1256 = vmatprep.subr.bf16.mxu1 %v4521_v20 }
 0x11e   :  { %3351 = vmatprep.subr.bf16.mxu0 %v5704_v18  ;;  %1286 = vmatprep.mubr.bf16.mxu1 %v5702_v0 }
 0x11f   :  { %3365 = vmatprep.mubr.msk.bf16.mxu0 %vm4294_vm1, %v5704_v18 }
 0x120   :  { %1257 = vmatpush1.bf16.msra.mxu1 %v4526_v22 }
 0x121   :  { %3352 = vmatpush3.bf16.msra.mxu0 %v4535_v24  ;;  %1258 = vmatprep.subr.bf16.mxu1 %v4531_v23 }
 0x122   :  { %3353 = vmatprep.subr.bf16.mxu0 %v5704_v18 }
 0x124   :  { %1259 = vmatpush1.bf16.msra.mxu1 %v4541_v25 }
 0x125   :  { %3354 = vmatpush3.bf16.msra.mxu0 %v4547_v27  ;;  %1260 = vmatprep.subr.bf16.mxu1 %v4543_v26 }
 0x126   :  { %3355 = vmatprep.subr.bf16.mxu0 %v5704_v18 }
 0x128   :  { %1261 = vmatpush1.bf16.msra.mxu1 %v4554_v28 }
 0x129   :  { %3356 = vmatpush3.bf16.msra.mxu0 %v4561_v30  ;;  %1262 = vmatprep.subr.bf16.mxu1 %v4557_v29 }
 0x12a   :  { %3357 = vmatprep.subr.bf16.mxu0 %v5704_v18 }
 0x12c   :  { %1263 = vmatpush1.bf16.msra.mxu1 %v4566_v31 }
 0x12d   :  { %3358 = vmatpush3.bf16.msra.mxu0 %v4573_v33  ;;  %1264 = vmatprep.subr.bf16.mxu1 %v4569_v32 }
 0x12e   :  { %3359 = vmatprep.subr.bf16.mxu0 %v5704_v18 }
 0x130   :  { %1265 = vmatpush1.bf16.msra.mxu1 %v4581_v35 }
 0x131   :  { %3360 = vmatpush3.bf16.msra.mxu0 %v4589_v37  ;;  %1266 = vmatprep.subr.bf16.mxu1 %v4586_v36 }
 0x132   :  { %3361 = vmatprep.subr.bf16.mxu0 %v5704_v18 }
 0x134   :  { %1267 = vmatpush1.bf16.msra.mxu1 %v4595_v40  ;;  %v434_v40 = vld [vmem:[#allocation14] sm:$0x7] }
 0x135   :  { %3362 = vmatpush3.bf16.msra.mxu0 %v4603_v43  ;;  %1268 = vmatprep.subr.bf16.mxu1 %v4600_v42 }
 0x136   :  { %3363 = vmatprep.subr.bf16.mxu0 %v5704_v18 }
 0x138   :  { %1269 = vmatpush1.bf16.msra.mxu1 %v4610_v46 }
 0x139   :  { %3364 = vmatpush3.bf16.msra.mxu0 %v4618_v48  ;;  %1358 = vmatprep.subr.bf16.mxu1 %v4615_v47 }
 0x13a   :  { %3369 = vmatprep.subr.bf16.mxu0 %v5704_v18 }
 0x196   :  { %v328_v60 = vpop.f32.mrb[0].mxu1  ;;  %v4758_v61 = vpop.f32.mrb[0].mxu0 }
 0x197   :  { %v4761_v2 = vadd.f32 %v328_v60, %v4754_v55  ;;  %v330_v3 = vpop.f32.mrb[1].mxu1  ;;  %v4763_v8 = vpop.f32.mrb[1].mxu0 }
 0x198   :  { %v4766_v12 = vadd.f32 %v330_v3, %v4756_v56  ;;  %v332_v41 = vpop.f32.mrb[2].mxu1  ;;  %v302_v0 = vpop.f32.mrb[2].mxu0 }
 0x199   :  { %5769 = vst [vmem:[#allocation45_spill] sm:$0xff] %v4761_v2  ;;  %v4769_v18 = vadd.f32 %v332_v41, %v4754_v55  ;;  %v334_v47 = vpop.f32.mrb[3].mxu1  ;;  %v4772_v48 = vadd.f32 %v302_v0, %v4754_v55  ;;  %v304_v46 = vpop.f32.mrb[3].mxu0  ;;  %v4780_v2 = vrot.slane %v182_v49, %v194_v7 }
 0x19a   :  { %5770 = vst [vmem:[#allocation46_spill] sm:$0xff] %v4766_v12  ;;  %v4775_v60 = vadd.f32 %v334_v47, %v4756_v56  ;;  %v4778_v44 = vadd.f32 %v304_v46, %v4756_v56 }
 0x19b   :  { %5771 = vst [vmem:[#allocation47_spill] sm:$0xff] %v4769_v18  ;;  %5772 = vst [vmem:[#allocation48_spill] sm:$0xff] %v4772_v48 }
 0x19c   :  { %5773 = vst [vmem:[#allocation49_spill] sm:$0xff] %v4775_v60  ;;  %5774 = vst [vmem:[#allocation50_spill] sm:$0xff] %v4778_v44 }
 0x19e   :  { %v3291_v3 = vpop.f32.mrb[4].mxu1  ;;  %v308_v12 = vpop.f32.mrb[4].mxu0 }
 0x19f   :  { %v4783_v42 = vadd.f32 %v3291_v3, %v4780_v2  ;;  %v4785_v41 = vpop.f32.mrb[5].mxu1  ;;  %v4788_v18 = vadd.f32 %v308_v12, %v4754_v55  ;;  %v310_v0 = vpop.f32.mrb[5].mxu0 }
 0x1a0   :  { %v3292_v48 = vpop.f32.mrb[6].mxu1  ;;  %v4791_v47 = vadd.f32 %v310_v0, %v4756_v56  ;;  %v312_v60 = vpop.f32.mrb[6].mxu0 }
 0x1a1   :  { %5775 = vst [vmem:[#allocation51_spill] sm:$0xff] %v4783_v42  ;;  %5776 = vst [vmem:[#allocation52_spill] sm:$0xff] %v4788_v18  ;;  %v4794_v46 = vadd.f32 %v3292_v48, %v4780_v2  ;;  %v374_v49 = vpop.f32.mrb[7].mxu1  ;;  %v4797_v44 = vadd.f32 %v312_v60, %v4754_v55  ;;  %v314_v3 = vpop.f32.mrb[7].mxu0 }
 0x1a2   :  { %5777 = vst [vmem:[#allocation53_spill] sm:$0xff] %v4791_v47  ;;  %v4800_v42 = vadd.f32 %v374_v49, %v4780_v2  ;;  %v4803_v12 = vadd.f32 %v314_v3, %v4756_v56 }
 0x1a3   :  { %5778 = vst [vmem:[#allocation54_spill] sm:$0xff] %v4794_v46  ;;  %5779 = vst [vmem:[#allocation55_spill] sm:$0xff] %v4797_v44 }
 0x1a4   :  { %5780 = vst [vmem:[#allocation56_spill] sm:$0xff] %v4800_v42  ;;  %5781 = vst [vmem:[#allocation57_spill] sm:$0xff] %v4803_v12 }
 0x1a6   :  { %v3295_v18 = vpop.f32.mrb[8].mxu1  ;;  %v318_v43 = vpop.f32.mrb[8].mxu0 }
 0x1a7   :  { %v4806_v0 = vadd.f32 %v3295_v18, %v4780_v2  ;;  %v387_v47 = vpop.f32.mrb[9].mxu1  ;;  %v4809_v48 = vadd.f32 %v318_v43, %v4754_v55  ;;  %v320_v46 = vpop.f32.mrb[9].mxu0 }
 0x1a8   :  { %v4812_v60 = vadd.f32 %v387_v47, %v4780_v2  ;;  %v3296_v44 = vpop.f32.mrb[10].mxu1  ;;  %v4815_v49 = vadd.f32 %v320_v46, %v4756_v56  ;;  %v322_v3 = vpop.f32.mrb[10].mxu0  ;;  %v4833_v46 = vrot.slane %v434_v40, %v190_v50 }
 0x1a9   :  { %5782 = vst [vmem:[#allocation58_spill] sm:$0xff] %v4806_v0  ;;  %5783 = vst [vmem:[#allocation59_spill] sm:$0xff] %v4809_v48  ;;  %v4818_v12 = vadd.f32 %v3296_v44, %v4780_v2  ;;  %v390_v42 = vpop.f32.mrb[11].mxu1  ;;  %v4821_v18 = vadd.f32 %v322_v3, %v4754_v55  ;;  %v324_v0 = vpop.f32.mrb[11].mxu0  ;;  %v4831_v48 = vrot.slane %v434_v40, %v194_v7 }
 0x1aa   :  { %5784 = vst [vmem:[#allocation60_spill] sm:$0xff] %v4812_v60  ;;  %5785 = vst [vmem:[#allocation61_spill] sm:$0xff] %v4815_v49  ;;  %v4824_v43 = vadd.f32 %v390_v42, %v4780_v2  ;;  %v4827_v47 = vadd.f32 %v324_v0, %v4756_v56  ;;  %v4829_v60 = vrot.slane %v434_v40, %v186_v45 }
 0x1ab   :  { %5786 = vst [vmem:[#allocation62_spill] sm:$0xff] %v4818_v12  ;;  %5787 = vst [vmem:[#allocation63_spill] sm:$0xff] %v4821_v18 }
 0x1ac   :  { %5788 = vst [vmem:[#allocation64_spill] sm:$0xff] %v4824_v43  ;;  %5789 = vst [vmem:[#allocation65_spill] sm:$0xff] %v4827_v47 }
 0x1ae   :  { %v517_v49 = vpop.f32.mrb[12].mxu1  ;;  %v3303_v44 = vpop.f32.mrb[12].mxu0 }
 0x1af   :  { %v4836_v12 = vadd.f32 %v517_v49, %v4829_v60  ;;  %v519_v3 = vpop.f32.mrb[13].mxu1  ;;  %v4839_v18 = vadd.f32 %v3303_v44, %v4831_v48  ;;  %v590_v42 = vpop.f32.mrb[13].mxu0 }
 0x1b0   :  { %v4842_v43 = vadd.f32 %v519_v3, %v4833_v46  ;;  %v521_v0 = vpop.f32.mrb[14].mxu1  ;;  %v4845_v45 = vadd.f32 %v590_v42, %v4831_v48  ;;  %v3304_v7 = vpop.f32.mrb[14].mxu0 }
 0x1b1   :  { %5790 = vst [vmem:[#allocation66_spill] sm:$0xff] %v4836_v12  ;;  %5791 = vst [vmem:[#allocation67_spill] sm:$0xff] %v4839_v18  ;;  %v4848_v40 = vadd.f32 %v521_v0, %v4829_v60  ;;  %v523_v50 = vpop.f32.mrb[15].mxu1  ;;  %v4851_v49 = vadd.f32 %v3304_v7, %v4831_v48  ;;  %v593_v12 = vpop.f32.mrb[15].mxu0 }
 0x1b2   :  { %5792 = vst [vmem:[#allocation68_spill] sm:$0xff] %v4842_v43  ;;  %5793 = vst [vmem:[#allocation69_spill] sm:$0xff] %v4845_v45  ;;  %v4854_v44 = vadd.f32 %v523_v50, %v4833_v46  ;;  %v4857_v18 = vadd.f32 %v593_v12, %v4831_v48 }
 0x1b3   :  { %5794 = vst [vmem:[#allocation70_spill] sm:$0xff] %v4848_v40  ;;  %5795 = vst [vmem:[#allocation71_spill] sm:$0xff] %v4851_v49 }
 0x1b4   :  { %5796 = vst [vmem:[#allocation72_spill] sm:$0xff] %v4854_v44  ;;  %5797 = vst [vmem:[#allocation73_spill] sm:$0xff] %v4857_v18 }
 0x1b6   :  { %v527_v3 = vpop.f32.mrb[16].mxu1  ;;  %v3307_v43 = vpop.f32.mrb[16].mxu0 }
 0x1b7   :  { %v4860_v42 = vadd.f32 %v527_v3, %v4829_v60  ;;  %v529_v45 = vpop.f32.mrb[17].mxu1  ;;  %v4863_v0 = vadd.f32 %v3307_v43, %v4831_v48  ;;  %v606_v40 = vpop.f32.mrb[17].mxu0 }
 0x1b8   :  { %v4866_v7 = vadd.f32 %v529_v45, %v4833_v46  ;;  %v531_v47 = vpop.f32.mrb[18].mxu1  ;;  %v4869_v50 = vadd.f32 %v606_v40, %v4831_v48  ;;  %v4871_v44 = vpop.f32.mrb[18].mxu0 }
 0x1b9   :  { %5798 = vst [vmem:[#allocation74_spill] sm:$0xff] %v4860_v42  ;;  %5799 = vst [vmem:[#allocation75_spill] sm:$0xff] %v4863_v0  ;;  %v4874_v12 = vadd.f32 %v531_v47, %v4829_v60  ;;  %v533_v18 = vpop.f32.mrb[19].mxu1  ;;  %v609_v3 = vpop.f32.mrb[19].mxu0 }
 0x1ba   :  { %5800 = vst [vmem:[#allocation76_spill] sm:$0xff] %v4866_v7  ;;  %5801 = vst [vmem:[#allocation77_spill] sm:$0xff] %v4869_v50  ;;  %v4877_v42 = vadd.f32 %v533_v18, %v4833_v46  ;;  %v4880_v43 = vadd.f32 %v609_v3, %v4831_v48 }
 0x1bb   :  { %5802 = vst [vmem:[#allocation78_spill] sm:$0xff] %v4874_v12 }
 0x1bc   :  { %5803 = vst [vmem:[#allocation79_spill] sm:$0xff] %v4877_v42  ;;  %5804 = vst [vmem:[#allocation80_spill] sm:$0xff] %v4880_v43 }
 0x1be   :  { %v537_v49 = vpop.f32.mrb[20].mxu1 }
 0x1bf   :  { %v4883_v45 = vadd.f32 %v537_v49, %v4829_v60  ;;  %v539_v7 = vpop.f32.mrb[21].mxu1 }
 0x1c0   :  { %v4886_v40 = vadd.f32 %v539_v7, %v4833_v46  ;;  %v541_v50 = vpop.f32.mrb[22].mxu1  ;;  %v299_v7 = vadd.f32 %v4758_v61, %v4754_v55  ;;  %v4904_v61 = vld [vmem:[#allocation19] ss:$0 sm:$0xff] }
 0x1c1   :  { %5805 = vst [vmem:[#allocation81_spill] sm:$0xff] %v4883_v45  ;;  %v4889_v47 = vadd.f32 %v541_v50, %v4829_v60  ;;  %v543_v12 = vpop.f32.mrb[23].mxu1  ;;  %v301_v50 = vadd.f32 %v4763_v8, %v4756_v56 }
 0x1c2   :  { %5806 = vst [vmem:[#allocation82_spill] sm:$0xff] %v4886_v40  ;;  %v4892_v0 = vadd.f32 %v543_v12, %v4833_v46 }
 0x1c3   :  { %5807 = vst [vmem:[#allocation83_spill] sm:$0xff] %v4889_v47 }
 0x1c4   :  { %5808 = vst [vmem:[#allocation84_spill] sm:$0xff] %v4892_v0 }
 0x1c6   :  { %v547_v18 = vpop.f32.mrb[24].mxu1 }
 0x1c7   :  { %v4895_v3 = vadd.f32 %v547_v18, %v4829_v60  ;;  %v549_v42 = vpop.f32.mrb[25].mxu1 }
 0x1c8   :  { %v4898_v49 = vadd.f32 %v549_v42, %v4833_v46  ;;  %v551_v45 = vpop.f32.mrb[26].mxu1 }
 0x1c9   :  { %5809 = vst [vmem:[#allocation85_spill] sm:$0xff] %v4895_v3  ;;  %v553_v43 = vpop.f32.mrb[27].mxu1 }
 0x1ca   :  { %5810 = vst [vmem:[#allocation86_spill] sm:$0xff] %v4898_v49 }
 0x1ce   :  { %v892_v40 = vpop.f32.mrb[28].mxu1 }
 0x1cf   :  { %v939_v47 = vadd.f32 %v892_v40, %v299_v7  ;;  %v894_v12 = vpop.f32.mrb[29].mxu1  ;;  %v933_v0 = vpop.f32.mrb[20].mxu0 }
 0x1d0   :  { %v946_v36 = vadd.f32 %v894_v12, %v301_v50  ;;  %v896_v37 = vpop.f32.mrb[30].mxu1  ;;  %v3327_v18 = vpop.f32.mrb[21].mxu0  ;;  %v959_v8 = vadd.f32 %v4904_v61, %v933_v0 }
 0x1d1   :  { %v3065_v3 = vmul.f32 -1.442695, %v939_v47  ;;  %v897_v35 = vpop.f32.mrb[31].mxu1  ;;  %v936_v32 = vpop.f32.mrb[22].mxu0  ;;  %v372_v37 = vadd.f32 %v4785_v41, %v4780_v2 }
 0x1d2   :  { %v3328_v42 = vpop.f32.mrb[23].mxu0  ;;  %v3066_v49 = vmul.f32 -1.442695, %v946_v36  ;;  %v552_v32 = vadd.f32 %v551_v45, %v4829_v60  ;;  %v554_v36 = vadd.f32 %v553_v43, %v4833_v46 }
 0x1d3   :  { %3740 = vpow2.f32 %v3065_v3 }
 0x1d4   :  { %3742 = vpow2.f32 %v3066_v49 }
 0x1dd   :  { %v3741_v33 = vpop.eup %3740 }
 0x1de   :  { %v943_v31 = vadd.f32 1.0, %v3741_v33  ;;  %v3743_v55 = vpop.eup %3742 }
 0x1df   :  { %v950_v56 = vadd.f32 1.0, %v3743_v55 }
 0x1e0   :  { %3744 = vrcp.f32 %v943_v31 }
 0x1e1   :  { %3746 = vrcp.f32 %v950_v56  ;;  %v4911_v56 = vpop.permute.xlu0 %1206 }
 0x1e2   :  { %5811 = vst [vmem:[#allocation87_spill] sm:$0xff] %v4911_v56 }
 0x1ea   :  { %v3745_v40 = vpop.eup %3744 }
 0x1eb   :  { %v960_v35 = vmul.f32 %v3745_v40, %v959_v8  ;;  %v3747_v2 = vpop.eup %3746 }
 0x1ec   :  { %v963_v60 = vsub.f32 1.0, %v3747_v2  ;;  %v965_v43 = vmul.f32 0.0, %v3747_v2 }
 0x1ed   :  { %v961_v47 = vadd.f32 %v960_v35, %v372_v37  ;;  %v4913_v37 = vpop.permute.xlu0 %1222 }
 0x1ee   :  { %v1129_v3 = vpop.f32.mrb[32].mxu1  ;;  %5812 = vst [vmem:[#allocation88_spill] sm:$0xff] %v4913_v37  ;;  %v1225_v35 = vmul.f32 0.0, %v4913_v37 }
 0x1ef   :  { %3748 = vtanh.f32 %v961_v47  ;;  %v1176_v31 = vadd.f32 %v1129_v3, %v552_v32  ;;  %v1131_v33 = vpop.f32.mrb[33].mxu1  ;;  %v1170_v49 = vpop.f32.mrb[24].mxu0 }
 0x1f0   :  { %v1183_v7 = vadd.f32 %v1131_v33, %v554_v36  ;;  %v1133_v50 = vpop.f32.mrb[34].mxu1  ;;  %v3347_v12 = vpop.f32.mrb[25].mxu0  ;;  %v4922_v33 = vld [vmem:[#allocation20] ss:$0 sm:$0xff] }
 0x1f1   :  { %v3092_v0 = vmul.f32 -1.442695, %v1176_v31  ;;  %v1134_v18 = vpop.f32.mrb[35].mxu1  ;;  %v1173_v42 = vpop.f32.mrb[26].mxu0  ;;  %v1196_v12 = vadd.f32 %v4922_v33, %v1170_v49 }
 0x1f2   :  { %v3348_v55 = vpop.f32.mrb[27].mxu0  ;;  %v3093_v41 = vmul.f32 -1.442695, %v1183_v7  ;;  %v5813_v7 = vmov 0.0   ;;  %v618_v42 = vadd.f32 %v4871_v44, %v4831_v48  ;;  %v4950_v44 = vpop.permute.xlu1 %1212 }
 0x1f3   :  { %3750 = vpow2.f32 %v3092_v0  ;;  %v5814_v0 = vmov 0   ;;  %5815 = vst [vmem:[#allocation89_spill] sm:$0xff] %v4950_v44 }
 0x1f4   :  { %3752 = vpow2.f32 %v3093_v41 }
 0x1f9   :  { %v3749_v45 = vpop.eup %3748 }
 0x1fa   :  { %v964_v46 = vmul.f32 %v3749_v45, %v963_v60 }
 0x1fc   :  { %v966_v8 = vadd.f32 %v965_v43, %v964_v46  ;;  %v4956_v43 = vpop.permute.xlu1 %1230 }
 0x1fd   :  { %v3751_v40 = vpop.eup %3750  ;;  %5816 = vst [vmem:[#allocation90_spill] sm:$0xff] %v4956_v43 }
 0x1fe   :  { %v1180_v32 = vadd.f32 1.0, %v3751_v40  ;;  %v1209_v47 = vmul.f32 %v4911_v56, %v966_v8  ;;  %v3753_v31 = vpop.eup %3752  ;;  %v1233_v8 = vmul.f32 0.0, %v4956_v43  ;;  %v5247_v56 = vld [vmem:[#allocation17 + $0x94] ss:$12 sps:$4 sm:$0xff]  }
 0x1ff   :  { %v1187_v50 = vadd.f32 1.0, %v3753_v31 }
 0x200   :  { %3754 = vrcp.f32 %v1180_v32  ;;  %1216 = vst.msk [vmem:[#allocation22] sm:$0xff] %vm251_vm0, %v1209_v47  ;;  %v4918_v36 = vadd.f32 %v1225_v35, %v1209_v47 }
 0x201   :  { %3756 = vrcp.f32 %v1187_v50 }
 0x202   :  { %v1253_v3 = vpack.c.bf16 %v4918_v36, %v4918_v36 }
 0x204   :  { %1287 = vmatmul.mubr.bf16.vlgmr.msra.gmra.mrb[36].mxu1 %v1253_v3  ;;  %3366 = vmatmul.mubr.bf16.vlgmr.msra.gmra.mrb[28].mxu0 %v1253_v3  ;;  %v5830_v3 = vld [vmem:[#allocation48_spill] sm:$0xff] }
 0x205   :  { %1359 = vmatpush1.bf16.msra.mxu1 %v4623_v51  ;;  %3370 = vmatpush3.bf16.msra.mxu0 %v4629_v53 }
 0x206   :  { %1360 = vmatprep.subr.bf16.mxu1 %v4626_v52  ;;  %3371 = vmatprep.subr.bf16.mxu0 %v5813_v7 }
 0x207   :  { %1390 = vmatprep.mubr.bf16.mxu1 %v5814_v0  ;;  %3385 = vmatprep.mubr.msk.bf16.mxu0 %vm4294_vm1, %v5813_v7 }
 0x209   :  { %1361 = vmatpush1.bf16.msra.mxu1 %v4635_v54  ;;  %3372 = vmatpush3.bf16.msra.mxu0 %v4643_v58 }
 0x20a   :  { %v3755_v18 = vpop.eup %3754  ;;  %1362 = vmatprep.subr.bf16.mxu1 %v4640_v57  ;;  %3373 = vmatprep.subr.bf16.mxu0 %v5813_v7 }
 0x20b   :  { %v1197_v55 = vmul.f32 %v3755_v18, %v1196_v12  ;;  %v3757_v48 = vpop.eup %3756  ;;  %v5831_v18 = vld [vmem:[#allocation50_spill] sm:$0xff] }
 0x20c   :  { %v1200_v2 = vsub.f32 1.0, %v3757_v48  ;;  %v1202_v45 = vmul.f32 0.0, %v3757_v48 }
 0x20d   :  { %v1198_v49 = vadd.f32 %v1197_v55, %v618_v42  ;;  %1363 = vmatpush1.bf16.msra.mxu1 %v4651_v59  ;;  %3374 = vmatpush3.bf16.msra.mxu0 %v4658_v63 }
 0x20e   :  { %1364 = vmatprep.subr.bf16.mxu1 %v4655_v62  ;;  %3375 = vmatprep.subr.bf16.mxu0 %v5813_v7 }
 0x20f   :  { %3758 = vtanh.f32 %v1198_v49 }
 0x211   :  { %1365 = vmatpush1.bf16.msra.mxu1 %v4663_v1  ;;  %3376 = vmatpush3.bf16.msra.mxu0 %v4670_v5 }
 0x212   :  { %1366 = vmatprep.subr.bf16.mxu1 %v4667_v4  ;;  %3377 = vmatprep.subr.bf16.mxu0 %v5813_v7 }
 0x215   :  { %1367 = vmatpush1.bf16.msra.mxu1 %v4675_v6  ;;  %3378 = vmatpush3.bf16.msra.mxu0 %v4682_v10 }
 0x216   :  { %1368 = vmatprep.subr.bf16.mxu1 %v4679_v9  ;;  %3379 = vmatprep.subr.bf16.mxu0 %v5813_v7 }
 0x219   :  { %v3759_v41 = vpop.eup %3758  ;;  %1369 = vmatpush1.bf16.msra.mxu1 %v4686_v11  ;;  %3380 = vmatpush3.bf16.msra.mxu0 %v4692_v14 }
 0x21a   :  { %v1201_v60 = vmul.f32 %v3759_v41, %v1200_v2  ;;  %1370 = vmatprep.subr.bf16.mxu1 %v4689_v13  ;;  %3381 = vmatprep.subr.bf16.mxu0 %v5813_v7 }
 0x21c   :  { %v1203_v46 = vadd.f32 %v1202_v45, %v1201_v60 }
 0x21d   :  { %1371 = vmatpush1.bf16.msra.mxu1 %v4696_v15  ;;  %3382 = vmatpush3.bf16.msra.mxu0 %v4702_v34 }
 0x21e   :  { %v4962_v40 = vmul.f32 %v4950_v44, %v1203_v46  ;;  %1372 = vmatprep.subr.bf16.mxu1 %v4699_v16  ;;  %3383 = vmatprep.subr.bf16.mxu0 %v5813_v7 }
 0x220   :  { %5817 = vst [vmem:[#allocation91_spill] sm:$0xff] %v4962_v40  ;;  %v4967_v35 = vadd.f32 %v1233_v8, %v4962_v40 }
 0x221   :  { %1373 = vmatpush1.bf16.msra.mxu1 %v4706_v38  ;;  %3384 = vmatpush3.bf16.msra.mxu0 %v4710_v39 }
 0x222   :  { %v1357_v32 = vpack.c.bf16 %v4967_v35, %v4967_v35  ;;  %1512 = vmatprep.subr.bf16.mxu1 %v4508_v17  ;;  %3389 = vmatprep.subr.bf16.mxu0 %v5813_v7  ;;  %v5818_v17 = vld [vmem:[#allocation33_spill] sm:$0xff] }
 0x224   :  { %1391 = vmatmul.mubr.bf16.vlgmr.msra.gmra.mrb[40].mxu1 %v1357_v32  ;;  %3386 = vmatmul.mubr.bf16.vlgmr.msra.gmra.mrb[32].mxu0 %v1357_v32 }
 0x225   :  { %1513 = vmatpush1.bf16.msra.mxu1 %v4519_v19  ;;  %3390 = vmatpush3.bf16.msra.mxu0 %v4523_v21  ;;  %v5819_v19 = vld [vmem:[#allocation35_spill] sm:$0xff]  ;;  %v5821_v21 = vld [vmem:[#allocation36_spill] sm:$0xff] }
 0x226   :  { %1514 = vmatprep.subr.bf16.mxu1 %v4521_v20  ;;  %3391 = vmatprep.subr.bf16.mxu0 %v5813_v7  ;;  %v5820_v20 = vld [vmem:[#allocation34_spill] sm:$0xff] }
 0x227   :  { %1544 = vmatprep.mubr.bf16.mxu1 %v5814_v0  ;;  %3405 = vmatprep.mubr.msk.bf16.mxu0 %vm4294_vm1, %v5813_v7 }
 0x229   :  { %1515 = vmatpush1.bf16.msra.mxu1 %v4526_v22  ;;  %3392 = vmatpush3.bf16.msra.mxu0 %v4535_v24  ;;  %v5822_v22 = vld [vmem:[#allocation38_spill] sm:$0xff]  ;;  %v5824_v24 = vld [vmem:[#allocation39_spill] sm:$0xff] }
 0x22a   :  { %1516 = vmatprep.subr.bf16.mxu1 %v4531_v23  ;;  %3393 = vmatprep.subr.bf16.mxu0 %v5813_v7  ;;  %v5823_v23 = vld [vmem:[#allocation37_spill] sm:$0xff] }
 0x22d   :  { %1517 = vmatpush1.bf16.msra.mxu1 %v4541_v25  ;;  %3394 = vmatpush3.bf16.msra.mxu0 %v4547_v27  ;;  %v5825_v25 = vld [vmem:[#allocation41_spill] sm:$0xff]  ;;  %v5827_v27 = vld [vmem:[#allocation42_spill] sm:$0xff] }
 0x22e   :  { %1518 = vmatprep.subr.bf16.mxu1 %v4543_v26  ;;  %3395 = vmatprep.subr.bf16.mxu0 %v5813_v7  ;;  %v5826_v26 = vld [vmem:[#allocation40_spill] sm:$0xff] }
 0x231   :  { %1519 = vmatpush1.bf16.msra.mxu1 %v4554_v28  ;;  %3396 = vmatpush3.bf16.msra.mxu0 %v4561_v30  ;;  %v5828_v28 = vld [vmem:[#allocation44_spill] sm:$0xff] }
 0x232   :  { %1520 = vmatprep.subr.bf16.mxu1 %v4557_v29  ;;  %3397 = vmatprep.subr.bf16.mxu0 %v5813_v7  ;;  %v5829_v29 = vld [vmem:[#allocation43_spill] sm:$0xff] }
 0x235   :  { %1521 = vmatpush1.bf16.msra.mxu1 %v5818_v17  ;;  %3398 = vmatpush3.bf16.msra.mxu0 %v5819_v19 }
 0x236   :  { %1522 = vmatprep.subr.bf16.mxu1 %v5820_v20  ;;  %3399 = vmatprep.subr.bf16.mxu0 %v5813_v7 }
 0x239   :  { %1523 = vmatpush1.bf16.msra.mxu1 %v5821_v21  ;;  %3400 = vmatpush3.bf16.msra.mxu0 %v5822_v22  ;;  %v5832_v21 = vld [vmem:[#allocation56_spill] sm:$0xff] }
 0x23a   :  { %1524 = vmatprep.subr.bf16.mxu1 %v5823_v23  ;;  %3401 = vmatprep.subr.bf16.mxu0 %v5813_v7 }
 0x23d   :  { %1525 = vmatpush1.bf16.msra.mxu1 %v5824_v24  ;;  %3402 = vmatpush3.bf16.msra.mxu0 %v5825_v25  ;;  %v5833_v25 = vld [vmem:[#allocation85_spill] sm:$0xff] }
 0x23e   :  { %1526 = vmatprep.subr.bf16.mxu1 %v5826_v26  ;;  %3403 = vmatprep.subr.bf16.mxu0 %v5813_v7 }
 0x241   :  { %1527 = vmatpush1.bf16.msra.mxu1 %v5827_v27  ;;  %3404 = vmatpush3.bf16.msra.mxu0 %v5828_v28 }
 0x242   :  { %1616 = vmatprep.subr.bf16.mxu1 %v5829_v29  ;;  %3409 = vmatprep.subr.bf16.mxu0 %v5813_v7  ;;  %v5834_v29 = vld [vmem:[#allocation86_spill] sm:$0xff] }
 0x2d7   :  { %v1288_v30 = vpop.f32.mrb[36].mxu1  ;;  %v1329_v47 = vpop.f32.mrb[28].mxu0 }
 0x2d8   :  { %v1335_v31 = vadd.f32 %v1288_v30, %v5830_v3  ;;  %v1290_v50 = vpop.f32.mrb[37].mxu1  ;;  %v3367_v12 = vpop.f32.mrb[29].mxu0  ;;  %v1349_v17 = vadd.f32 %v4904_v61, %v1329_v47 }
 0x2d9   :  { %v1342_v42 = vadd.f32 %v1290_v50, %v5831_v18  ;;  %v1292_v55 = vpop.f32.mrb[38].mxu1  ;;  %v1332_v49 = vpop.f32.mrb[30].mxu0 }
 0x2da   :  { %v3097_v48 = vmul.f32 -1.442695, %v1335_v31  ;;  %v1293_v2 = vpop.f32.mrb[39].mxu1  ;;  %v3368_v41 = vpop.f32.mrb[31].mxu0 }
 0x2db   :  { %v3098_v60 = vmul.f32 -1.442695, %v1342_v42  ;;  %v5017_v41 = vpop.permute.xlu1 %1480 }
 0x2dc   :  { %3760 = vpow2.f32 %v3097_v48  ;;  %5835 = vst [vmem:[#allocation33_spill] sm:$0xff] %v5017_v41 }
 0x2dd   :  { %3762 = vpow2.f32 %v3098_v60 }
 0x2e6   :  { %v3761_v45 = vpop.eup %3760 }
 0x2e7   :  { %v1339_v46 = vadd.f32 1.0, %v3761_v45  ;;  %v3763_v8 = vpop.eup %3762 }
 0x2e8   :  { %v1346_v32 = vadd.f32 1.0, %v3763_v8  ;;  %v1483_v8 = vmul.f32 %v5017_v41, %v4918_v36  ;;  %v5255_v41 = vld [vmem:[#allocation17 + $0x90] ss:$12 sps:$4 sm:$0xff]  }
 0x2e9   :  { %3764 = vrcp.f32 %v1339_v46  ;;  %v5019_v46 = vpop.permute.xlu0 %1463 }
 0x2ea   :  { %3766 = vrcp.f32 %v1346_v32  ;;  %5836 = vst [vmem:[#allocation35_spill] sm:$0xff] %v5019_v46 }
 0x2f3   :  { %v3765_v19 = vpop.eup %3764 }
 0x2f4   :  { %v1350_v20 = vmul.f32 %v3765_v19, %v1349_v17  ;;  %v3767_v47 = vpop.eup %3766 }
 0x2f5   :  { %v1353_v55 = vsub.f32 1.0, %v3767_v47  ;;  %v1355_v2 = vmul.f32 %v3767_v47, %v4918_v36  ;;  %v5152_v47 = vld [vmem:[#allocation16 + $0xac] ss:$12 sps:$4 sm:$0xff]  }
 0x2f6   :  { %v1351_v22 = vadd.f32 %v1350_v20, %v5832_v21  ;;  %5851 = vst [vmem:[#allocation85_spill] sm:$0xff] %v5152_v47 }
 0x2f7   :  { %v1392_v23 = vpop.f32.mrb[40].mxu1  ;;  %v1433_v24 = vpop.f32.mrb[32].mxu0 }
 0x2f8   :  { %3768 = vtanh.f32 %v1351_v22  ;;  %v1439_v26 = vadd.f32 %v1392_v23, %v5833_v25  ;;  %v1394_v27 = vpop.f32.mrb[41].mxu1  ;;  %v3387_v28 = vpop.f32.mrb[33].mxu0  ;;  %v1453_v22 = vadd.f32 %v4922_v33, %v1433_v24  ;;  %v5112_v24 = vld [vmem:[#allocation16 + $0x4c] ss:$12 sps:$4 sm:$0xff]   ;;  %v5116_v25 = vld [vmem:[#allocation16 + $0x48] ss:$12 sps:$4 sm:$0xff]  }
 0x2f9   :  { %v1446_v30 = vadd.f32 %v1394_v27, %v5834_v29  ;;  %v1396_v3 = vpop.f32.mrb[42].mxu1  ;;  %v1436_v31 = vpop.f32.mrb[34].mxu0  ;;  %v5122_v27 = vld [vmem:[#allocation16 + $0x64] ss:$12 sps:$4 sm:$0xff]   ;;  %v5126_v28 = vld [vmem:[#allocation16 + $0x60] ss:$12 sps:$4 sm:$0xff]  }
 0x2fa   :  { %v3099_v50 = vmul.f32 -1.442695, %v1439_v26  ;;  %v1397_v12 = vpop.f32.mrb[43].mxu1  ;;  %v3388_v18 = vpop.f32.mrb[35].mxu0  ;;  %v5119_v26 = vld [vmem:[#allocation16 + $0x50] ss:$12 sps:$4 sm:$0xff]  }
 0x2fb   :  { %v3100_v42 = vmul.f32 -1.442695, %v1446_v30  ;;  %5841 = vst [vmem:[#allocation37_spill] sm:$0xff] %v5119_v26  ;;  %5842 = vst [vmem:[#allocation39_spill] sm:$0xff] %v5122_v27  ;;  %v5129_v29 = vld [vmem:[#allocation16 + $0x68] ss:$12 sps:$4 sm:$0xff]  }
 0x2fc   :  { %3770 = vpow2.f32 %v3099_v50  ;;  %5843 = vst [vmem:[#allocation41_spill] sm:$0xff] %v5126_v28  ;;  %5844 = vst [vmem:[#allocation40_spill] sm:$0xff] %v5129_v29  ;;  %v5132_v30 = vld [vmem:[#allocation16 + $0x7c] ss:$12 sps:$4 sm:$0xff]   ;;  %v5136_v3 = vld [vmem:[#allocation16 + $0x78] ss:$12 sps:$4 sm:$0xff]  }
 0x2fd   :  { %3772 = vpow2.f32 %v3100_v42  ;;  %5845 = vst [vmem:[#allocation42_spill] sm:$0xff] %v5132_v30  ;;  %5846 = vst [vmem:[#allocation44_spill] sm:$0xff] %v5136_v3  ;;  %v5139_v31 = vld [vmem:[#allocation16 + $0x80] ss:$12 sps:$4 sm:$0xff]   ;;  %v5146_v12 = vld [vmem:[#allocation16 + $0x90] ss:$12 sps:$4 sm:$0xff]  }
 0x2fe   :  { %5847 = vst [vmem:[#allocation43_spill] sm:$0xff] %v5139_v31  ;;  %v5142_v50 = vld [vmem:[#allocation16 + $0x94] ss:$12 sps:$4 sm:$0xff]   ;;  %5849 = vst [vmem:[#allocation50_spill] sm:$0xff] %v5146_v12  ;;  %v5149_v18 = vld [vmem:[#allocation16 + $0x98] ss:$12 sps:$4 sm:$0xff]  }
 0x2ff   :  { %5848 = vst [vmem:[#allocation48_spill] sm:$0xff] %v5142_v50  ;;  %5850 = vst [vmem:[#allocation56_spill] sm:$0xff] %v5149_v18  ;;  %v5156_v42 = vld [vmem:[#allocation16 + $0xa8] ss:$12 sps:$4 sm:$0xff]  }
 0x300   :  { %5852 = vst [vmem:[#allocation86_spill] sm:$0xff] %v5156_v42 }
 0x302   :  { %v3769_v49 = vpop.eup %3768 }
 0x303   :  { %v1354_v48 = vmul.f32 %v3769_v49, %v1353_v55  ;;  %v5159_v55 = vld [vmem:[#allocation16 + $0xb0] ss:$12 sps:$4 sm:$0xff]  }
 0x304   :  { %v5162_v49 = vld [vmem:[#allocation17 + $0x4] ss:$12 sps:$4 sm:$0xff]  }
 0x305   :  { %v1356_v60 = vadd.f32 %v1355_v2, %v1354_v48  ;;  %5854 = vst [vmem:[#allocation92_spill] sm:$0xff] %v5162_v49 }
 0x306   :  { %v3771_v45 = vpop.eup %3770 }
 0x307   :  { %v1443_v32 = vadd.f32 1.0, %v3771_v45  ;;  %v1466_v17 = vmul.f32 %v5019_v46, %v1356_v60  ;;  %v3773_v21 = vpop.eup %3772  ;;  %v5855_v60 = vld [vmem:[#allocation52_spill] sm:$0xff]  ;;  %v5258_v46 = vld [vmem:[#allocation17 + $0x98] ss:$12 sps:$4 sm:$0xff]  }
 0x308   :  { %v1450_v36 = vadd.f32 1.0, %v3773_v21 }
 0x309   :  { %3774 = vrcp.f32 %v1443_v32  ;;  %1474 = vst.msk [vmem:[#allocation22 + $0x8] sm:$0xff] %vm251_vm0, %v1466_v17  ;;  %v5025_v19 = vadd.f32 %v1483_v8, %v1466_v17  ;;  %v5856_v17 = vld [vmem:[#allocation53_spill] sm:$0xff] }
 0x30a   :  { %3776 = vrcp.f32 %v1450_v36 }
 0x30b   :  { %v1511_v20 = vpack.c.bf16 %v5025_v19, %v5025_v19 }
 0x30d   :  { %1545 = vmatmul.mubr.bf16.vlgmr.msra.gmra.mrb[44].mxu1 %v1511_v20  ;;  %3406 = vmatmul.mubr.bf16.vlgmr.msra.gmra.mrb[36].mxu0 %v1511_v20 }
 0x30e   :  { %1617 = vmatpush1.bf16.msra.mxu1 %v4623_v51  ;;  %3410 = vmatpush3.bf16.msra.mxu0 %v4629_v53 }
 0x30f   :  { %1618 = vmatprep.subr.bf16.mxu1 %v4626_v52  ;;  %3411 = vmatprep.subr.bf16.mxu0 %v5813_v7  ;;  %v5837_v52 = vld [vmem:[#allocation75_spill] sm:$0xff] }
 0x310   :  { %1648 = vmatprep.mubr.bf16.mxu1 %v5814_v0  ;;  %3425 = vmatprep.mubr.msk.bf16.mxu0 %vm4294_vm1, %v5813_v7  ;;  %5853 = vst [vmem:[#allocation75_spill] sm:$0xff] %v5159_v55 }
 0x312   :  { %1619 = vmatpush1.bf16.msra.mxu1 %v4635_v54  ;;  %3412 = vmatpush3.bf16.msra.mxu0 %v4643_v58 }
 0x313   :  { %v3775_v23 = vpop.eup %3774  ;;  %1620 = vmatprep.subr.bf16.mxu1 %v4640_v57  ;;  %3413 = vmatprep.subr.bf16.mxu0 %v5813_v7 }
 0x314   :  { %v1454_v51 = vmul.f32 %v3775_v23, %v1453_v22  ;;  %v3777_v54 = vpop.eup %3776 }
 0x315   :  { %v1457_v57 = vsub.f32 1.0, %v3777_v54 }
 0x316   :  { %v1455_v53 = vadd.f32 %v1454_v51, %v5837_v52  ;;  %1621 = vmatpush1.bf16.msra.mxu1 %v4651_v59  ;;  %3414 = vmatpush3.bf16.msra.mxu0 %v4658_v63 }
 0x317   :  { %1622 = vmatprep.subr.bf16.mxu1 %v4655_v62  ;;  %3415 = vmatprep.subr.bf16.mxu0 %v5813_v7  ;;  %v1459_v62 = vmul.f32 %v3777_v54, %v4967_v35 }
 0x318   :  { %3778 = vtanh.f32 %v1455_v53 }
 0x31a   :  { %1623 = vmatpush1.bf16.msra.mxu1 %v4663_v1  ;;  %3416 = vmatpush3.bf16.msra.mxu0 %v4670_v5  ;;  %v5059_v1 = vpop.permute.xlu0 %1469 }
 0x31b   :  { %1624 = vmatprep.subr.bf16.mxu1 %v4667_v4  ;;  %3417 = vmatprep.subr.bf16.mxu0 %v5813_v7  ;;  %5838 = vst [vmem:[#allocation34_spill] sm:$0xff] %v5059_v1  ;;  %v5061_v4 = vpop.permute.xlu1 %1488 }
 0x31c   :  { %5839 = vst [vmem:[#allocation36_spill] sm:$0xff] %v5061_v4  ;;  %v1491_v5 = vmul.f32 %v5061_v4, %v4967_v35  ;;  %v5109_v35 = vld [vmem:[#allocation16 + $0x38] ss:$12 sps:$4 sm:$0xff]  }
 0x31e   :  { %1625 = vmatpush1.bf16.msra.mxu1 %v4675_v6  ;;  %3418 = vmatpush3.bf16.msra.mxu0 %v4682_v10 }
 0x31f   :  { %1626 = vmatprep.subr.bf16.mxu1 %v4679_v9  ;;  %3419 = vmatprep.subr.bf16.mxu0 %v5813_v7 }
 0x322   :  { %v3779_v58 = vpop.eup %3778  ;;  %1627 = vmatpush1.bf16.msra.mxu1 %v4686_v11  ;;  %3420 = vmatpush3.bf16.msra.mxu0 %v4692_v14  ;;  %v5079_v11 = vld [vmem:[#allocation16 + $0x4] ss:$12 sps:$4 sm:$0xff]   ;;  %v5086_v14 = vld [vmem:[#allocation16 + $0x8] ss:$12 sps:$4 sm:$0xff]  }
 0x323   :  { %v1458_v59 = vmul.f32 %v3779_v58, %v1457_v57  ;;  %1628 = vmatprep.subr.bf16.mxu1 %v4689_v13  ;;  %3421 = vmatprep.subr.bf16.mxu0 %v5813_v7  ;;  %v5083_v13 = vld [vmem:[#allocation16] ss:$12 sps:$4 sm:$0xff]  }
 0x325   :  { %v1460_v63 = vadd.f32 %v1459_v62, %v1458_v59 }
 0x326   :  { %1629 = vmatpush1.bf16.msra.mxu1 %v4696_v15  ;;  %3422 = vmatpush3.bf16.msra.mxu0 %v4702_v34  ;;  %v5089_v15 = vld [vmem:[#allocation16 + $0x1c] ss:$12 sps:$4 sm:$0xff]   ;;  %v5099_v34 = vld [vmem:[#allocation16 + $0x20] ss:$12 sps:$4 sm:$0xff]  }
 0x327   :  { %1630 = vmatprep.subr.bf16.mxu1 %v4699_v16  ;;  %3423 = vmatprep.subr.bf16.mxu0 %v5813_v7  ;;  %v5070_v6 = vmul.f32 %v5059_v1, %v1460_v63  ;;  %v5096_v16 = vld [vmem:[#allocation16 + $0x18] ss:$12 sps:$4 sm:$0xff]  }
 0x329   :  { %5840 = vst [vmem:[#allocation38_spill] sm:$0xff] %v5070_v6  ;;  %v5073_v9 = vadd.f32 %v1491_v5, %v5070_v6  ;;  %v5857_v5 = vld [vmem:[#allocation51_spill] sm:$0xff]  ;;  %v5276_v6 = vld [vmem:[#allocation17 + $0xb0] ss:$12 sps:$4 sm:$0xff]  }
 0x32a   :  { %1631 = vmatpush1.bf16.msra.mxu1 %v4706_v38  ;;  %3424 = vmatpush3.bf16.msra.mxu0 %v4710_v39  ;;  %v5102_v38 = vld [vmem:[#allocation16 + $0x34] ss:$12 sps:$4 sm:$0xff]   ;;  %v5106_v39 = vld [vmem:[#allocation16 + $0x30] ss:$12 sps:$4 sm:$0xff]  }
 0x32b   :  { %v1615_v10 = vpack.c.bf16 %v5073_v9, %v5073_v9  ;;  %1770 = vmatprep.subr.bf16.mxu1 %v5079_v11  ;;  %3429 = vmatprep.subr.bf16.mxu0 %v5813_v7 }
 0x32d   :  { %1649 = vmatmul.mubr.bf16.vlgmr.msra.gmra.mrb[48].mxu1 %v1615_v10  ;;  %3426 = vmatmul.mubr.bf16.vlgmr.msra.gmra.mrb[40].mxu0 %v1615_v10 }
 0x32e   :  { %1771 = vmatpush1.bf16.msra.mxu1 %v5083_v13  ;;  %3430 = vmatpush3.bf16.msra.mxu0 %v5086_v14 }
 0x32f   :  { %1772 = vmatprep.subr.bf16.mxu1 %v5089_v15  ;;  %3431 = vmatprep.subr.bf16.mxu0 %v5813_v7 }
 0x330   :  { %1802 = vmatprep.mubr.bf16.mxu1 %v5814_v0  ;;  %3445 = vmatprep.mubr.msk.bf16.mxu0 %vm4294_vm1, %v5813_v7 }
 0x332   :  { %1773 = vmatpush1.bf16.msra.mxu1 %v5096_v16  ;;  %3432 = vmatpush3.bf16.msra.mxu0 %v5099_v34 }
 0x333   :  { %1774 = vmatprep.subr.bf16.mxu1 %v5102_v38  ;;  %3433 = vmatprep.subr.bf16.mxu0 %v5813_v7 }
 0x336   :  { %1775 = vmatpush1.bf16.msra.mxu1 %v5106_v39  ;;  %3434 = vmatpush3.bf16.msra.mxu0 %v5109_v35 }
 0x337   :  { %1776 = vmatprep.subr.bf16.mxu1 %v5112_v24  ;;  %3435 = vmatprep.subr.bf16.mxu0 %v5813_v7 }
 0x33a   :  { %1777 = vmatpush1.bf16.msra.mxu1 %v5116_v25  ;;  %3436 = vmatpush3.bf16.msra.mxu0 %v5119_v26 }
 0x33b   :  { %1778 = vmatprep.subr.bf16.mxu1 %v5122_v27  ;;  %3437 = vmatprep.subr.bf16.mxu0 %v5813_v7 }
 0x33e   :  { %1779 = vmatpush1.bf16.msra.mxu1 %v5126_v28  ;;  %3438 = vmatpush3.bf16.msra.mxu0 %v5129_v29 }
 0x33f   :  { %1780 = vmatprep.subr.bf16.mxu1 %v5132_v30  ;;  %3439 = vmatprep.subr.bf16.mxu0 %v5813_v7 }
 0x342   :  { %1781 = vmatpush1.bf16.msra.mxu1 %v5136_v3  ;;  %3440 = vmatpush3.bf16.msra.mxu0 %v5139_v31 }
 0x343   :  { %1782 = vmatprep.subr.bf16.mxu1 %v5142_v50  ;;  %3441 = vmatprep.subr.bf16.mxu0 %v5813_v7 }
 0x346   :  { %1783 = vmatpush1.bf16.msra.mxu1 %v5146_v12  ;;  %3442 = vmatpush3.bf16.msra.mxu0 %v5149_v18 }
 0x347   :  { %1784 = vmatprep.subr.bf16.mxu1 %v5152_v47  ;;  %3443 = vmatprep.subr.bf16.mxu0 %v5813_v7 }
 0x34a   :  { %1785 = vmatpush1.bf16.msra.mxu1 %v5156_v42  ;;  %3444 = vmatpush3.bf16.msra.mxu0 %v5159_v55 }
 0x34b   :  { %1874 = vmatprep.subr.bf16.mxu1 %v5162_v49  ;;  %3449 = vmatprep.subr.bf16.mxu0 %v5813_v7 }
 0x3e0   :  { %v1546_v48 = vpop.f32.mrb[44].mxu1  ;;  %v1587_v2 = vpop.f32.mrb[36].mxu0 }
 0x3e1   :  { %v1593_v45 = vadd.f32 %v1546_v48, %v5855_v60  ;;  %v1548_v8 = vpop.f32.mrb[45].mxu1  ;;  %v3407_v32 = vpop.f32.mrb[37].mxu0  ;;  %v1607_v59 = vadd.f32 %v4904_v61, %v1587_v2 }
 0x3e2   :  { %v1600_v20 = vadd.f32 %v1548_v8, %v5856_v17  ;;  %v1550_v21 = vpop.f32.mrb[46].mxu1  ;;  %v1590_v36 = vpop.f32.mrb[38].mxu0 }
 0x3e3   :  { %v3103_v22 = vmul.f32 -1.442695, %v1593_v45  ;;  %v1551_v23 = vpop.f32.mrb[47].mxu1  ;;  %v3408_v51 = vpop.f32.mrb[39].mxu0  ;;  %v5858_v45 = vld [vmem:[#allocation83_spill] sm:$0xff] }
 0x3e4   :  { %v3104_v52 = vmul.f32 -1.442695, %v1600_v20  ;;  %v5859_v20 = vld [vmem:[#allocation84_spill] sm:$0xff] }
 0x3e5   :  { %3780 = vpow2.f32 %v3103_v22 }
 0x3e6   :  { %3782 = vpow2.f32 %v3104_v52 }
 0x3ef   :  { %v3781_v53 = vpop.eup %3780 }
 0x3f0   :  { %v1597_v54 = vadd.f32 1.0, %v3781_v53  ;;  %v3783_v57 = vpop.eup %3782 }
 0x3f1   :  { %v1604_v58 = vadd.f32 1.0, %v3783_v57 }
 0x3f2   :  { %3784 = vrcp.f32 %v1597_v54 }
 0x3f3   :  { %3786 = vrcp.f32 %v1604_v58 }
 0x3fc   :  { %v3785_v62 = vpop.eup %3784 }
 0x3fd   :  { %v1608_v63 = vmul.f32 %v3785_v62, %v1607_v59  ;;  %v3787_v2 = vpop.eup %3786 }
 0x3fe   :  { %v1611_v54 = vsub.f32 1.0, %v3787_v2  ;;  %v1613_v59 = vmul.f32 %v3787_v2, %v5025_v19 }
 0x3ff   :  { %v1609_v10 = vadd.f32 %v1608_v63, %v5857_v5  ;;  %v5173_v5 = vpop.permute.xlu0 %1721 }
 0x400   :  { %v1650_v48 = vpop.f32.mrb[48].mxu1  ;;  %v1691_v60 = vpop.f32.mrb[40].mxu0  ;;  %5860 = vst [vmem:[#allocation52_spill] sm:$0xff] %v5173_v5 }
 0x401   :  { %3788 = vtanh.f32 %v1609_v10  ;;  %v1697_v8 = vadd.f32 %v1650_v48, %v5858_v45  ;;  %v1652_v32 = vpop.f32.mrb[49].mxu1  ;;  %v3427_v17 = vpop.f32.mrb[41].mxu0 }
 0x402   :  { %v1704_v21 = vadd.f32 %v1652_v32, %v5859_v20  ;;  %v1654_v36 = vpop.f32.mrb[50].mxu1  ;;  %v1694_v22 = vpop.f32.mrb[42].mxu0 }
 0x403   :  { %v3105_v23 = vmul.f32 -1.442695, %v1697_v8  ;;  %v1655_v51 = vpop.f32.mrb[51].mxu1  ;;  %v3428_v52 = vpop.f32.mrb[43].mxu0  ;;  %v5188_v36 = vld [vmem:[#allocation17 + $0x8] ss:$12 sps:$4 sm:$0xff]  }
 0x404   :  { %v3106_v53 = vmul.f32 -1.442695, %v1704_v21  ;;  %v5175_v10 = vpop.permute.xlu1 %1738  ;;  %v5185_v21 = vld [vmem:[#allocation17] ss:$12 sps:$4 sm:$0xff]   ;;  %v5199_v51 = vld [vmem:[#allocation17 + $0x18] ss:$12 sps:$4 sm:$0xff]   ;;  %v5251_v43 = vpop.permute.xlu0 %1727 }
 0x405   :  { %3790 = vpow2.f32 %v3105_v23  ;;  %5861 = vst [vmem:[#allocation53_spill] sm:$0xff] %v5175_v10  ;;  %v1741_v8 = vmul.f32 %v5175_v10, %v5025_v19  ;;  %v5191_v19 = vld [vmem:[#allocation17 + $0x1c] ss:$12 sps:$4 sm:$0xff]   ;;  %v1711_v23 = vadd.f32 %v4922_v33, %v1691_v60  ;;  %v5202_v52 = vld [vmem:[#allocation17 + $0x20] ss:$12 sps:$4 sm:$0xff]   ;;  %5863 = vst [vmem:[#allocation51_spill] sm:$0xff] %v5251_v43 }
 0x406   :  { %3792 = vpow2.f32 %v3106_v53  ;;  %v5205_v53 = vld [vmem:[#allocation17 + $0x34] ss:$12 sps:$4 sm:$0xff]   ;;  %v5210_v60 = vld [vmem:[#allocation17 + $0x30] ss:$12 sps:$4 sm:$0xff]  }
 0x408   :  { %v5253_v44 = vpop.permute.xlu1 %1746 }
 0x409   :  { %5864 = vst [vmem:[#allocation83_spill] sm:$0xff] %v5253_v44 }
 0x40b   :  { %v3789_v57 = vpop.eup %3788 }
 0x40c   :  { %v1612_v58 = vmul.f32 %v3789_v57, %v1611_v54  ;;  %v5862_v57 = vld [vmem:[#allocation80_spill] sm:$0xff] }
 0x40e   :  { %v1614_v62 = vadd.f32 %v1613_v59, %v1612_v58  ;;  %v5213_v59 = vld [vmem:[#allocation17 + $0x38] ss:$12 sps:$4 sm:$0xff]  }
 0x40f   :  { %v3791_v63 = vpop.eup %3790 }
 0x410   :  { %v1701_v48 = vadd.f32 1.0, %v3791_v63  ;;  %v1724_v45 = vmul.f32 %v5173_v5, %v1614_v62  ;;  %v3793_v20 = vpop.eup %3792  ;;  %v5216_v62 = vld [vmem:[#allocation17 + $0x4c] ss:$12 sps:$4 sm:$0xff]   ;;  %v5220_v63 = vld [vmem:[#allocation17 + $0x48] ss:$12 sps:$4 sm:$0xff]  }
 0x411   :  { %v1708_v22 = vadd.f32 1.0, %v3793_v20  ;;  %v5233_v20 = vld [vmem:[#allocation17 + $0x68] ss:$12 sps:$4 sm:$0xff]  }
 0x412   :  { %3794 = vrcp.f32 %v1701_v48  ;;  %1732 = vst.msk [vmem:[#allocation22 + $0x10] sm:$0xff] %vm251_vm0, %v1724_v45  ;;  %v5181_v32 = vadd.f32 %v1741_v8, %v1724_v45  ;;  %v5223_v48 = vld [vmem:[#allocation17 + $0x50] ss:$12 sps:$4 sm:$0xff]   ;;  %v5867_v5 = vld [vmem:[#allocation57_spill] sm:$0xff] }
 0x413   :  { %3796 = vrcp.f32 %v1708_v22  ;;  %v5226_v45 = vld [vmem:[#allocation17 + $0x64] ss:$12 sps:$4 sm:$0xff]   ;;  %v5236_v22 = vld [vmem:[#allocation17 + $0x7c] ss:$12 sps:$4 sm:$0xff]  }
 0x414   :  { %v1769_v17 = vpack.c.bf16 %v5181_v32, %v5181_v32 }
 0x416   :  { %1803 = vmatmul.mubr.bf16.vlgmr.msra.gmra.mrb[52].mxu1 %v1769_v17  ;;  %3446 = vmatmul.mubr.bf16.vlgmr.msra.gmra.mrb[44].mxu0 %v1769_v17  ;;  %v5230_v17 = vld [vmem:[#allocation17 + $0x60] ss:$12 sps:$4 sm:$0xff]  }
 0x417   :  { %1875 = vmatpush1.bf16.msra.mxu1 %v5185_v21  ;;  %3450 = vmatpush3.bf16.msra.mxu0 %v5188_v36 }
 0x418   :  { %1876 = vmatprep.subr.bf16.mxu1 %v5191_v19  ;;  %3451 = vmatprep.subr.bf16.mxu0 %v5813_v7 }
 0x419   :  { %1906 = vmatprep.mubr.bf16.mxu1 %v5814_v0  ;;  %3465 = vmatprep.mubr.msk.bf16.mxu0 %vm4294_vm1, %v5813_v7 }
 0x41b   :  { %1877 = vmatpush1.bf16.msra.mxu1 %v5199_v51  ;;  %3452 = vmatpush3.bf16.msra.mxu0 %v5202_v52 }
 0x41c   :  { %v3795_v2 = vpop.eup %3794  ;;  %1878 = vmatprep.subr.bf16.mxu1 %v5205_v53  ;;  %3453 = vmatprep.subr.bf16.mxu0 %v5813_v7 }
 0x41d   :  { %v1712_v54 = vmul.f32 %v3795_v2, %v1711_v23  ;;  %v3797_v8 = vpop.eup %3796 }
 0x41e   :  { %v1715_v23 = vsub.f32 1.0, %v3797_v8  ;;  %v1717_v37 = vmul.f32 %v3797_v8, %v5073_v9  ;;  %v5261_v8 = vld [vmem:[#allocation17 + $0xac] ss:$12 sps:$4 sm:$0xff]  }
 0x41f   :  { %v1713_v58 = vadd.f32 %v1712_v54, %v5862_v57  ;;  %1879 = vmatpush1.bf16.msra.mxu1 %v5210_v60  ;;  %3454 = vmatpush3.bf16.msra.mxu0 %v5213_v59  ;;  %v5240_v54 = vld [vmem:[#allocation17 + $0x78] ss:$12 sps:$4 sm:$0xff]   ;;  %v5243_v57 = vld [vmem:[#allocation17 + $0x80] ss:$12 sps:$4 sm:$0xff]  }
 0x420   :  { %1880 = vmatprep.subr.bf16.mxu1 %v5216_v62  ;;  %3455 = vmatprep.subr.bf16.mxu0 %v5813_v7 }
 0x421   :  { %3798 = vtanh.f32 %v1713_v58 }
 0x423   :  { %1881 = vmatpush1.bf16.msra.mxu1 %v5220_v63  ;;  %3456 = vmatpush3.bf16.msra.mxu0 %v5223_v48 }
 0x424   :  { %1882 = vmatprep.subr.bf16.mxu1 %v5226_v45  ;;  %3457 = vmatprep.subr.bf16.mxu0 %v5813_v7 }
 0x427   :  { %1883 = vmatpush1.bf16.msra.mxu1 %v5230_v17  ;;  %3458 = vmatpush3.bf16.msra.mxu0 %v5233_v20 }
 0x428   :  { %1884 = vmatprep.subr.bf16.mxu1 %v5236_v22  ;;  %3459 = vmatprep.subr.bf16.mxu0 %v5813_v7 }
 0x42b   :  { %v3799_v2 = vpop.eup %3798  ;;  %1885 = vmatpush1.bf16.msra.mxu1 %v5240_v54  ;;  %3460 = vmatpush3.bf16.msra.mxu0 %v5243_v57 }
 0x42c   :  { %v1716_v58 = vmul.f32 %v3799_v2, %v1715_v23  ;;  %1886 = vmatprep.subr.bf16.mxu1 %v5247_v56  ;;  %3461 = vmatprep.subr.bf16.mxu0 %v5813_v7  ;;  %v1749_v23 = vmul.f32 %v5253_v44, %v5073_v9  ;;  %v5866_v9 = vld [vmem:[#allocation55_spill] sm:$0xff] }
 0x42e   :  { %v1718_v40 = vadd.f32 %v1717_v37, %v1716_v58  ;;  %v5273_v58 = vld [vmem:[#allocation17 + $0xa8] ss:$12 sps:$4 sm:$0xff]  }
 0x42f   :  { %1887 = vmatpush1.bf16.msra.mxu1 %v5255_v41  ;;  %3462 = vmatpush3.bf16.msra.mxu0 %v5258_v46 }
 0x430   :  { %1888 = vmatprep.subr.bf16.mxu1 %v5261_v8  ;;  %3463 = vmatprep.subr.bf16.mxu0 %v5813_v7  ;;  %v5266_v37 = vmul.f32 %v5251_v43, %v1718_v40 }
 0x432   :  { %5865 = vst [vmem:[#allocation84_spill] sm:$0xff] %v5266_v37  ;;  %v5271_v2 = vadd.f32 %v1749_v23, %v5266_v37 }
 0x433   :  { %1889 = vmatpush1.bf16.msra.mxu1 %v5273_v58  ;;  %3464 = vmatpush3.bf16.msra.mxu0 %v5276_v6 }
 0x434   :  { %v1873_v4 = vpack.c.bf16 %v5271_v2, %v5271_v2  ;;  %2020 = vmatprep.subr.bf16.mxu1 %v5079_v11  ;;  %3469 = vmatprep.subr.bf16.mxu0 %v5813_v7 }
 0x436   :  { %1907 = vmatmul.mubr.bf16.vlgmr.msra.gmra.mrb[56].mxu1 %v1873_v4  ;;  %3466 = vmatmul.mubr.bf16.vlgmr.msra.gmra.mrb[48].mxu0 %v1873_v4 }
 0x437   :  { %2021 = vmatpush1.bf16.msra.mxu1 %v5083_v13  ;;  %3470 = vmatpush3.bf16.msra.mxu0 %v5086_v14 }
 0x438   :  { %2022 = vmatprep.subr.bf16.mxu1 %v5089_v15  ;;  %3471 = vmatprep.subr.bf16.mxu0 %v5813_v7 }
 0x439   :  { %2052 = vmatprep.mubr.bf16.mxu1 %v5814_v0  ;;  %3485 = vmatprep.mubr.msk.bf16.mxu0 %vm4294_vm1, %v5813_v7 }
 0x43b   :  { %2023 = vmatpush1.bf16.msra.mxu1 %v5096_v16  ;;  %3472 = vmatpush3.bf16.msra.mxu0 %v5099_v34 }
 0x43c   :  { %2024 = vmatprep.subr.bf16.mxu1 %v5102_v38  ;;  %3473 = vmatprep.subr.bf16.mxu0 %v5813_v7 }
 0x43f   :  { %2025 = vmatpush1.bf16.msra.mxu1 %v5106_v39  ;;  %3474 = vmatpush3.bf16.msra.mxu0 %v5109_v35 }
 0x440   :  { %2026 = vmatprep.subr.bf16.mxu1 %v5112_v24  ;;  %3475 = vmatprep.subr.bf16.mxu0 %v5813_v7 }
 0x443   :  { %2027 = vmatpush1.bf16.msra.mxu1 %v5116_v25  ;;  %3476 = vmatpush3.bf16.msra.mxu0 %v5119_v26 }
 0x444   :  { %2028 = vmatprep.subr.bf16.mxu1 %v5122_v27  ;;  %3477 = vmatprep.subr.bf16.mxu0 %v5813_v7 }
 0x447   :  { %2029 = vmatpush1.bf16.msra.mxu1 %v5126_v28  ;;  %3478 = vmatpush3.bf16.msra.mxu0 %v5129_v29 }
 0x448   :  { %2030 = vmatprep.subr.bf16.mxu1 %v5132_v30  ;;  %3479 = vmatprep.subr.bf16.mxu0 %v5813_v7 }
 0x44b   :  { %2031 = vmatpush1.bf16.msra.mxu1 %v5136_v3  ;;  %3480 = vmatpush3.bf16.msra.mxu0 %v5139_v31 }
 0x44c   :  { %2032 = vmatprep.subr.bf16.mxu1 %v5142_v50  ;;  %3481 = vmatprep.subr.bf16.mxu0 %v5813_v7 }
 0x44f   :  { %2033 = vmatpush1.bf16.msra.mxu1 %v5146_v12  ;;  %3482 = vmatpush3.bf16.msra.mxu0 %v5149_v18 }
 0x450   :  { %2034 = vmatprep.subr.bf16.mxu1 %v5152_v47  ;;  %3483 = vmatprep.subr.bf16.mxu0 %v5813_v7 }
 0x453   :  { %2035 = vmatpush1.bf16.msra.mxu1 %v5156_v42  ;;  %3484 = vmatpush3.bf16.msra.mxu0 %v5159_v55 }
 0x454   :  { %2124 = vmatprep.subr.bf16.mxu1 %v5162_v49  ;;  %3489 = vmatprep.subr.bf16.mxu0 %v5813_v7 }
 0x4e9   :  { %v1804_v40 = vpop.f32.mrb[52].mxu1  ;;  %v1845_v4 = vpop.f32.mrb[44].mxu0 }
 0x4ea   :  { %v1851_v23 = vadd.f32 %v1804_v40, %v5866_v9  ;;  %v1806_v1 = vpop.f32.mrb[53].mxu1  ;;  %v3447_v10 = vpop.f32.mrb[45].mxu0  ;;  %v1865_v3 = vadd.f32 %v4904_v61, %v1845_v4 }
 0x4eb   :  { %v1858_v37 = vadd.f32 %v1806_v1, %v5867_v5  ;;  %v1808_v44 = vpop.f32.mrb[54].mxu1  ;;  %v1848_v43 = vpop.f32.mrb[46].mxu0  ;;  %v5868_v10 = vld [vmem:[#allocation54_spill] sm:$0xff] }
 0x4ec   :  { %v3109_v47 = vmul.f32 -1.442695, %v1851_v23  ;;  %v1809_v18 = vpop.f32.mrb[55].mxu1  ;;  %v3448_v12 = vpop.f32.mrb[47].mxu0 }
 0x4ed   :  { %v3110_v42 = vmul.f32 -1.442695, %v1858_v37  ;;  %v5869_v18 = vld [vmem:[#allocation81_spill] sm:$0xff] }
 0x4ee   :  { %3800 = vpow2.f32 %v3109_v47 }
 0x4ef   :  { %3802 = vpow2.f32 %v3110_v42  ;;  %v5870_v42 = vld [vmem:[#allocation82_spill] sm:$0xff] }
 0x4f8   :  { %v3801_v55 = vpop.eup %3800 }
 0x4f9   :  { %v1855_v49 = vadd.f32 1.0, %v3801_v55  ;;  %v3803_v50 = vpop.eup %3802 }
 0x4fa   :  { %v1862_v31 = vadd.f32 1.0, %v3803_v50 }
 0x4fb   :  { %3804 = vrcp.f32 %v1855_v49 }
 0x4fc   :  { %3806 = vrcp.f32 %v1862_v31 }
 0x505   :  { %v3805_v40 = vpop.eup %3804 }
 0x506   :  { %v1866_v9 = vmul.f32 %v3805_v40, %v1865_v3  ;;  %v3807_v61 = vpop.eup %3806 }
 0x507   :  { %v1869_v31 = vsub.f32 1.0, %v3807_v61 }
 0x508   :  { %v1867_v1 = vadd.f32 %v1866_v9, %v5868_v10  ;;  %v1871_v9 = vmul.f32 %v3807_v61, %v5181_v32 }
 0x509   :  { %v1908_v44 = vpop.f32.mrb[56].mxu1  ;;  %v1949_v43 = vpop.f32.mrb[48].mxu0 }
 0x50a   :  { %3808 = vtanh.f32 %v1867_v1  ;;  %v1955_v12 = vadd.f32 %v1908_v44, %v5869_v18  ;;  %v1910_v47 = vpop.f32.mrb[57].mxu1  ;;  %v3467_v5 = vpop.f32.mrb[49].mxu0 }
 0x50b   :  { %v1962_v37 = vadd.f32 %v1910_v47, %v5870_v42  ;;  %v1912_v55 = vpop.f32.mrb[58].mxu1  ;;  %v1952_v49 = vpop.f32.mrb[50].mxu0 }
 0x50c   :  { %v3111_v23 = vmul.f32 -1.442695, %v1955_v12  ;;  %v1913_v50 = vpop.f32.mrb[59].mxu1  ;;  %v3468_v30 = vpop.f32.mrb[51].mxu0  ;;  %v1969_v55 = vadd.f32 %v4922_v33, %v1949_v43 }
 0x50d   :  { %v3112_v3 = vmul.f32 -1.442695, %v1962_v37  ;;  %v5325_v44 = vpop.permute.xlu0 %1979  ;;  %v5327_v18 = vpop.permute.xlu1 %1996  ;;  %v5871_v50 = vld [vmem:[#allocation77_spill] sm:$0xff] }
 0x50e   :  { %3810 = vpow2.f32 %v3111_v23  ;;  %v1999_v30 = vmul.f32 %v5327_v18, %v5181_v32 }
 0x50f   :  { %3812 = vpow2.f32 %v3112_v3 }
 0x514   :  { %v3809_v4 = vpop.eup %3808 }
 0x515   :  { %v1870_v40 = vmul.f32 %v3809_v4, %v1869_v31 }
 0x517   :  { %v1872_v10 = vadd.f32 %v1871_v9, %v1870_v40  ;;  %v5367_v9 = vpop.permute.xlu0 %1985 }
 0x518   :  { %v3811_v1 = vpop.eup %3810 }
 0x519   :  { %v1959_v47 = vadd.f32 1.0, %v3811_v1  ;;  %v1982_v12 = vmul.f32 %v5325_v44, %v1872_v10  ;;  %v3813_v37 = vpop.eup %3812  ;;  %v5369_v10 = vpop.permute.xlu1 %2004 }
 0x51a   :  { %v1966_v32 = vadd.f32 1.0, %v3813_v37  ;;  %v5874_v37 = vld [vmem:[#allocation43_spill] sm:$0xff] }
 0x51b   :  { %3814 = vrcp.f32 %v1959_v47  ;;  %1990 = vst.msk [vmem:[#allocation22 + $0x18] sm:$0xff] %vm251_vm0, %v1982_v12  ;;  %v5333_v5 = vadd.f32 %v1999_v30, %v1982_v12  ;;  %v2007_v47 = vmul.f32 %v5369_v10, %v5271_v2 }
 0x51c   :  { %3816 = vrcp.f32 %v1966_v32  ;;  %v5875_v32 = vld [vmem:[#allocation48_spill] sm:$0xff] }
 0x51d   :  { %v2019_v42 = vpack.c.bf16 %v5333_v5, %v5333_v5 }
 0x51f   :  { %2053 = vmatmul.mubr.bf16.vlgmr.msra.gmra.mrb[60].mxu1 %v2019_v42  ;;  %3486 = vmatmul.mubr.bf16.vlgmr.msra.gmra.mrb[52].mxu0 %v2019_v42  ;;  %v5873_v42 = vld [vmem:[#allocation44_spill] sm:$0xff] }
 0x520   :  { %2125 = vmatpush1.bf16.msra.mxu1 %v5185_v21  ;;  %3490 = vmatpush3.bf16.msra.mxu0 %v5188_v36 }
 0x521   :  { %2126 = vmatprep.subr.bf16.mxu1 %v5191_v19  ;;  %3491 = vmatprep.subr.bf16.mxu0 %v5813_v7 }
 0x522   :  { %2156 = vmatprep.mubr.bf16.mxu1 %v5814_v0  ;;  %3505 = vmatprep.mubr.msk.bf16.mxu0 %vm4294_vm1, %v5813_v7 }
 0x524   :  { %2127 = vmatpush1.bf16.msra.mxu1 %v5199_v51  ;;  %3492 = vmatpush3.bf16.msra.mxu0 %v5202_v52 }
 0x525   :  { %v3815_v49 = vpop.eup %3814  ;;  %2128 = vmatprep.subr.bf16.mxu1 %v5205_v53  ;;  %3493 = vmatprep.subr.bf16.mxu0 %v5813_v7 }
 0x526   :  { %v1970_v23 = vmul.f32 %v3815_v49, %v1969_v55  ;;  %v3817_v33 = vpop.eup %3816  ;;  %v5876_v55 = vld [vmem:[#allocation50_spill] sm:$0xff]  ;;  %v5877_v49 = vld [vmem:[#allocation56_spill] sm:$0xff] }
 0x527   :  { %v1973_v43 = vsub.f32 1.0, %v3817_v33  ;;  %v1975_v4 = vmul.f32 %v3817_v33, %v5271_v2  ;;  %v5872_v2 = vld [vmem:[#allocation42_spill] sm:$0xff]  ;;  %v5881_v33 = vld [vmem:[#allocation92_spill] sm:$0xff] }
 0x528   :  { %v1971_v61 = vadd.f32 %v1970_v23, %v5871_v50  ;;  %2129 = vmatpush1.bf16.msra.mxu1 %v5210_v60  ;;  %3494 = vmatpush3.bf16.msra.mxu0 %v5213_v59  ;;  %v5878_v23 = vld [vmem:[#allocation85_spill] sm:$0xff]  ;;  %v5879_v50 = vld [vmem:[#allocation86_spill] sm:$0xff] }
 0x529   :  { %2130 = vmatprep.subr.bf16.mxu1 %v5216_v62  ;;  %3495 = vmatprep.subr.bf16.mxu0 %v5813_v7 }
 0x52a   :  { %3818 = vtanh.f32 %v1971_v61  ;;  %v5880_v61 = vld [vmem:[#allocation75_spill] sm:$0xff] }
 0x52c   :  { %2131 = vmatpush1.bf16.msra.mxu1 %v5220_v63  ;;  %3496 = vmatpush3.bf16.msra.mxu0 %v5223_v48 }
 0x52d   :  { %2132 = vmatprep.subr.bf16.mxu1 %v5226_v45  ;;  %3497 = vmatprep.subr.bf16.mxu0 %v5813_v7 }
 0x530   :  { %2133 = vmatpush1.bf16.msra.mxu1 %v5230_v17  ;;  %3498 = vmatpush3.bf16.msra.mxu0 %v5233_v20 }
 0x531   :  { %2134 = vmatprep.subr.bf16.mxu1 %v5236_v22  ;;  %3499 = vmatprep.subr.bf16.mxu0 %v5813_v7 }
 0x534   :  { %v3819_v3 = vpop.eup %3818  ;;  %2135 = vmatpush1.bf16.msra.mxu1 %v5240_v54  ;;  %3500 = vmatpush3.bf16.msra.mxu0 %v5243_v57 }
 0x535   :  { %v1974_v31 = vmul.f32 %v3819_v3, %v1973_v43  ;;  %2136 = vmatprep.subr.bf16.mxu1 %v5247_v56  ;;  %3501 = vmatprep.subr.bf16.mxu0 %v5813_v7 }
 0x537   :  { %v1976_v40 = vadd.f32 %v1975_v4, %v1974_v31  ;;  %v5882_v31 = vld [vmem:[#allocation59_spill] sm:$0xff] }
 0x538   :  { %2137 = vmatpush1.bf16.msra.mxu1 %v5255_v41  ;;  %3502 = vmatpush3.bf16.msra.mxu0 %v5258_v46 }
 0x539   :  { %2138 = vmatprep.subr.bf16.mxu1 %v5261_v8  ;;  %3503 = vmatprep.subr.bf16.mxu0 %v5813_v7  ;;  %v5376_v1 = vmul.f32 %v5367_v9, %v1976_v40 }
 0x53b   :  { %v5381_v12 = vadd.f32 %v2007_v47, %v5376_v1 }
 0x53c   :  { %2139 = vmatpush1.bf16.msra.mxu1 %v5273_v58  ;;  %3504 = vmatpush3.bf16.msra.mxu0 %v5276_v6 }
 0x53d   :  { %v2123_v30 = vpack.c.bf16 %v5381_v12, %v5381_v12  ;;  %2248 = vmatprep.subr.bf16.mxu1 %v5079_v11  ;;  %3509 = vmatprep.subr.bf16.mxu0 %v5813_v7 }
 0x53f   :  { %2157 = vmatmul.mubr.bf16.vlgmr.msra.gmra.mrb[64].mxu1 %v2123_v30  ;;  %3506 = vmatmul.mubr.bf16.vlgmr.msra.gmra.mrb[56].mxu0 %v2123_v30  ;;  %v5883_v30 = vld [vmem:[#allocation61_spill] sm:$0xff] }
 0x540   :  { %2249 = vmatpush1.bf16.msra.mxu1 %v5083_v13  ;;  %3510 = vmatpush3.bf16.msra.mxu0 %v5086_v14 }
 0x541   :  { %2250 = vmatprep.subr.bf16.mxu1 %v5089_v15  ;;  %3511 = vmatprep.subr.bf16.mxu0 %v5813_v7 }
 0x542   :  { %2280 = vmatprep.mubr.bf16.mxu1 %v5814_v0  ;;  %3525 = vmatprep.mubr.msk.bf16.mxu0 %vm4294_vm1, %v5813_v7 }
 0x544   :  { %2251 = vmatpush1.bf16.msra.mxu1 %v5096_v16  ;;  %3512 = vmatpush3.bf16.msra.mxu0 %v5099_v34 }
 0x545   :  { %2252 = vmatprep.subr.bf16.mxu1 %v5102_v38  ;;  %3513 = vmatprep.subr.bf16.mxu0 %v5813_v7 }
 0x548   :  { %2253 = vmatpush1.bf16.msra.mxu1 %v5106_v39  ;;  %3514 = vmatpush3.bf16.msra.mxu0 %v5109_v35 }
 0x549   :  { %2254 = vmatprep.subr.bf16.mxu1 %v5112_v24  ;;  %3515 = vmatprep.subr.bf16.mxu0 %v5813_v7 }
 0x54c   :  { %2255 = vmatpush1.bf16.msra.mxu1 %v5116_v25  ;;  %3516 = vmatpush3.bf16.msra.mxu0 %v5119_v26 }
 0x54d   :  { %2256 = vmatprep.subr.bf16.mxu1 %v5122_v27  ;;  %3517 = vmatprep.subr.bf16.mxu0 %v5813_v7 }
 0x550   :  { %2257 = vmatpush1.bf16.msra.mxu1 %v5126_v28  ;;  %3518 = vmatpush3.bf16.msra.mxu0 %v5129_v29  ;;  %v5426_v28 = vld [vmem:[#allocation19] ss:$0 sm:$0xff] }
 0x551   :  { %2258 = vmatprep.subr.bf16.mxu1 %v5872_v2  ;;  %3519 = vmatprep.subr.bf16.mxu0 %v5813_v7 }
 0x554   :  { %2259 = vmatpush1.bf16.msra.mxu1 %v5873_v42  ;;  %3520 = vmatpush3.bf16.msra.mxu0 %v5874_v37 }
 0x555   :  { %2260 = vmatprep.subr.bf16.mxu1 %v5875_v32  ;;  %3521 = vmatprep.subr.bf16.mxu0 %v5813_v7 }
 0x558   :  { %2261 = vmatpush1.bf16.msra.mxu1 %v5876_v55  ;;  %3522 = vmatpush3.bf16.msra.mxu0 %v5877_v49 }
 0x559   :  { %2262 = vmatprep.subr.bf16.mxu1 %v5878_v23  ;;  %3523 = vmatprep.subr.bf16.mxu0 %v5813_v7 }
 0x55c   :  { %2263 = vmatpush1.bf16.msra.mxu1 %v5879_v50  ;;  %3524 = vmatpush3.bf16.msra.mxu0 %v5880_v61 }
 0x55d   :  { %2352 = vmatprep.subr.bf16.mxu1 %v5881_v33  ;;  %3529 = vmatprep.subr.bf16.mxu0 %v5813_v7 }
 0x5f2   :  { %v2054_v43 = vpop.f32.mrb[60].mxu1  ;;  %v2095_v3 = vpop.f32.mrb[52].mxu0 }
 0x5f3   :  { %v2101_v4 = vadd.f32 %v2054_v43, %v5882_v31  ;;  %v2056_v40 = vpop.f32.mrb[61].mxu1  ;;  %v3487_v47 = vpop.f32.mrb[53].mxu0  ;;  %v2115_v43 = vadd.f32 %v5426_v28, %v2095_v3 }
 0x5f4   :  { %v2108_v49 = vadd.f32 %v2056_v40, %v5883_v30  ;;  %v2058_v55 = vpop.f32.mrb[62].mxu1  ;;  %v2098_v23 = vpop.f32.mrb[54].mxu0 }
 0x5f5   :  { %v3113_v32 = vmul.f32 -1.442695, %v2101_v4  ;;  %v2059_v37 = vpop.f32.mrb[63].mxu1  ;;  %v3488_v42 = vpop.f32.mrb[55].mxu0  ;;  %v5884_v55 = vld [vmem:[#allocation60_spill] sm:$0xff] }
 0x5f6   :  { %v3114_v50 = vmul.f32 -1.442695, %v2108_v49  ;;  %v5885_v42 = vld [vmem:[#allocation78_spill] sm:$0xff] }
 0x5f7   :  { %3820 = vpow2.f32 %v3113_v32 }
 0x5f8   :  { %3822 = vpow2.f32 %v3114_v50 }
 0x601   :  { %v3821_v61 = vpop.eup %3820 }
 0x602   :  { %v2105_v33 = vadd.f32 1.0, %v3821_v61  ;;  %v3823_v2 = vpop.eup %3822  ;;  %v5886_v61 = vld [vmem:[#allocation79_spill] sm:$0xff] }
 0x603   :  { %v2112_v29 = vadd.f32 1.0, %v3823_v2 }
 0x604   :  { %3824 = vrcp.f32 %v2105_v33 }
 0x605   :  { %3826 = vrcp.f32 %v2112_v29 }
 0x60e   :  { %v3825_v31 = vpop.eup %3824 }
 0x60f   :  { %v2116_v47 = vmul.f32 %v3825_v31, %v2115_v43  ;;  %v3827_v3 = vpop.eup %3826 }
 0x610   :  { %v2119_v29 = vsub.f32 1.0, %v3827_v3 }
 0x611   :  { %v2117_v23 = vadd.f32 %v2116_v47, %v5884_v55  ;;  %v2121_v55 = vmul.f32 %v3827_v3, %v5333_v5 }
 0x612   :  { %v2158_v4 = vpop.f32.mrb[64].mxu1  ;;  %v2199_v37 = vpop.f32.mrb[56].mxu0 }
 0x613   :  { %3828 = vtanh.f32 %v2117_v23  ;;  %v2205_v32 = vadd.f32 %v2158_v4, %v5885_v42  ;;  %v2160_v49 = vpop.f32.mrb[65].mxu1  ;;  %v3507_v50 = vpop.f32.mrb[57].mxu0 }
 0x614   :  { %v2212_v33 = vadd.f32 %v2160_v49, %v5886_v61  ;;  %v2162_v40 = vpop.f32.mrb[66].mxu1  ;;  %v2202_v2 = vpop.f32.mrb[58].mxu0  ;;  %v2233_v49 = vmul.f32 %v5369_v10, %v5333_v5  ;;  %v5449_v61 = vld [vmem:[#allocation20] ss:$0 sm:$0xff] }
 0x615   :  { %v3115_v30 = vmul.f32 -1.442695, %v2205_v32  ;;  %v2163_v27 = vpop.f32.mrb[67].mxu1  ;;  %v3508_v26 = vpop.f32.mrb[59].mxu0 }
 0x616   :  { %v3116_v43 = vmul.f32 -1.442695, %v2212_v33  ;;  %v2219_v33 = vadd.f32 %v5449_v61, %v2199_v37 }
 0x617   :  { %3830 = vpow2.f32 %v3115_v30  ;;  %v5887_v30 = vld [vmem:[#allocation71_spill] sm:$0xff] }
 0x618   :  { %3832 = vpow2.f32 %v3116_v43 }
 0x61d   :  { %v3829_v31 = vpop.eup %3828 }
 0x61e   :  { %v2120_v47 = vmul.f32 %v3829_v31, %v2119_v29 }
 0x620   :  { %v2122_v23 = vadd.f32 %v2121_v55, %v2120_v47 }
 0x621   :  { %v3831_v4 = vpop.eup %3830 }
 0x622   :  { %v2209_v42 = vadd.f32 1.0, %v3831_v4  ;;  %v2227_v50 = vmul.f32 %v2122_v23, %v5367_v9  ;;  %v3833_v32 = vpop.eup %3832  ;;  %v2235_v23 = vmul.f32 %v5381_v12, %v5327_v18  ;;  %v2926_v4 = vld [vmem:[#allocation22 + $0x18] sm:$0xff]  ;;  %v5900_v18 = vld [vmem:[#allocation75_spill] sm:$0xff] }
 0x623   :  { %v2216_v5 = vadd.f32 1.0, %v3833_v32 }
 0x624   :  { %3834 = vrcp.f32 %v2209_v42  ;;  %2230 = vst.msk [vmem:[#allocation22 + $0x20] sm:$0xff] %vm251_vm0, %v2227_v50  ;;  %v5437_v26 = vadd.f32 %v2233_v49, %v2227_v50 }
 0x625   :  { %3836 = vrcp.f32 %v2216_v5  ;;  %v5902_v5 = vld [vmem:[#allocation63_spill] sm:$0xff] }
 0x626   :  { %v2247_v27 = vpack.c.bf16 %v5437_v26, %v5437_v26 }
 0x628   :  { %2281 = vmatmul.mubr.bf16.vlgmr.msra.gmra.mrb[68].mxu1 %v2247_v27  ;;  %3526 = vmatmul.mubr.bf16.vlgmr.msra.gmra.mrb[60].mxu0 %v2247_v27 }
 0x629   :  { %2353 = vmatpush1.bf16.msra.mxu1 %v5185_v21  ;;  %3530 = vmatpush3.bf16.msra.mxu0 %v5188_v36 }
 0x62a   :  { %2354 = vmatprep.subr.bf16.mxu1 %v5191_v19  ;;  %3531 = vmatprep.subr.bf16.mxu0 %v5813_v7 }
 0x62b   :  { %v2927_v9 = vld [vmem:[#allocation22 + $0x20] sm:$0xff]  ;;  %2384 = vmatprep.mubr.bf16.mxu1 %v5814_v0  ;;  %3545 = vmatprep.mubr.msk.bf16.mxu0 %vm4294_vm1, %v5813_v7 }
 0x62c   :  { %v2943_v10 = vadd.f32 %v2927_v9, %v5376_v1 }
 0x62d   :  { %2355 = vmatpush1.bf16.msra.mxu1 %v5199_v51  ;;  %3532 = vmatpush3.bf16.msra.mxu0 %v5202_v52 }
 0x62e   :  { %v3835_v40 = vpop.eup %3834  ;;  %2951 = vst.msk [vmem:[#allocation22 + $0x20] sm:$0xff] %vm251_vm0, %v2943_v10  ;;  %2356 = vmatprep.subr.bf16.mxu1 %v5205_v53  ;;  %3533 = vmatprep.subr.bf16.mxu0 %v5813_v7 }
 0x62f   :  { %v2220_v2 = vmul.f32 %v3835_v40, %v2219_v33  ;;  %v3837_v1 = vpop.eup %3836  ;;  %v5903_v40 = vld [vmem:[#allocation65_spill] sm:$0xff] }
 0x630   :  { %v2223_v37 = vsub.f32 1.0, %v3837_v1  ;;  %v2225_v31 = vmul.f32 %v3837_v1, %v5381_v12  ;;  %v5901_v12 = vld [vmem:[#allocation92_spill] sm:$0xff] }
 0x631   :  { %v2221_v3 = vadd.f32 %v2220_v2, %v5887_v30  ;;  %2357 = vmatpush1.bf16.msra.mxu1 %v5210_v60  ;;  %3534 = vmatpush3.bf16.msra.mxu0 %v5213_v59 }
 0x632   :  { %2358 = vmatprep.subr.bf16.mxu1 %v5216_v62  ;;  %3535 = vmatprep.subr.bf16.mxu0 %v5813_v7 }
 0x633   :  { %3838 = vtanh.f32 %v2221_v3 }
 0x635   :  { %2359 = vmatpush1.bf16.msra.mxu1 %v5220_v63  ;;  %3536 = vmatpush3.bf16.msra.mxu0 %v5223_v48 }
 0x636   :  { %2360 = vmatprep.subr.bf16.mxu1 %v5226_v45  ;;  %3537 = vmatprep.subr.bf16.mxu0 %v5813_v7 }
 0x639   :  { %2361 = vmatpush1.bf16.msra.mxu1 %v5230_v17  ;;  %3538 = vmatpush3.bf16.msra.mxu0 %v5233_v20 }
 0x63a   :  { %2362 = vmatprep.subr.bf16.mxu1 %v5236_v22  ;;  %3539 = vmatprep.subr.bf16.mxu0 %v5813_v7 }
 0x63d   :  { %v3839_v43 = vpop.eup %3838  ;;  %2363 = vmatpush1.bf16.msra.mxu1 %v5240_v54  ;;  %3540 = vmatpush3.bf16.msra.mxu0 %v5243_v57 }
 0x63e   :  { %v2224_v29 = vmul.f32 %v3839_v43, %v2223_v37  ;;  %2364 = vmatprep.subr.bf16.mxu1 %v5247_v56  ;;  %3541 = vmatprep.subr.bf16.mxu0 %v5813_v7 }
 0x640   :  { %v2226_v47 = vadd.f32 %v2225_v31, %v2224_v29 }
 0x641   :  { %2365 = vmatpush1.bf16.msra.mxu1 %v5255_v41  ;;  %3542 = vmatpush3.bf16.msra.mxu0 %v5258_v46 }
 0x642   :  { %2366 = vmatprep.subr.bf16.mxu1 %v5261_v8  ;;  %3543 = vmatprep.subr.bf16.mxu0 %v5813_v7  ;;  %v2228_v55 = vmul.f32 %v2226_v47, %v5325_v44  ;;  %v5899_v44 = vld [vmem:[#allocation86_spill] sm:$0xff] }
 0x644   :  { %v5482_v42 = vadd.f32 %v2235_v23, %v2228_v55  ;;  %v2942_v50 = vadd.f32 %v2926_v4, %v2228_v55 }
 0x645   :  { %2367 = vmatpush1.bf16.msra.mxu1 %v5273_v58  ;;  %3544 = vmatpush3.bf16.msra.mxu0 %v5276_v6 }
 0x646   :  { %v2351_v49 = vpack.c.bf16 %v5482_v42, %v5482_v42  ;;  %2950 = vst.msk [vmem:[#allocation22 + $0x18] sm:$0xff] %vm251_vm0, %v2942_v50  ;;  %2476 = vmatprep.subr.bf16.mxu1 %v5079_v11  ;;  %3549 = vmatprep.subr.bf16.mxu0 %v5813_v7  ;;  %v5888_v11 = vld [vmem:[#allocation37_spill] sm:$0xff] }
 0x648   :  { %2385 = vmatmul.mubr.bf16.vlgmr.msra.gmra.mrb[72].mxu1 %v2351_v49  ;;  %3546 = vmatmul.mubr.bf16.vlgmr.msra.gmra.mrb[64].mxu0 %v2351_v49 }
 0x649   :  { %2477 = vmatpush1.bf16.msra.mxu1 %v5083_v13  ;;  %3550 = vmatpush3.bf16.msra.mxu0 %v5086_v14  ;;  %v5889_v13 = vld [vmem:[#allocation39_spill] sm:$0xff]  ;;  %v5890_v14 = vld [vmem:[#allocation41_spill] sm:$0xff] }
 0x64a   :  { %2478 = vmatprep.subr.bf16.mxu1 %v5089_v15  ;;  %3551 = vmatprep.subr.bf16.mxu0 %v5813_v7  ;;  %v5891_v15 = vld [vmem:[#allocation40_spill] sm:$0xff] }
 0x64b   :  { %2508 = vmatprep.mubr.bf16.mxu1 %v5814_v0  ;;  %3565 = vmatprep.mubr.msk.bf16.mxu0 %vm4294_vm1, %v5813_v7 }
 0x64d   :  { %2479 = vmatpush1.bf16.msra.mxu1 %v5096_v16  ;;  %3552 = vmatpush3.bf16.msra.mxu0 %v5099_v34  ;;  %v5892_v16 = vld [vmem:[#allocation42_spill] sm:$0xff]  ;;  %v5893_v34 = vld [vmem:[#allocation44_spill] sm:$0xff] }
 0x64e   :  { %2480 = vmatprep.subr.bf16.mxu1 %v5102_v38  ;;  %3553 = vmatprep.subr.bf16.mxu0 %v5813_v7  ;;  %v5894_v38 = vld [vmem:[#allocation43_spill] sm:$0xff] }
 0x651   :  { %2481 = vmatpush1.bf16.msra.mxu1 %v5106_v39  ;;  %3554 = vmatpush3.bf16.msra.mxu0 %v5109_v35  ;;  %v5895_v39 = vld [vmem:[#allocation48_spill] sm:$0xff]  ;;  %v5896_v35 = vld [vmem:[#allocation50_spill] sm:$0xff] }
 0x652   :  { %2482 = vmatprep.subr.bf16.mxu1 %v5112_v24  ;;  %3555 = vmatprep.subr.bf16.mxu0 %v5813_v7  ;;  %v5897_v24 = vld [vmem:[#allocation56_spill] sm:$0xff] }
 0x655   :  { %2483 = vmatpush1.bf16.msra.mxu1 %v5116_v25  ;;  %3556 = vmatpush3.bf16.msra.mxu0 %v5888_v11  ;;  %v5898_v25 = vld [vmem:[#allocation85_spill] sm:$0xff]  ;;  %v5904_v11 = vld [vmem:[#allocation64_spill] sm:$0xff] }
 0x656   :  { %2484 = vmatprep.subr.bf16.mxu1 %v5889_v13  ;;  %3557 = vmatprep.subr.bf16.mxu0 %v5813_v7 }
 0x659   :  { %2485 = vmatpush1.bf16.msra.mxu1 %v5890_v14  ;;  %3558 = vmatpush3.bf16.msra.mxu0 %v5891_v15 }
 0x65a   :  { %2486 = vmatprep.subr.bf16.mxu1 %v5892_v16  ;;  %3559 = vmatprep.subr.bf16.mxu0 %v5813_v7  ;;  %v5905_v16 = vld [vmem:[#allocation74_spill] sm:$0xff] }
 0x65d   :  { %2487 = vmatpush1.bf16.msra.mxu1 %v5893_v34  ;;  %3560 = vmatpush3.bf16.msra.mxu0 %v5894_v38 }
 0x65e   :  { %2488 = vmatprep.subr.bf16.mxu1 %v5895_v39  ;;  %3561 = vmatprep.subr.bf16.mxu0 %v5813_v7 }
 0x661   :  { %2489 = vmatpush1.bf16.msra.mxu1 %v5896_v35  ;;  %3562 = vmatpush3.bf16.msra.mxu0 %v5897_v24  ;;  %v5906_v35 = vld [vmem:[#allocation76_spill] sm:$0xff] }
 0x662   :  { %2490 = vmatprep.subr.bf16.mxu1 %v5898_v25  ;;  %3563 = vmatprep.subr.bf16.mxu0 %v5813_v7 }
 0x665   :  { %2491 = vmatpush1.bf16.msra.mxu1 %v5899_v44  ;;  %3564 = vmatpush3.bf16.msra.mxu0 %v5900_v18 }
 0x666   :  { %2580 = vmatprep.subr.bf16.mxu1 %v5901_v12  ;;  %3569 = vmatprep.subr.bf16.mxu0 %v5813_v7 }
 0x6fb   :  { %v2282_v27 = vpop.f32.mrb[68].mxu1  ;;  %v2323_v32 = vpop.f32.mrb[60].mxu0 }
 0x6fc   :  { %v2329_v9 = vadd.f32 %v2282_v27, %v5902_v5  ;;  %v2284_v10 = vpop.f32.mrb[69].mxu1  ;;  %v3527_v33 = vpop.f32.mrb[61].mxu0  ;;  %v2343_v4 = vadd.f32 %v5426_v28, %v2323_v32 }
 0x6fd   :  { %v2336_v2 = vadd.f32 %v2284_v10, %v5903_v40  ;;  %v2286_v30 = vpop.f32.mrb[70].mxu1  ;;  %v2326_v3 = vpop.f32.mrb[62].mxu0 }
 0x6fe   :  { %v3117_v1 = vmul.f32 -1.442695, %v2329_v9  ;;  %v2287_v37 = vpop.f32.mrb[71].mxu1  ;;  %v3528_v43 = vpop.f32.mrb[63].mxu0 }
 0x6ff   :  { %v3118_v29 = vmul.f32 -1.442695, %v2336_v2  ;;  %v5908_v43 = vld [vmem:[#allocation83_spill] sm:$0xff] }
 0x700   :  { %3840 = vpow2.f32 %v3117_v1  ;;  %v5907_v1 = vld [vmem:[#allocation51_spill] sm:$0xff] }
 0x701   :  { %3842 = vpow2.f32 %v3118_v29  ;;  %v2461_v29 = vmul.f32 %v5437_v26, %v5908_v43 }
 0x70a   :  { %v3841_v31 = vpop.eup %3840 }
 0x70b   :  { %v2333_v47 = vadd.f32 1.0, %v3841_v31  ;;  %v3843_v55 = vpop.eup %3842 }
 0x70c   :  { %v2340_v23 = vadd.f32 1.0, %v3843_v55 }
 0x70d   :  { %3844 = vrcp.f32 %v2333_v47 }
 0x70e   :  { %3846 = vrcp.f32 %v2340_v23 }
 0x717   :  { %v3845_v50 = vpop.eup %3844 }
 0x718   :  { %v2344_v49 = vmul.f32 %v3845_v50, %v2343_v4  ;;  %v3847_v32 = vpop.eup %3846  ;;  %v5909_v4 = vld [vmem:[#allocation84_spill] sm:$0xff] }
 0x719   :  { %v2347_v9 = vsub.f32 1.0, %v3847_v32  ;;  %v2349_v40 = vmul.f32 %v3847_v32, %v5437_v26  ;;  %v3971_v32 = vld [vmem:[#allocation16 + $0xac] ss:$12 sps:$4 sm:$0xff]  }
 0x71a   :  { %v2345_v13 = vadd.f32 %v2344_v49, %v5904_v11 }
 0x71b   :  { %v2386_v14 = vpop.f32.mrb[72].mxu1  ;;  %v2427_v15 = vpop.f32.mrb[64].mxu0 }
 0x71c   :  { %3848 = vtanh.f32 %v2345_v13  ;;  %v2433_v34 = vadd.f32 %v2386_v14, %v5905_v16  ;;  %v2388_v38 = vpop.f32.mrb[73].mxu1  ;;  %v3547_v39 = vpop.f32.mrb[65].mxu0  ;;  %v2447_v49 = vadd.f32 %v5449_v61, %v2427_v15  ;;  %v3957_v13 = vld [vmem:[#allocation16 + $0x30] ss:$12 sps:$4 sm:$0xff]   ;;  %v3958_v14 = vld [vmem:[#allocation16 + $0x38] ss:$12 sps:$4 sm:$0xff]  }
 0x71d   :  { %v2440_v24 = vadd.f32 %v2388_v38, %v5906_v35  ;;  %v2390_v25 = vpop.f32.mrb[74].mxu1  ;;  %v2430_v44 = vpop.f32.mrb[66].mxu0  ;;  %v3959_v15 = vld [vmem:[#allocation16 + $0x4c] ss:$12 sps:$4 sm:$0xff]   ;;  %v3960_v16 = vld [vmem:[#allocation16 + $0x48] ss:$12 sps:$4 sm:$0xff]  }
 0x71e   :  { %v3119_v18 = vmul.f32 -1.442695, %v2433_v34  ;;  %v2391_v12 = vpop.f32.mrb[75].mxu1  ;;  %v3548_v27 = vpop.f32.mrb[67].mxu0  ;;  %v3961_v34 = vld [vmem:[#allocation16 + $0x50] ss:$12 sps:$4 sm:$0xff]  }
 0x71f   :  { %v3120_v5 = vmul.f32 -1.442695, %v2440_v24  ;;  %v3962_v38 = vld [vmem:[#allocation16 + $0x64] ss:$12 sps:$4 sm:$0xff]   ;;  %v3963_v39 = vld [vmem:[#allocation16 + $0x60] ss:$12 sps:$4 sm:$0xff]  }
 0x720   :  { %3850 = vpow2.f32 %v3119_v18  ;;  %v3964_v35 = vld [vmem:[#allocation16 + $0x68] ss:$12 sps:$4 sm:$0xff]   ;;  %v3966_v25 = vld [vmem:[#allocation16 + $0x78] ss:$12 sps:$4 sm:$0xff]   ;;  %v3967_v44 = vld [vmem:[#allocation16 + $0x80] ss:$12 sps:$4 sm:$0xff]  }
 0x721   :  { %3852 = vpow2.f32 %v3120_v5  ;;  %v3965_v24 = vld [vmem:[#allocation16 + $0x7c] ss:$12 sps:$4 sm:$0xff]   ;;  %v3968_v18 = vld [vmem:[#allocation16 + $0x94] ss:$12 sps:$4 sm:$0xff]   ;;  %v3970_v27 = vld [vmem:[#allocation16 + $0x98] ss:$12 sps:$4 sm:$0xff]  }
 0x722   :  { %v3969_v12 = vld [vmem:[#allocation16 + $0x90] ss:$12 sps:$4 sm:$0xff]   ;;  %v3972_v5 = vld [vmem:[#allocation16 + $0xa8] ss:$12 sps:$4 sm:$0xff]  }
 0x726   :  { %v3849_v10 = vpop.eup %3848 }
 0x727   :  { %v2348_v33 = vmul.f32 %v3849_v10, %v2347_v9  ;;  %v3973_v9 = vld [vmem:[#allocation16 + $0xb0] ss:$12 sps:$4 sm:$0xff]  }
 0x728   :  { %v3974_v10 = vld [vmem:[#allocation17 + $0x4] ss:$12 sps:$4 sm:$0xff]  }
 0x729   :  { %v2350_v2 = vadd.f32 %v2349_v40, %v2348_v33 }
 0x72a   :  { %v3851_v30 = vpop.eup %3850 }
 0x72b   :  { %v2437_v3 = vadd.f32 1.0, %v3851_v30  ;;  %v2455_v37 = vmul.f32 %v2350_v2, %v5907_v1  ;;  %v3853_v55 = vpop.eup %3852  ;;  %v5913_v2 = vld [vmem:[#allocation45_spill] sm:$0xff] }
 0x72c   :  { %v2444_v26 = vadd.f32 1.0, %v3853_v55 }
 0x72d   :  { %3854 = vrcp.f32 %v2437_v3  ;;  %2458 = vst.msk [vmem:[#allocation22 + $0x28] sm:$0xff] %vm251_vm0, %v2455_v37  ;;  %v5537_v31 = vadd.f32 %v2461_v29, %v2455_v37  ;;  %v5914_v37 = vld [vmem:[#allocation46_spill] sm:$0xff] }
 0x72e   :  { %3856 = vrcp.f32 %v2444_v26 }
 0x72f   :  { %v2475_v47 = vpack.c.bf16 %v5537_v31, %v5537_v31 }
 0x731   :  { %2509 = vmatmul.mubr.bf16.vlgmr.msra.gmra.mrb[76].mxu1 %v2475_v47  ;;  %3566 = vmatmul.mubr.bf16.vlgmr.msra.gmra.mrb[68].mxu0 %v2475_v47 }
 0x732   :  { %2581 = vmatpush1.bf16.msra.mxu1 %v5185_v21  ;;  %3570 = vmatpush3.bf16.msra.mxu0 %v5188_v36 }
 0x733   :  { %2582 = vmatprep.subr.bf16.mxu1 %v5191_v19  ;;  %3571 = vmatprep.subr.bf16.mxu0 %v5813_v7  ;;  %v5910_v19 = vld [vmem:[#allocation67_spill] sm:$0xff] }
 0x734   :  { %v2928_v23 = vld [vmem:[#allocation22 + $0x28] sm:$0xff]  ;;  %2612 = vmatprep.mubr.bf16.mxu1 %v5814_v0  ;;  %3585 = vmatprep.mubr.msk.bf16.mxu0 %vm4294_vm1, %v5813_v7 }
 0x735   :  { %v2944_v50 = vadd.f32 %v2928_v23, %v5909_v4 }
 0x736   :  { %2583 = vmatpush1.bf16.msra.mxu1 %v5199_v51  ;;  %3572 = vmatpush3.bf16.msra.mxu0 %v5202_v52 }
 0x737   :  { %v3855_v21 = vpop.eup %3854  ;;  %2952 = vst.msk [vmem:[#allocation22 + $0x28] sm:$0xff] %vm251_vm0, %v2944_v50  ;;  %2584 = vmatprep.subr.bf16.mxu1 %v5205_v53  ;;  %3573 = vmatprep.subr.bf16.mxu0 %v5813_v7 }
 0x738   :  { %v2448_v36 = vmul.f32 %v3855_v21, %v2447_v49  ;;  %v3857_v51 = vpop.eup %3856 }
 0x739   :  { %v2451_v52 = vsub.f32 1.0, %v3857_v51 }
 0x73a   :  { %v2449_v11 = vadd.f32 %v2448_v36, %v5910_v19  ;;  %2585 = vmatpush1.bf16.msra.mxu1 %v5210_v60  ;;  %3574 = vmatpush3.bf16.msra.mxu0 %v5213_v59  ;;  %v2453_v59 = vmul.f32 %v3857_v51, %v5482_v42 }
 0x73b   :  { %2586 = vmatprep.subr.bf16.mxu1 %v5216_v62  ;;  %3575 = vmatprep.subr.bf16.mxu0 %v5813_v7 }
 0x73c   :  { %3858 = vtanh.f32 %v2449_v11 }
 0x73e   :  { %2587 = vmatpush1.bf16.msra.mxu1 %v5220_v63  ;;  %3576 = vmatpush3.bf16.msra.mxu0 %v5223_v48  ;;  %v5911_v63 = vld [vmem:[#allocation52_spill] sm:$0xff] }
 0x73f   :  { %2588 = vmatprep.subr.bf16.mxu1 %v5226_v45  ;;  %3577 = vmatprep.subr.bf16.mxu0 %v5813_v7  ;;  %v5912_v45 = vld [vmem:[#allocation53_spill] sm:$0xff] }
 0x742   :  { %2589 = vmatpush1.bf16.msra.mxu1 %v5230_v17  ;;  %3578 = vmatpush3.bf16.msra.mxu0 %v5233_v20  ;;  %v2463_v17 = vmul.f32 %v5482_v42, %v5912_v45  ;;  %v2925_v20 = vld [vmem:[#allocation22 + $0x10] sm:$0xff] }
 0x743   :  { %2590 = vmatprep.subr.bf16.mxu1 %v5236_v22  ;;  %3579 = vmatprep.subr.bf16.mxu0 %v5813_v7  ;;  %v3956_v42 = vld [vmem:[#allocation16 + $0x34] ss:$12 sps:$4 sm:$0xff]  }
 0x746   :  { %v3859_v53 = vpop.eup %3858  ;;  %2591 = vmatpush1.bf16.msra.mxu1 %v5240_v54  ;;  %3580 = vmatpush3.bf16.msra.mxu0 %v5243_v57  ;;  %v3951_v54 = vld [vmem:[#allocation16] ss:$12 sps:$4 sm:$0xff]   ;;  %v3952_v57 = vld [vmem:[#allocation16 + $0x8] ss:$12 sps:$4 sm:$0xff]  }
 0x747   :  { %v2452_v60 = vmul.f32 %v3859_v53, %v2451_v52  ;;  %2592 = vmatprep.subr.bf16.mxu1 %v5247_v56  ;;  %3581 = vmatprep.subr.bf16.mxu0 %v5813_v7  ;;  %v5915_v52 = vld [vmem:[#allocation58_spill] sm:$0xff] }
 0x749   :  { %v2454_v62 = vadd.f32 %v2453_v59, %v2452_v60 }
 0x74a   :  { %2593 = vmatpush1.bf16.msra.mxu1 %v5255_v41  ;;  %3582 = vmatpush3.bf16.msra.mxu0 %v5258_v46  ;;  %v3950_v46 = vld [vmem:[#allocation16 + $0x4] ss:$12 sps:$4 sm:$0xff]  }
 0x74b   :  { %2594 = vmatprep.subr.bf16.mxu1 %v5261_v8  ;;  %3583 = vmatprep.subr.bf16.mxu0 %v5813_v7  ;;  %v2456_v48 = vmul.f32 %v2454_v62, %v5911_v63  ;;  %v3953_v8 = vld [vmem:[#allocation16 + $0x1c] ss:$12 sps:$4 sm:$0xff]  }
 0x74c   :  { %v5916_v62 = vld [vmem:[#allocation70_spill] sm:$0xff] }
 0x74d   :  { %v5580_v22 = vadd.f32 %v2463_v17, %v2456_v48  ;;  %v2941_v56 = vadd.f32 %v2925_v20, %v2456_v48  ;;  %v5917_v17 = vld [vmem:[#allocation72_spill] sm:$0xff] }
 0x74e   :  { %2595 = vmatpush1.bf16.msra.mxu1 %v5273_v58  ;;  %3584 = vmatpush3.bf16.msra.mxu0 %v5276_v6  ;;  %v3954_v6 = vld [vmem:[#allocation16 + $0x18] ss:$12 sps:$4 sm:$0xff]   ;;  %v3955_v58 = vld [vmem:[#allocation16 + $0x20] ss:$12 sps:$4 sm:$0xff]  }
 0x74f   :  { %v2579_v41 = vpack.c.bf16 %v5580_v22, %v5580_v22  ;;  %2949 = vst.msk [vmem:[#allocation22 + $0x10] sm:$0xff] %vm251_vm0, %v2941_v56  ;;  %2704 = vmatprep.subr.bf16.mxu1 %v3950_v46  ;;  %3589 = vmatprep.subr.bf16.mxu0 %v5813_v7 }
 0x751   :  { %2613 = vmatmul.mubr.bf16.vlgmr.msra.gmra.mrb[80].mxu1 %v2579_v41  ;;  %3586 = vmatmul.mubr.bf16.vlgmr.msra.gmra.mrb[72].mxu0 %v2579_v41 }
 0x752   :  { %2705 = vmatpush1.bf16.msra.mxu1 %v3951_v54  ;;  %3590 = vmatpush3.bf16.msra.mxu0 %v3952_v57 }
 0x753   :  { %2706 = vmatprep.subr.bf16.mxu1 %v3953_v8  ;;  %3591 = vmatprep.subr.bf16.mxu0 %v5813_v7 }
 0x754   :  { %2736 = vmatprep.mubr.bf16.mxu1 %v5814_v0  ;;  %3605 = vmatprep.mubr.msk.bf16.mxu0 %vm4294_vm1, %v5813_v7 }
 0x756   :  { %2707 = vmatpush1.bf16.msra.mxu1 %v3954_v6  ;;  %3592 = vmatpush3.bf16.msra.mxu0 %v3955_v58 }
 0x757   :  { %2708 = vmatprep.subr.bf16.mxu1 %v3956_v42  ;;  %3593 = vmatprep.subr.bf16.mxu0 %v5813_v7 }
 0x75a   :  { %2709 = vmatpush1.bf16.msra.mxu1 %v3957_v13  ;;  %3594 = vmatpush3.bf16.msra.mxu0 %v3958_v14 }
 0x75b   :  { %2710 = vmatprep.subr.bf16.mxu1 %v3959_v15  ;;  %3595 = vmatprep.subr.bf16.mxu0 %v5813_v7 }
 0x75e   :  { %2711 = vmatpush1.bf16.msra.mxu1 %v3960_v16  ;;  %3596 = vmatpush3.bf16.msra.mxu0 %v3961_v34 }
 0x75f   :  { %2712 = vmatprep.subr.bf16.mxu1 %v3962_v38  ;;  %3597 = vmatprep.subr.bf16.mxu0 %v5813_v7  ;;  %v5918_v38 = vld [vmem:[#allocation34_spill] sm:$0xff] }
 0x762   :  { %2713 = vmatpush1.bf16.msra.mxu1 %v3963_v39  ;;  %3598 = vmatpush3.bf16.msra.mxu0 %v3964_v35  ;;  %v5919_v35 = vld [vmem:[#allocation36_spill] sm:$0xff] }
 0x763   :  { %2714 = vmatprep.subr.bf16.mxu1 %v3965_v24  ;;  %3599 = vmatprep.subr.bf16.mxu0 %v5813_v7  ;;  %v2689_v24 = vmul.f32 %v5537_v31, %v5919_v35 }
 0x766   :  { %2715 = vmatpush1.bf16.msra.mxu1 %v3966_v25  ;;  %3600 = vmatpush3.bf16.msra.mxu0 %v3967_v44 }
 0x767   :  { %2716 = vmatprep.subr.bf16.mxu1 %v3968_v18  ;;  %3601 = vmatprep.subr.bf16.mxu0 %v5813_v7 }
 0x76a   :  { %2717 = vmatpush1.bf16.msra.mxu1 %v3969_v12  ;;  %3602 = vmatpush3.bf16.msra.mxu0 %v3970_v27  ;;  %v3975_v12 = vld [vmem:[#allocation17] ss:$12 sps:$4 sm:$0xff]   ;;  %v3976_v27 = vld [vmem:[#allocation17 + $0x8] ss:$12 sps:$4 sm:$0xff]  }
 0x76b   :  { %2718 = vmatprep.subr.bf16.mxu1 %v3971_v32  ;;  %3603 = vmatprep.subr.bf16.mxu0 %v5813_v7  ;;  %v3977_v32 = vld [vmem:[#allocation17 + $0x1c] ss:$12 sps:$4 sm:$0xff]  }
 0x76e   :  { %2719 = vmatpush1.bf16.msra.mxu1 %v3972_v5  ;;  %3604 = vmatpush3.bf16.msra.mxu0 %v3973_v9  ;;  %v5920_v9 = vld [vmem:[#allocation38_spill] sm:$0xff] }
 0x76f   :  { %2808 = vmatprep.subr.bf16.mxu1 %v3974_v10  ;;  %3609 = vmatprep.subr.bf16.mxu0 %v5813_v7 }
 0x804   :  { %v2510_v33 = vpop.f32.mrb[76].mxu1  ;;  %v2551_v40 = vpop.f32.mrb[68].mxu0 }
 0x805   :  { %v2557_v30 = vadd.f32 %v2510_v33, %v5913_v2  ;;  %v2512_v3 = vpop.f32.mrb[77].mxu1  ;;  %v3567_v1 = vpop.f32.mrb[69].mxu0  ;;  %v2571_v19 = vadd.f32 %v5426_v28, %v2551_v40  ;;  %v3978_v40 = vld [vmem:[#allocation17 + $0x18] ss:$12 sps:$4 sm:$0xff]   ;;  %v3979_v2 = vld [vmem:[#allocation17 + $0x20] ss:$12 sps:$4 sm:$0xff]  }
 0x806   :  { %v2564_v43 = vadd.f32 %v2512_v3, %v5914_v37  ;;  %v2514_v29 = vpop.f32.mrb[78].mxu1  ;;  %v2554_v47 = vpop.f32.mrb[70].mxu0  ;;  %v3980_v3 = vld [vmem:[#allocation17 + $0x34] ss:$12 sps:$4 sm:$0xff]  }
 0x807   :  { %v3121_v55 = vmul.f32 -1.442695, %v2557_v30  ;;  %v2515_v26 = vpop.f32.mrb[79].mxu1  ;;  %v3568_v23 = vpop.f32.mrb[71].mxu0  ;;  %v3982_v29 = vld [vmem:[#allocation17 + $0x38] ss:$12 sps:$4 sm:$0xff]  }
 0x808   :  { %v3122_v4 = vmul.f32 -1.442695, %v2564_v43  ;;  %v3981_v43 = vld [vmem:[#allocation17 + $0x30] ss:$12 sps:$4 sm:$0xff]   ;;  %v3983_v47 = vld [vmem:[#allocation17 + $0x4c] ss:$12 sps:$4 sm:$0xff]  }
 0x809   :  { %3860 = vpow2.f32 %v3121_v55  ;;  %v3984_v55 = vld [vmem:[#allocation17 + $0x48] ss:$12 sps:$4 sm:$0xff]   ;;  %v3985_v26 = vld [vmem:[#allocation17 + $0x50] ss:$12 sps:$4 sm:$0xff]  }
 0x80a   :  { %3862 = vpow2.f32 %v3122_v4  ;;  %v3986_v23 = vld [vmem:[#allocation17 + $0x64] ss:$12 sps:$4 sm:$0xff]  }
 0x813   :  { %v3861_v50 = vpop.eup %3860 }
 0x814   :  { %v2561_v49 = vadd.f32 1.0, %v3861_v50  ;;  %v3863_v21 = vpop.eup %3862  ;;  %v3987_v50 = vld [vmem:[#allocation17 + $0x60] ss:$12 sps:$4 sm:$0xff]  }
 0x815   :  { %v2568_v36 = vadd.f32 1.0, %v3863_v21  ;;  %v3989_v21 = vld [vmem:[#allocation17 + $0x7c] ss:$12 sps:$4 sm:$0xff]  }
 0x816   :  { %3864 = vrcp.f32 %v2561_v49  ;;  %v3988_v49 = vld [vmem:[#allocation17 + $0x68] ss:$12 sps:$4 sm:$0xff]  }
 0x817   :  { %3866 = vrcp.f32 %v2568_v36 }
 0x820   :  { %v3865_v11 = vpop.eup %3864 }
 0x821   :  { %v2572_v51 = vmul.f32 %v3865_v11, %v2571_v19  ;;  %v3867_v8 = vpop.eup %3866  ;;  %v3990_v11 = vld [vmem:[#allocation17 + $0x78] ss:$12 sps:$4 sm:$0xff]  }
 0x822   :  { %v2575_v58 = vsub.f32 1.0, %v3867_v8  ;;  %v2577_v14 = vmul.f32 %v3867_v8, %v5537_v31  ;;  %v3997_v8 = vld [vmem:[#allocation17 + $0xb0] ss:$12 sps:$4 sm:$0xff]  }
 0x823   :  { %v2573_v53 = vadd.f32 %v2572_v51, %v5915_v52  ;;  %v3991_v51 = vld [vmem:[#allocation17 + $0x80] ss:$12 sps:$4 sm:$0xff]  }
 0x824   :  { %v2614_v60 = vpop.f32.mrb[80].mxu1  ;;  %v2655_v59 = vpop.f32.mrb[72].mxu0 }
 0x825   :  { %3868 = vtanh.f32 %v2573_v53  ;;  %v2661_v63 = vadd.f32 %v2614_v60, %v5916_v62  ;;  %v2616_v48 = vpop.f32.mrb[81].mxu1  ;;  %v3587_v45 = vpop.f32.mrb[73].mxu0  ;;  %v2675_v33 = vadd.f32 %v5449_v61, %v2655_v59  ;;  %v3992_v60 = vld [vmem:[#allocation17 + $0x94] ss:$12 sps:$4 sm:$0xff]   ;;  %v3993_v62 = vld [vmem:[#allocation17 + $0x90] ss:$12 sps:$4 sm:$0xff]  }
 0x826   :  { %v2668_v20 = vadd.f32 %v2616_v48, %v5917_v17  ;;  %v2618_v56 = vpop.f32.mrb[82].mxu1  ;;  %v2658_v41 = vpop.f32.mrb[74].mxu0  ;;  %v3995_v48 = vld [vmem:[#allocation17 + $0xac] ss:$12 sps:$4 sm:$0xff]   ;;  %v5922_v45 = vld [vmem:[#allocation35_spill] sm:$0xff] }
 0x827   :  { %v3123_v46 = vmul.f32 -1.442695, %v2661_v63  ;;  %v2619_v54 = vpop.f32.mrb[83].mxu1  ;;  %v3588_v57 = vpop.f32.mrb[75].mxu0  ;;  %v3994_v63 = vld [vmem:[#allocation17 + $0x98] ss:$12 sps:$4 sm:$0xff]  }
 0x828   :  { %v3124_v6 = vmul.f32 -1.442695, %v2668_v20  ;;  %v5923_v20 = vld [vmem:[#allocation33_spill] sm:$0xff]  ;;  %v2924_v41 = vld [vmem:[#allocation22 + $0x8] sm:$0xff] }
 0x829   :  { %3870 = vpow2.f32 %v3123_v46  ;;  %v2691_v56 = vmul.f32 %v5580_v22, %v5923_v20  ;;  %v3996_v57 = vld [vmem:[#allocation17 + $0xa8] ss:$12 sps:$4 sm:$0xff]  }
 0x82a   :  { %3872 = vpow2.f32 %v3124_v6 }
 0x82f   :  { %v3869_v42 = vpop.eup %3868 }
 0x830   :  { %v2576_v13 = vmul.f32 %v3869_v42, %v2575_v58  ;;  %v5924_v42 = vld [vmem:[#allocation47_spill] sm:$0xff] }
 0x832   :  { %v2578_v15 = vadd.f32 %v2577_v14, %v2576_v13 }
 0x833   :  { %v3871_v16 = vpop.eup %3870 }
 0x834   :  { %v2665_v34 = vadd.f32 1.0, %v3871_v16  ;;  %v2683_v39 = vmul.f32 %v2578_v15, %v5918_v38  ;;  %v3873_v18 = vpop.eup %3872  ;;  %v5925_v15 = vld [vmem:[#allocation49_spill] sm:$0xff] }
 0x835   :  { %v2672_v31 = vadd.f32 1.0, %v3873_v18 }
 0x836   :  { %3874 = vrcp.f32 %v2665_v34  ;;  %2686 = vst.msk [vmem:[#allocation22 + $0x30] sm:$0xff] %vm251_vm0, %v2683_v39  ;;  %v5610_v25 = vadd.f32 %v2689_v24, %v2683_v39 }
 0x837   :  { %3876 = vrcp.f32 %v2672_v31 }
 0x838   :  { %v2703_v44 = vpack.c.bf16 %v5610_v25, %v5610_v25 }
 0x83a   :  { %2737 = vmatmul.mubr.bf16.vlgmr.msra.gmra.mrb[84].mxu1 %v2703_v44  ;;  %3606 = vmatmul.mubr.bf16.vlgmr.msra.gmra.mrb[76].mxu0 %v2703_v44 }
 0x83b   :  { %2809 = vmatpush1.bf16.msra.mxu1 %v3975_v12  ;;  %3610 = vmatpush3.bf16.msra.mxu0 %v3976_v27 }
 0x83c   :  { %2810 = vmatprep.subr.bf16.mxu1 %v3977_v32  ;;  %3611 = vmatprep.subr.bf16.mxu0 %v5813_v7 }
 0x83d   :  { %v2929_v5 = vld [vmem:[#allocation22 + $0x30] sm:$0xff]  ;;  %2840 = vmatprep.mubr.bf16.mxu1 %v5814_v0  ;;  %3625 = vmatprep.mubr.msk.bf16.mxu0 %vm4294_vm1, %v5813_v7 }
 0x83e   :  { %v2945_v10 = vadd.f32 %v2929_v5, %v5920_v9  ;;  %v5921_v0 = vld [vmem:[#allocation73_spill] sm:$0xff] }
 0x83f   :  { %2811 = vmatpush1.bf16.msra.mxu1 %v3978_v40  ;;  %3612 = vmatpush3.bf16.msra.mxu0 %v3979_v2 }
 0x840   :  { %v3875_v30 = vpop.eup %3874  ;;  %2953 = vst.msk [vmem:[#allocation22 + $0x30] sm:$0xff] %vm251_vm0, %v2945_v10  ;;  %2812 = vmatprep.subr.bf16.mxu1 %v3980_v3  ;;  %3613 = vmatprep.subr.bf16.mxu0 %v5813_v7  ;;  %v5926_v10 = vld [vmem:[#allocation62_spill] sm:$0xff] }
 0x841   :  { %v2676_v1 = vmul.f32 %v3875_v30, %v2675_v33  ;;  %v3877_v4 = vpop.eup %3876  ;;  %v5927_v30 = vld [vmem:[#allocation66_spill] sm:$0xff] }
 0x842   :  { %v2679_v36 = vsub.f32 1.0, %v3877_v4  ;;  %v2681_v53 = vmul.f32 %v3877_v4, %v5580_v22 }
 0x843   :  { %v2677_v37 = vadd.f32 %v2676_v1, %v5921_v0  ;;  %2813 = vmatpush1.bf16.msra.mxu1 %v3981_v43  ;;  %3614 = vmatpush3.bf16.msra.mxu0 %v3982_v29 }
 0x844   :  { %2814 = vmatprep.subr.bf16.mxu1 %v3983_v47  ;;  %3615 = vmatprep.subr.bf16.mxu0 %v5813_v7 }
 0x845   :  { %3878 = vtanh.f32 %v2677_v37  ;;  %v5928_v37 = vld [vmem:[#allocation68_spill] sm:$0xff] }
 0x847   :  { %2815 = vmatpush1.bf16.msra.mxu1 %v3984_v55  ;;  %3616 = vmatpush3.bf16.msra.mxu0 %v3985_v26 }
 0x848   :  { %2816 = vmatprep.subr.bf16.mxu1 %v3986_v23  ;;  %3617 = vmatprep.subr.bf16.mxu0 %v5813_v7 }
 0x84b   :  { %2817 = vmatpush1.bf16.msra.mxu1 %v3987_v50  ;;  %3618 = vmatpush3.bf16.msra.mxu0 %v3988_v49 }
 0x84c   :  { %2818 = vmatprep.subr.bf16.mxu1 %v3989_v21  ;;  %3619 = vmatprep.subr.bf16.mxu0 %v5813_v7 }
 0x84f   :  { %v3879_v19 = vpop.eup %3878  ;;  %2819 = vmatpush1.bf16.msra.mxu1 %v3990_v11  ;;  %3620 = vmatpush3.bf16.msra.mxu0 %v3991_v51  ;;  %v5929_v51 = vld [vmem:[#allocation89_spill] sm:$0xff] }
 0x850   :  { %v2680_v52 = vmul.f32 %v3879_v19, %v2679_v36  ;;  %2820 = vmatprep.subr.bf16.mxu1 %v3992_v60  ;;  %3621 = vmatprep.subr.bf16.mxu0 %v5813_v7  ;;  %v5930_v60 = vld [vmem:[#allocation90_spill] sm:$0xff] }
 0x852   :  { %v2682_v59 = vadd.f32 %v2681_v53, %v2680_v52 }
 0x853   :  { %2821 = vmatpush1.bf16.msra.mxu1 %v3993_v62  ;;  %3622 = vmatpush3.bf16.msra.mxu0 %v3994_v63 }
 0x854   :  { %2822 = vmatprep.subr.bf16.mxu1 %v3995_v48  ;;  %3623 = vmatprep.subr.bf16.mxu0 %v5813_v7  ;;  %v2684_v17 = vmul.f32 %v2682_v59, %v5922_v45  ;;  %v2916_v59 = vmul.f32 %v5610_v25, %v5930_v60 }
 0x856   :  { %v5632_v46 = vadd.f32 %v2691_v56, %v2684_v17  ;;  %v2940_v54 = vadd.f32 %v2924_v41, %v2684_v17  ;;  %v5931_v17 = vld [vmem:[#allocation91_spill] sm:$0xff] }
 0x857   :  { %2823 = vmatpush1.bf16.msra.mxu1 %v3996_v57  ;;  %3624 = vmatpush3.bf16.msra.mxu0 %v3997_v8  ;;  %v5932_v57 = vld [vmem:[#allocation69_spill] sm:$0xff] }
 0x858   :  { %v2807_v6 = vpack.c.bf16 %v5632_v46, %v5632_v46  ;;  %2948 = vst.msk [vmem:[#allocation22 + $0x8] sm:$0xff] %vm251_vm0, %v2940_v54 }
 0x85a   :  { %2841 = vmatmul.mubr.bf16.vlgmr.msra.gmra.mrb[88].mxu1 %v2807_v6  ;;  %3626 = vmatmul.mubr.bf16.vlgmr.msra.gmra.mrb[80].mxu0 %v2807_v6 }
 0x90d   :  { %v2738_v7 = vpop.f32.mrb[84].mxu1  ;;  %v2779_v58 = vpop.f32.mrb[76].mxu0 }
 0x90e   :  { %v2785_v13 = vadd.f32 %v2738_v7, %v5924_v42  ;;  %v2740_v22 = vpop.f32.mrb[85].mxu1  ;;  %v3607_v14 = vpop.f32.mrb[77].mxu0  ;;  %v2799_v31 = vadd.f32 %v5426_v28, %v2779_v58 }
 0x90f   :  { %v2792_v16 = vadd.f32 %v2740_v22, %v5925_v15  ;;  %v2742_v34 = vpop.f32.mrb[86].mxu1  ;;  %v2782_v38 = vpop.f32.mrb[78].mxu0  ;;  %v5933_v22 = vld [vmem:[#allocation87_spill] sm:$0xff] }
 0x910   :  { %v3125_v39 = vmul.f32 -1.442695, %v2785_v13  ;;  %v2743_v35 = vpop.f32.mrb[87].mxu1  ;;  %v3608_v24 = vpop.f32.mrb[79].mxu0 }
 0x911   :  { %v3126_v44 = vmul.f32 -1.442695, %v2792_v16  ;;  %v2923_v16 = vld [vmem:[#allocation22] sm:$0xff] }
 0x912   :  { %3880 = vpow2.f32 %v3125_v39 }
 0x913   :  { %3882 = vpow2.f32 %v3126_v44 }
 0x91c   :  { %v3881_v18 = vpop.eup %3880 }
 0x91d   :  { %v2789_v12 = vadd.f32 1.0, %v3881_v18  ;;  %v3883_v27 = vpop.eup %3882 }
 0x91e   :  { %v2796_v32 = vadd.f32 1.0, %v3883_v27 }
 0x91f   :  { %3884 = vrcp.f32 %v2789_v12 }
 0x920   :  { %3886 = vrcp.f32 %v2796_v32 }
 0x929   :  { %v3885_v5 = vpop.eup %3884 }
 0x92a   :  { %v2800_v9 = vmul.f32 %v3885_v5, %v2799_v31  ;;  %v3887_v28 = vpop.eup %3886 }
 0x92b   :  { %v2803_v50 = vsub.f32 1.0, %v3887_v28  ;;  %v2805_v36 = vmul.f32 %v3887_v28, %v5610_v25 }
 0x92c   :  { %v2801_v33 = vadd.f32 %v2800_v9, %v5926_v10 }
 0x92d   :  { %v2842_v40 = vpop.f32.mrb[88].mxu1  ;;  %v2883_v2 = vpop.f32.mrb[80].mxu0 }
 0x92e   :  { %3888 = vtanh.f32 %v2801_v33  ;;  %v2889_v3 = vadd.f32 %v2842_v40, %v5927_v30  ;;  %v2844_v1 = vpop.f32.mrb[89].mxu1  ;;  %v3627_v0 = vpop.f32.mrb[81].mxu0  ;;  %v2903_v56 = vadd.f32 %v5449_v61, %v2883_v2  ;;  %v5934_v61 = vld [vmem:[#allocation88_spill] sm:$0xff] }
 0x92f   :  { %v2896_v43 = vadd.f32 %v2844_v1, %v5928_v37  ;;  %v2846_v29 = vpop.f32.mrb[90].mxu1  ;;  %v2886_v47 = vpop.f32.mrb[82].mxu0  ;;  %v2918_v15 = vmul.f32 %v5632_v46, %v5934_v61 }
 0x930   :  { %v3127_v55 = vmul.f32 -1.442695, %v2889_v3  ;;  %v2847_v26 = vpop.f32.mrb[91].mxu1  ;;  %v3628_v23 = vpop.f32.mrb[83].mxu0 }
 0x931   :  { %v3128_v4 = vmul.f32 -1.442695, %v2896_v43 }
 0x932   :  { %3890 = vpow2.f32 %v3127_v55 }
 0x933   :  { %3892 = vpow2.f32 %v3128_v4 }
 0x938   :  { %v3889_v49 = vpop.eup %3888 }
 0x939   :  { %v2804_v21 = vmul.f32 %v3889_v49, %v2803_v50 }
 0x93b   :  { %v2806_v19 = vadd.f32 %v2805_v36, %v2804_v21 }
 0x93c   :  { %v3891_v11 = vpop.eup %3890 }
 0x93d   :  { %v2911_v52 = vmul.f32 %v2806_v19, %v5929_v51  ;;  %v2893_v53 = vadd.f32 1.0, %v3891_v11  ;;  %v3893_v63 = vpop.eup %3892 }
 0x93e   :  { %v2900_v45 = vadd.f32 1.0, %v3893_v63 }
 0x93f   :  { %2914 = vst.msk [vmem:[#allocation22 + $0x38] sm:$0xff] %vm251_vm0, %v2911_v52  ;;  %3894 = vrcp.f32 %v2893_v53  ;;  %v2917_v62 = vadd.f32 %v2916_v59, %v2911_v52 }
 0x940   :  { %3896 = vrcp.f32 %v2900_v45 }
 0x941   :  { %2920 = vst.msk [vmem:[#allocation23] sm:$0xff] %vm251_vm0, %v2917_v62 }
 0x946   :  { %v2930_v48 = vld [vmem:[#allocation22 + $0x38] sm:$0xff] }
 0x947   :  { %v2946_v20 = vadd.f32 %v2930_v48, %v5931_v17 }
 0x949   :  { %v3895_v41 = vpop.eup %3894  ;;  %2954 = vst.msk [vmem:[#allocation22 + $0x38] sm:$0xff] %vm251_vm0, %v2946_v20 }
 0x94a   :  { %v2904_v54 = vmul.f32 %v3895_v41, %v2903_v56  ;;  %v3897_v8 = vpop.eup %3896 }
 0x94b   :  { %v2907_v6 = vsub.f32 1.0, %v3897_v8  ;;  %v2909_v42 = vmul.f32 %v3897_v8, %v5632_v46 }
 0x94c   :  { %v2905_v25 = vadd.f32 %v2904_v54, %v5932_v57 }
 0x94e   :  { %3898 = vtanh.f32 %v2905_v25 }
 0x958   :  { %v3899_v7 = vpop.eup %3898 }
 0x959   :  { %v2908_v58 = vmul.f32 %v3899_v7, %v2907_v6 }
 0x95b   :  { %v2910_v13 = vadd.f32 %v2909_v42, %v2908_v58 }
 0x95d   :  { %v2912_v14 = vmul.f32 %v2910_v13, %v5933_v22 }
 0x95f   :  { %v2939_v34 = vadd.f32 %v2923_v16, %v2912_v14  ;;  %v2919_v38 = vadd.f32 %v2918_v15, %v2912_v14 }
 0x961   :  { %2947 = vst.msk [vmem:[#allocation22] sm:$0xff] %vm251_vm0, %v2939_v34  ;;  %2922 = vst.msk [vmem:[#allocation23 + $0x8] sm:$0xff] %vm251_vm0, %v2919_v38 }
 0x962   :  { %4229 = shalt.err (!%p4226_p0)
}
 0x963   :  { %s4230_s20 = scalar_lea.hbm %s5700_s10, 1024 }
 0x964   :  { %p4231_p1 = scmp.ne.s32.totalorder %s5700_s10, %s4230_s20  ;;  %p4234_p2 = scmp.lt.u32.totalorder %s4230_s20, %s5700_s10 }
 0x966   :  { %p4236_p3 = pnand %p4234_p2, %p4231_p1 }
 0x968   :  { %4239 = shalt.err (!%p4236_p3)
}
 0x969   :  { %s4297_s24 = smov 128   ;;  %s4298_s2 = smov 8  }
 0x96a   :  { %2966 = dma.vmem_to_hbm [thread:$0]  %s2961_s16, 1024, %s5700_s10, [#allocation7], %s4297_s24, %s4297_s24, %s4298_s2  }
 0x96b   :  { %s4240_s22 = scalar_lea.vmem %s5657_s27, 256  ;;  %p4245_p5 = scmp.lt.s32.totalorder %s5657_s27, %s5657_s27 }
 0x96c   :  { %p4241_p4 = scmp.ne.s32.totalorder %s5657_s27, %s4240_s22  ;;  %p4246_p6 = scmp.lt.s32.totalorder %s4240_s22, %s4240_s22 }
 0x96e   :  { %p4247_p7 = por %p4246_p6, %p4245_p5 }
 0x970   :  { %p4248_p8 = pnand %p4247_p7, %p4241_p4 }
 0x972   :  { %4251 = shalt.err (!%p4248_p8)
}
 0x973   :  { %s4252_s28 = scalar_lea.hbm %s5701_s11, 256 }
 0x974   :  { %p4253_p9 = scmp.ne.s32.totalorder %s5701_s11, %s4252_s28  ;;  %p4256_p10 = scmp.lt.u32.totalorder %s4252_s28, %s5701_s11 }
 0x976   :  { %p4258_p11 = pnand %p4256_p10, %p4253_p9 }
 0x978   :  { %4261 = shalt.err (!%p4258_p11)
}
 0x979   :  { %2978 = dma.vmem_to_hbm [thread:$0]  %s5657_s27, 256, %s5701_s11, [#allocation24], %s4297_s24, %s4297_s24, %s4298_s2  }
 0x97a   :  { %4274 = dma.done.wait [#allocation7], 1024  }
 0x97b   :  { %4275 = vsyncadd [#allocation7], 4294966272 }
 0x97c   :  { %4276 = dma.done.wait [#allocation24], 256  }
 0x97d   :  { %4277 = vsyncadd [#allocation24], 4294967040 }
 0x97e   :  { %2985 = vsyncpa [#allocation6], 1 }
 0x97f   :  { %2986 = vsyncpa [#allocation9], 1 }
 0x980   :  { %2987 = vsyncpa [#allocation12], 1 }
 0x981   :  { %2988 = vsyncpa [#allocation15], 1 }
 0x982   :  { %2989 = vsyncpa [#allocation18], 1 }
 0x983   :  { %2990 = vsyncpa [#allocation21], 1 }
 0x984   :  { %2991 = vsyncpa [#allocation7], 1 }
 0x985   :  { %2992 = vsyncpa [#allocation24], 1 }

</bundles_post_ra>
